<compile_context>
chip_gen: v7x
topology: tpu7x:2x2x1
jax: 0.10.0
libtpu: 0.0.40
codegen_flags: <defaults>
</compile_context>

<pallas_src>
import jax
import jax.numpy as jnp
from jax import lax
from jax.experimental import pallas as pl
from jax.experimental.pallas import tpu as pltpu
import numpy as np


def _fm_kernel(gbias_ref, emb_t_ref, sqn_ref, bias_ref, feat_ref, val_ref,
               out_ref):
    # gbias_ref: (1, 1)  SMEM  -- global bias self.bias_
    # emb_t_ref: (K, N)  VMEM  -- embedding table, transposed (factors x ids)
    # sqn_ref:   (N, 1)  VMEM  -- per-id squared L2 norm of the embedding rows
    # bias_ref:  (N, 1)  VMEM  -- per-id bias table
    # feat_ref:  (F, TB) VMEM  -- feature indices, batch tile on lanes
    # val_ref:   (F, TB) VMEM  -- feature values,  batch tile on lanes
    # out_ref:   (1, TB) VMEM  -- lane-dense scores
    feat = feat_ref[...]                                   # (F, TB) int32
    val = val_ref[...]                                     # (F, TB) f32
    n_ids = emb_t_ref.shape[1]
    num_fields, tb = feat.shape

    row_ids = lax.broadcasted_iota(jnp.int32, (n_ids, tb), 0)

    # Densify the sparse (index, value) pairs: VPU compares/selects only,
    # no cross-lane work, no gather.
    w = jnp.zeros((n_ids, tb), jnp.float32)
    w2 = jnp.zeros((n_ids, tb), jnp.float32)
    for f in range(num_fields):                            # static unroll, F small
        idx_f = feat[f:f + 1, :]                           # (1, TB)
        v_f = val[f:f + 1, :]                              # (1, TB)
        hit = row_ids == idx_f                             # (N, TB) bool
        w = w + jnp.where(hit, v_f, 0.0)
        w2 = w2 + jnp.where(hit, v_f * v_f, 0.0)

    # s[k, t] = sum_f value[t, f] * E[feature[t, f], k]
    s = jnp.dot(emb_t_ref[...], w,
                preferred_element_type=jnp.float32,
                precision=lax.Precision.HIGHEST)           # (K, TB)

    sum_square = jnp.sum(s * s, axis=0, keepdims=True)                 # (1, TB)
    square_sum = jnp.sum(sqn_ref[...] * w2, axis=0, keepdims=True)     # (1, TB)
    feat_bias = jnp.sum(bias_ref[...] * w, axis=0, keepdims=True)      # (1, TB)

    out_ref[...] = 0.5 * (sum_square - square_sum) + feat_bias + gbias_ref[0, 0]


def pointfm_forward(features, feature_values, emb_table, bias_table,
                    global_bias, *, tile_b=512):
    """features: (B, F) int32; feature_values: (B, F) f32 -> (B,) f32."""
    B, F = features.shape
    N, K = emb_table.shape
    assert tile_b % 128 == 0, "tile_b must be a multiple of 128 (lane-dense)"

    # Pad batch to a multiple of tile_b (pad rows: index 0 / value 0 -> score
    # reduces to the global bias and is sliced off below).
    B_pad = ((B + tile_b - 1) // tile_b) * tile_b
    pad = B_pad - B
    featT = jnp.pad(features.astype(jnp.int32), ((0, pad), (0, 0))).T      # (F, B_pad)
    valT = jnp.pad(feature_values.astype(jnp.float32), ((0, pad), (0, 0))).T

    # Tiny per-table preprocessing (glue); tables stay VMEM-resident in-kernel.
    emb_f32 = emb_table.astype(jnp.float32)
    emb_t = emb_f32.T                                                     # (K, N)
    sqn = jnp.sum(emb_f32 * emb_f32, axis=1, keepdims=True)               # (N, 1)
    bcol = bias_table.astype(jnp.float32).reshape(N, 1)                   # (N, 1)
    gbias = global_bias.reshape(1, 1).astype(jnp.float32)                 # (1, 1)

    grid = (B_pad // tile_b,)
    out = pl.pallas_call(
        _fm_kernel,
        out_shape=jax.ShapeDtypeStruct((1, B_pad), jnp.float32),
        grid=grid,
        in_specs=[
            pl.BlockSpec(memory_space=pltpu.MemorySpace.SMEM),    # global bias
            pl.BlockSpec((K, N), lambda i: (0, 0)),               # emb_table^T
            pl.BlockSpec((N, 1), lambda i: (0, 0)),               # row sq-norms
            pl.BlockSpec((N, 1), lambda i: (0, 0)),               # bias table
            pl.BlockSpec((F, tile_b), lambda i: (0, i)),          # feature ids
            pl.BlockSpec((F, tile_b), lambda i: (0, i)),          # feature vals
        ],
        out_specs=pl.BlockSpec((1, tile_b), lambda i: (0, i)),
        compiler_params=pltpu.CompilerParams(
            dimension_semantics=("parallel",)),
    )(gbias, emb_t, sqn, bcol, featT, valT)

    return out.reshape(-1)[:B]


def pointfm_reference(features, feature_values, emb_table, bias_table,
                      global_bias):
    e = emb_table[features] * feature_values[..., None]
    sum_sq = jnp.sum(e, axis=1) ** 2
    sq_sum = jnp.sum(e ** 2, axis=1)
    fm = 0.5 * (sum_sq - sq_sum)
    fm = jnp.sum(fm, axis=1, keepdims=True)
    fb = jnp.sum(bias_table[features][..., 0] * feature_values, axis=1,
                 keepdims=True)
    return (fm + fb + global_bias).reshape(-1)


if __name__ == "__main__":
    # Small shapes consistent with the module's forward.
    num_features = 64      # size of embedding tables
    num_factors = 32       # K (hidden factors)
    B = 16                 # batch
    F = 8                  # nonzero features per example

    key = jax.random.PRNGKey(0)
    k_emb, k_bias, k_idx, k_val, k_idx2, k_val2 = jax.random.split(key, 6)

    # Embeddings ~ N(0, 0.01) as in __init__; biases made nonzero here (the
    # module inits them to 0) purely to exercise the bias code paths.
    emb_table = 0.01 * jax.random.normal(k_emb, (num_features, num_factors),
                                         dtype=jnp.float32)
    bias_table = 0.01 * jax.random.normal(k_bias, (num_features, 1),
                                          dtype=jnp.float32)
    global_bias = jnp.array([0.1], dtype=jnp.float32)

    features = jax.random.randint(k_idx, (B, F), 0, num_features,
                                  dtype=jnp.int32)
    feature_values = jax.random.uniform(k_val, (B, F), dtype=jnp.float32)

    out = jax.block_until_ready(
        pointfm_forward(features, feature_values, emb_table, bias_table,
                        global_bias))
    ref = pointfm_reference(features, feature_values, emb_table, bias_table,
                            global_bias)
    np.testing.assert_allclose(np.asarray(out), np.asarray(ref),
                               rtol=1e-4, atol=2e-6)

    # Ragged batch + multi-tile grid path.
    B2 = 300
    features2 = jax.random.randint(k_idx2, (B2, F), 0, num_features,
                                   dtype=jnp.int32)
    feature_values2 = jax.random.uniform(k_val2, (B2, F), dtype=jnp.float32)
    out2 = jax.block_until_ready(
        pointfm_forward(features2, feature_values2, emb_table, bias_table,
                        global_bias, tile_b=128))
    ref2 = pointfm_reference(features2, feature_values2, emb_table, bias_table,
                             global_bias)
    np.testing.assert_allclose(np.asarray(out2), np.asarray(ref2),
                               rtol=1e-4, atol=2e-6)

    print("KERNEL_OK")
</pallas_src>

<mosaic_0001>
module attributes {stable_mosaic.version = 11 : i64} {
  func.func @_fm_kernel(%arg0: i32, %arg1: memref<1x1xf32, #tpu.memory_space<smem>>, %arg2: memref<32x64xf32, #tpu.memory_space<vmem>>, %arg3: memref<64x1xf32, #tpu.memory_space<vmem>>, %arg4: memref<64x1xf32, #tpu.memory_space<vmem>>, %arg5: memref<8x512xi32, #tpu.memory_space<vmem>>, %arg6: memref<8x512xf32, #tpu.memory_space<vmem>>, %arg7: memref<1x512xf32, #tpu.memory_space<vmem>>) attributes {dimension_semantics = [#tpu.dimension_semantics<parallel>], iteration_bounds = array<i64: 1>, scalar_prefetch = 0 : i64, scratch_operands = 0 : i64, tpu.core_type = #tpu.core_type<tc>, window_params = [{transform_indices = @transform_0, window_bounds = array<i64: 1, 1>}, {pipeline_mode = #tpu.pipeline_mode<synchronous>, transform_indices = @transform_1, window_bounds = array<i64: 32, 64>}, {pipeline_mode = #tpu.pipeline_mode<synchronous>, transform_indices = @transform_2, window_bounds = array<i64: 64, 1>}, {pipeline_mode = #tpu.pipeline_mode<synchronous>, transform_indices = @transform_3, window_bounds = array<i64: 64, 1>}, {transform_indices = @transform_4, window_bounds = array<i64: 8, 512>}, {transform_indices = @transform_5, window_bounds = array<i64: 8, 512>}, {transform_indices = @transform_6, window_bounds = array<i64: 1, 512>}]} {
    %c0 = arith.constant 0 : index
    %c0_0 = arith.constant 0 : index
    %0 = vector.load %arg5[%c0, %c0_0] : memref<8x512xi32, #tpu.memory_space<vmem>>, vector<8x512xi32>
    %c0_1 = arith.constant 0 : index
    %c0_2 = arith.constant 0 : index
    %1 = vector.load %arg6[%c0_1, %c0_2] : memref<8x512xf32, #tpu.memory_space<vmem>>, vector<8x512xf32>
    %2 = tpu.iota {dimensions = array<i32: 0>} : vector<64x512xi32>
    %cst = arith.constant 0.000000e+00 : f32
    %3 = vector.broadcast %cst : f32 to vector<64x512xf32>
    %cst_3 = arith.constant 0.000000e+00 : f32
    %4 = vector.broadcast %cst_3 : f32 to vector<64x512xf32>
    %5 = vector.extract_strided_slice %0 {offsets = [0, 0], sizes = [1, 512], strides = [1, 1]} : vector<8x512xi32> to vector<1x512xi32>
    %6 = vector.extract_strided_slice %1 {offsets = [0, 0], sizes = [1, 512], strides = [1, 1]} : vector<8x512xf32> to vector<1x512xf32>
    %7 = vector.broadcast %5 : vector<1x512xi32> to vector<64x512xi32>
    %8 = arith.cmpi eq, %2, %7 : vector<64x512xi32>
    %cst_4 = arith.constant 0.000000e+00 : f32
    %9 = vector.shape_cast %6 : vector<1x512xf32> to vector<1x512xf32>
    %10 = vector.broadcast %9 : vector<1x512xf32> to vector<64x512xf32>
    %11 = vector.broadcast %cst_4 : f32 to vector<64x512xf32>
    %12 = arith.select %8, %10, %11 : vector<64x512xi1>, vector<64x512xf32>
    %13 = arith.addf %3, %12 : vector<64x512xf32>
    %14 = arith.mulf %6, %6 : vector<1x512xf32>
    %cst_5 = arith.constant 0.000000e+00 : f32
    %15 = vector.shape_cast %14 : vector<1x512xf32> to vector<1x512xf32>
    %16 = vector.broadcast %15 : vector<1x512xf32> to vector<64x512xf32>
    %17 = vector.broadcast %cst_5 : f32 to vector<64x512xf32>
    %18 = arith.select %8, %16, %17 : vector<64x512xi1>, vector<64x512xf32>
    %19 = arith.addf %4, %18 : vector<64x512xf32>
    %20 = vector.extract_strided_slice %0 {offsets = [1, 0], sizes = [1, 512], strides = [1, 1]} : vector<8x512xi32> to vector<1x512xi32>
    %21 = vector.extract_strided_slice %1 {offsets = [1, 0], sizes = [1, 512], strides = [1, 1]} : vector<8x512xf32> to vector<1x512xf32>
    %22 = vector.broadcast %20 : vector<1x512xi32> to vector<64x512xi32>
    %23 = arith.cmpi eq, %2, %22 : vector<64x512xi32>
    %cst_6 = arith.constant 0.000000e+00 : f32
    %24 = vector.shape_cast %21 : vector<1x512xf32> to vector<1x512xf32>
    %25 = vector.broadcast %24 : vector<1x512xf32> to vector<64x512xf32>
    %26 = vector.broadcast %cst_6 : f32 to vector<64x512xf32>
    %27 = arith.select %23, %25, %26 : vector<64x512xi1>, vector<64x512xf32>
    %28 = arith.addf %13, %27 : vector<64x512xf32>
    %29 = arith.mulf %21, %21 : vector<1x512xf32>
    %cst_7 = arith.constant 0.000000e+00 : f32
    %30 = vector.shape_cast %29 : vector<1x512xf32> to vector<1x512xf32>
    %31 = vector.broadcast %30 : vector<1x512xf32> to vector<64x512xf32>
    %32 = vector.broadcast %cst_7 : f32 to vector<64x512xf32>
    %33 = arith.select %23, %31, %32 : vector<64x512xi1>, vector<64x512xf32>
    %34 = arith.addf %19, %33 : vector<64x512xf32>
    %35 = vector.extract_strided_slice %0 {offsets = [2, 0], sizes = [1, 512], strides = [1, 1]} : vector<8x512xi32> to vector<1x512xi32>
    %36 = vector.extract_strided_slice %1 {offsets = [2, 0], sizes = [1, 512], strides = [1, 1]} : vector<8x512xf32> to vector<1x512xf32>
    %37 = vector.broadcast %35 : vector<1x512xi32> to vector<64x512xi32>
    %38 = arith.cmpi eq, %2, %37 : vector<64x512xi32>
    %cst_8 = arith.constant 0.000000e+00 : f32
    %39 = vector.shape_cast %36 : vector<1x512xf32> to vector<1x512xf32>
    %40 = vector.broadcast %39 : vector<1x512xf32> to vector<64x512xf32>
    %41 = vector.broadcast %cst_8 : f32 to vector<64x512xf32>
    %42 = arith.select %38, %40, %41 : vector<64x512xi1>, vector<64x512xf32>
    %43 = arith.addf %28, %42 : vector<64x512xf32>
    %44 = arith.mulf %36, %36 : vector<1x512xf32>
    %cst_9 = arith.constant 0.000000e+00 : f32
    %45 = vector.shape_cast %44 : vector<1x512xf32> to vector<1x512xf32>
    %46 = vector.broadcast %45 : vector<1x512xf32> to vector<64x512xf32>
    %47 = vector.broadcast %cst_9 : f32 to vector<64x512xf32>
    %48 = arith.select %38, %46, %47 : vector<64x512xi1>, vector<64x512xf32>
    %49 = arith.addf %34, %48 : vector<64x512xf32>
    %50 = vector.extract_strided_slice %0 {offsets = [3, 0], sizes = [1, 512], strides = [1, 1]} : vector<8x512xi32> to vector<1x512xi32>
    %51 = vector.extract_strided_slice %1 {offsets = [3, 0], sizes = [1, 512], strides = [1, 1]} : vector<8x512xf32> to vector<1x512xf32>
    %52 = vector.broadcast %50 : vector<1x512xi32> to vector<64x512xi32>
    %53 = arith.cmpi eq, %2, %52 : vector<64x512xi32>
    %cst_10 = arith.constant 0.000000e+00 : f32
    %54 = vector.shape_cast %51 : vector<1x512xf32> to vector<1x512xf32>
    %55 = vector.broadcast %54 : vector<1x512xf32> to vector<64x512xf32>
    %56 = vector.broadcast %cst_10 : f32 to vector<64x512xf32>
    %57 = arith.select %53, %55, %56 : vector<64x512xi1>, vector<64x512xf32>
    %58 = arith.addf %43, %57 : vector<64x512xf32>
    %59 = arith.mulf %51, %51 : vector<1x512xf32>
    %cst_11 = arith.constant 0.000000e+00 : f32
    %60 = vector.shape_cast %59 : vector<1x512xf32> to vector<1x512xf32>
    %61 = vector.broadcast %60 : vector<1x512xf32> to vector<64x512xf32>
    %62 = vector.broadcast %cst_11 : f32 to vector<64x512xf32>
    %63 = arith.select %53, %61, %62 : vector<64x512xi1>, vector<64x512xf32>
    %64 = arith.addf %49, %63 : vector<64x512xf32>
    %65 = vector.extract_strided_slice %0 {offsets = [4, 0], sizes = [1, 512], strides = [1, 1]} : vector<8x512xi32> to vector<1x512xi32>
    %66 = vector.extract_strided_slice %1 {offsets = [4, 0], sizes = [1, 512], strides = [1, 1]} : vector<8x512xf32> to vector<1x512xf32>
    %67 = vector.broadcast %65 : vector<1x512xi32> to vector<64x512xi32>
    %68 = arith.cmpi eq, %2, %67 : vector<64x512xi32>
    %cst_12 = arith.constant 0.000000e+00 : f32
    %69 = vector.shape_cast %66 : vector<1x512xf32> to vector<1x512xf32>
    %70 = vector.broadcast %69 : vector<1x512xf32> to vector<64x512xf32>
    %71 = vector.broadcast %cst_12 : f32 to vector<64x512xf32>
    %72 = arith.select %68, %70, %71 : vector<64x512xi1>, vector<64x512xf32>
    %73 = arith.addf %58, %72 : vector<64x512xf32>
    %74 = arith.mulf %66, %66 : vector<1x512xf32>
    %cst_13 = arith.constant 0.000000e+00 : f32
    %75 = vector.shape_cast %74 : vector<1x512xf32> to vector<1x512xf32>
    %76 = vector.broadcast %75 : vector<1x512xf32> to vector<64x512xf32>
    %77 = vector.broadcast %cst_13 : f32 to vector<64x512xf32>
    %78 = arith.select %68, %76, %77 : vector<64x512xi1>, vector<64x512xf32>
    %79 = arith.addf %64, %78 : vector<64x512xf32>
    %80 = vector.extract_strided_slice %0 {offsets = [5, 0], sizes = [1, 512], strides = [1, 1]} : vector<8x512xi32> to vector<1x512xi32>
    %81 = vector.extract_strided_slice %1 {offsets = [5, 0], sizes = [1, 512], strides = [1, 1]} : vector<8x512xf32> to vector<1x512xf32>
    %82 = vector.broadcast %80 : vector<1x512xi32> to vector<64x512xi32>
    %83 = arith.cmpi eq, %2, %82 : vector<64x512xi32>
    %cst_14 = arith.constant 0.000000e+00 : f32
    %84 = vector.shape_cast %81 : vector<1x512xf32> to vector<1x512xf32>
    %85 = vector.broadcast %84 : vector<1x512xf32> to vector<64x512xf32>
    %86 = vector.broadcast %cst_14 : f32 to vector<64x512xf32>
    %87 = arith.select %83, %85, %86 : vector<64x512xi1>, vector<64x512xf32>
    %88 = arith.addf %73, %87 : vector<64x512xf32>
    %89 = arith.mulf %81, %81 : vector<1x512xf32>
    %cst_15 = arith.constant 0.000000e+00 : f32
    %90 = vector.shape_cast %89 : vector<1x512xf32> to vector<1x512xf32>
    %91 = vector.broadcast %90 : vector<1x512xf32> to vector<64x512xf32>
    %92 = vector.broadcast %cst_15 : f32 to vector<64x512xf32>
    %93 = arith.select %83, %91, %92 : vector<64x512xi1>, vector<64x512xf32>
    %94 = arith.addf %79, %93 : vector<64x512xf32>
    %95 = vector.extract_strided_slice %0 {offsets = [6, 0], sizes = [1, 512], strides = [1, 1]} : vector<8x512xi32> to vector<1x512xi32>
    %96 = vector.extract_strided_slice %1 {offsets = [6, 0], sizes = [1, 512], strides = [1, 1]} : vector<8x512xf32> to vector<1x512xf32>
    %97 = vector.broadcast %95 : vector<1x512xi32> to vector<64x512xi32>
    %98 = arith.cmpi eq, %2, %97 : vector<64x512xi32>
    %cst_16 = arith.constant 0.000000e+00 : f32
    %99 = vector.shape_cast %96 : vector<1x512xf32> to vector<1x512xf32>
    %100 = vector.broadcast %99 : vector<1x512xf32> to vector<64x512xf32>
    %101 = vector.broadcast %cst_16 : f32 to vector<64x512xf32>
    %102 = arith.select %98, %100, %101 : vector<64x512xi1>, vector<64x512xf32>
    %103 = arith.addf %88, %102 : vector<64x512xf32>
    %104 = arith.mulf %96, %96 : vector<1x512xf32>
    %cst_17 = arith.constant 0.000000e+00 : f32
    %105 = vector.shape_cast %104 : vector<1x512xf32> to vector<1x512xf32>
    %106 = vector.broadcast %105 : vector<1x512xf32> to vector<64x512xf32>
    %107 = vector.broadcast %cst_17 : f32 to vector<64x512xf32>
    %108 = arith.select %98, %106, %107 : vector<64x512xi1>, vector<64x512xf32>
    %109 = arith.addf %94, %108 : vector<64x512xf32>
    %110 = vector.extract_strided_slice %0 {offsets = [7, 0], sizes = [1, 512], strides = [1, 1]} : vector<8x512xi32> to vector<1x512xi32>
    %111 = vector.extract_strided_slice %1 {offsets = [7, 0], sizes = [1, 512], strides = [1, 1]} : vector<8x512xf32> to vector<1x512xf32>
    %112 = vector.broadcast %110 : vector<1x512xi32> to vector<64x512xi32>
    %113 = arith.cmpi eq, %2, %112 : vector<64x512xi32>
    %cst_18 = arith.constant 0.000000e+00 : f32
    %114 = vector.shape_cast %111 : vector<1x512xf32> to vector<1x512xf32>
    %115 = vector.broadcast %114 : vector<1x512xf32> to vector<64x512xf32>
    %116 = vector.broadcast %cst_18 : f32 to vector<64x512xf32>
    %117 = arith.select %113, %115, %116 : vector<64x512xi1>, vector<64x512xf32>
    %118 = arith.addf %103, %117 : vector<64x512xf32>
    %119 = arith.mulf %111, %111 : vector<1x512xf32>
    %cst_19 = arith.constant 0.000000e+00 : f32
    %120 = vector.shape_cast %119 : vector<1x512xf32> to vector<1x512xf32>
    %121 = vector.broadcast %120 : vector<1x512xf32> to vector<64x512xf32>
    %122 = vector.broadcast %cst_19 : f32 to vector<64x512xf32>
    %123 = arith.select %113, %121, %122 : vector<64x512xi1>, vector<64x512xf32>
    %124 = arith.addf %109, %123 : vector<64x512xf32>
    %c0_20 = arith.constant 0 : index
    %c0_21 = arith.constant 0 : index
    %125 = vector.load %arg2[%c0_20, %c0_21] : memref<32x64xf32, #tpu.memory_space<vmem>>, vector<32x64xf32>
    %cst_22 = arith.constant dense<0.000000e+00> : vector<32x512xf32>
    %126 = tpu.matmul %125, %118, %cst_22 {dimension_numbers = #tpu.dot_dimension_numbers<[1], [0], [0], [1], [0, 0, 1, 1], [], []>, precision = #tpu.contract_precision<fp32>} : vector<32x64xf32>, vector<64x512xf32>, vector<32x512xf32> -> vector<32x512xf32>
    %127 = arith.mulf %126, %126 : vector<32x512xf32>
    %cst_23 = arith.constant dense<0.000000e+00> : vector<512xf32>
    %128 = vector.multi_reduction <add>, %127, %cst_23 [0] : vector<32x512xf32> to vector<512xf32>
    %129 = vector.shape_cast %128 : vector<512xf32> to vector<1x512xf32>
    %c0_24 = arith.constant 0 : index
    %c0_25 = arith.constant 0 : index
    %130 = vector.load %arg3[%c0_24, %c0_25] : memref<64x1xf32, #tpu.memory_space<vmem>>, vector<64x1xf32>
    %131 = vector.broadcast %130 : vector<64x1xf32> to vector<64x512xf32>
    %132 = arith.mulf %131, %124 : vector<64x512xf32>
    %cst_26 = arith.constant dense<0.000000e+00> : vector<512xf32>
    %133 = vector.multi_reduction <add>, %132, %cst_26 [0] : vector<64x512xf32> to vector<512xf32>
    %134 = vector.shape_cast %133 : vector<512xf32> to vector<1x512xf32>
    %c0_27 = arith.constant 0 : index
    %c0_28 = arith.constant 0 : index
    %135 = vector.load %arg4[%c0_27, %c0_28] : memref<64x1xf32, #tpu.memory_space<vmem>>, vector<64x1xf32>
    %136 = vector.broadcast %135 : vector<64x1xf32> to vector<64x512xf32>
    %137 = arith.mulf %136, %118 : vector<64x512xf32>
    %cst_29 = arith.constant dense<0.000000e+00> : vector<512xf32>
    %138 = vector.multi_reduction <add>, %137, %cst_29 [0] : vector<64x512xf32> to vector<512xf32>
    %139 = vector.shape_cast %138 : vector<512xf32> to vector<1x512xf32>
    %140 = arith.subf %129, %134 : vector<1x512xf32>
    %cst_30 = arith.constant 5.000000e-01 : f32
    %141 = vector.broadcast %cst_30 : f32 to vector<1x512xf32>
    %142 = arith.mulf %141, %140 : vector<1x512xf32>
    %143 = arith.addf %142, %139 : vector<1x512xf32>
    %c0_31 = arith.constant 0 : index
    %c0_32 = arith.constant 0 : index
    %144 = memref.load %arg1[%c0_31, %c0_32] : memref<1x1xf32, #tpu.memory_space<smem>>
    %145 = vector.broadcast %144 : f32 to vector<1x512xf32>
    %146 = arith.addf %143, %145 : vector<1x512xf32>
    %c0_33 = arith.constant 0 : index
    %c0_34 = arith.constant 0 : index
    %147 = vector.load %arg7[%c0_33, %c0_34] : memref<1x512xf32, #tpu.memory_space<vmem>>, vector<1x512xf32>
    tpu.vector_store %arg7[%c0_33, %c0_34], %146 {strides = array<i32>} : memref<1x512xf32, #tpu.memory_space<vmem>>, vector<1x512xf32>,
    return
  }
  func.func @transform_0(%arg0: i32) -> (i32, i32) {
    %c0_i32 = arith.constant 0 : i32
    %c0_i32_0 = arith.constant 0 : i32
    %c0_i32_1 = arith.constant 0 : i32
    return %c0_i32, %c0_i32_0 : i32, i32
  }
  func.func @transform_1(%arg0: i32) -> (i32, i32) {
    %c0_i32 = arith.constant 0 : i32
    %c0_i32_0 = arith.constant 0 : i32
    %c0_i32_1 = arith.constant 0 : i32
    return %c0_i32, %c0_i32_0 : i32, i32
  }
  func.func @transform_2(%arg0: i32) -> (i32, i32) {
    %c0_i32 = arith.constant 0 : i32
    %c0_i32_0 = arith.constant 0 : i32
    %c0_i32_1 = arith.constant 0 : i32
    return %c0_i32, %c0_i32_0 : i32, i32
  }
  func.func @transform_3(%arg0: i32) -> (i32, i32) {
    %c0_i32 = arith.constant 0 : i32
    %c0_i32_0 = arith.constant 0 : i32
    %c0_i32_1 = arith.constant 0 : i32
    return %c0_i32, %c0_i32_0 : i32, i32
  }
  func.func @transform_4(%arg0: i32) -> (i32, i32) {
    %c0_i32 = arith.constant 0 : i32
    %c0_i32_0 = arith.constant 0 : i32
    return %c0_i32, %arg0 : i32, i32
  }
  func.func @transform_5(%arg0: i32) -> (i32, i32) {
    %c0_i32 = arith.constant 0 : i32
    %c0_i32_0 = arith.constant 0 : i32
    return %c0_i32, %arg0 : i32, i32
  }
  func.func @transform_6(%arg0: i32) -> (i32, i32) {
    %c0_i32 = arith.constant 0 : i32
    %c0_i32_0 = arith.constant 0 : i32
    return %c0_i32, %arg0 : i32, i32
  }
}

</mosaic_0001>

<bundles_post_ra>
// kernel: tpu_custom_call.1
= control target key start
LH: loop header
LB: loop body
LE: loop exit
PB: predicated region body
PF: predicated region fallthrough
CT: control target
= control target key end

     0   :  { %v8019_v0 = vlaneseq  ;;  %s7992_s0 = inlined_call_operand.<no memory space> [shape: f32[1,1], index: 0, kind: input, shape index: {}]   ;;  %s7993_s1 = inlined_call_operand.vmem [shape: f32[32,64], index: 1, kind: input, shape index: {}]   ;;  %s7994_s2 = inlined_call_operand.vmem [shape: f32[64,1], index: 2, kind: input, shape index: {}]   ;;  %s7995_s3 = inlined_call_operand.vmem [shape: f32[64,1], index: 3, kind: input, shape index: {}]   ;;  %s7996_s4 = inlined_call_operand.vmem [shape: s32[8,512], index: 4, kind: input, shape index: {}]   ;;  %s7997_s5 = inlined_call_operand.vmem [shape: f32[8,512], index: 5, kind: input, shape index: {}]   ;;  %s7998_s6 = inlined_call_operand.hbm [shape: f32[1,512], index: 6, kind: output, shape index: {}]  }
   0x2   :  { %v4043_v1 = vshrl.u32 %v8019_v0, 7 }
   0x4   :  { %8675 = vst [vmem:[#allocation6_spill] sm:$0xff] %v4043_v1 }
   0x5   :  { %12 = vsyncpa [#allocation4], 0  ;;  %v4048_v2 = vld [vmem:[%s7996_s4 + $0x8] sm:$0xff]  ;;  %v4056_v4 = vadd.s32 8, %v4043_v1  ;;  %v4059_v5 = vsub.s32 0, %v4043_v1  ;;  %v4062_v6 = vsub.s32 1, %v4043_v1 }
   0x6   :  { %v4053_v3 = vld [vmem:[%s7997_s5 + $0x8] sm:$0xff]  ;;  %v4065_v7 = vsub.s32 2, %v4043_v1  ;;  %v4068_v8 = vsub.s32 3, %v4043_v1  ;;  %v4071_v9 = vsub.s32 4, %v4043_v1  ;;  %v4074_v10 = vsub.s32 5, %v4043_v1  ;;  %v4194_v40 = vld [vmem:[%s7996_s4 + $0x18] sm:$0xff] }
   0x7   :  { %8676 = vst [vmem:[#allocation7_spill] sm:$0xff] %v4056_v4  ;;  %8677 = vst [vmem:[#allocation8_spill] sm:$0xff] %v4059_v5  ;;  %v4077_v11 = vsub.s32 6, %v4043_v1  ;;  %v4081_v12 = vrot.slane %v4048_v2, %v4059_v5  ;;  %v4085_v13 = vrot.slane %v4053_v3, %v4059_v5  ;;  %v4089_v14 = vrot.slane %v4048_v2, %v4062_v6  ;;  %v4215_v45 = vld [vmem:[%s7997_s5 + $0x18] sm:$0xff] }
   0x8   :  { %8678 = vst [vmem:[#allocation9_spill] sm:$0xff] %v4062_v6  ;;  %8679 = vst [vmem:[#allocation10_spill] sm:$0xff] %v4065_v7  ;;  %v4093_v15 = vrot.slane %v4053_v3, %v4062_v6  ;;  %v4097_v16 = vrot.slane %v4048_v2, %v4065_v7  ;;  %v4101_v17 = vrot.slane %v4053_v3, %v4065_v7  ;;  %v4230_v50 = vsub.s32 7, %v4043_v1 }
   0x9   :  { %8680 = vst [vmem:[#allocation11_spill] sm:$0xff] %v4068_v8  ;;  %8681 = vst [vmem:[#allocation12_spill] sm:$0xff] %v4071_v9  ;;  %v4105_v18 = vrot.slane %v4048_v2, %v4068_v8  ;;  %v4109_v19 = vrot.slane %v4053_v3, %v4068_v8  ;;  %vm59_vm0 = vcmp.eq.s32.totalorder %v4043_v1, %v4081_v12 }
   0xa   :  { %8682 = vst [vmem:[#allocation13_spill] sm:$0xff] %v4074_v10  ;;  %8683 = vst [vmem:[#allocation14_spill] sm:$0xff] %v4077_v11  ;;  %vm8010_vm1 = vcmp.eq.s32.totalorder %v4056_v4, %v4081_v12  ;;  %vm271_vm2 = vcmp.eq.s32.totalorder %v4043_v1, %v4089_v14  ;;  %vm8008_vm3 = vcmp.eq.s32.totalorder %v4056_v4, %v4089_v14  ;;  %v107_v20 = vsel %vm59_vm0, %v4085_v13, 0.0 }
   0xb   :  { %8684 = vst [vmem:[#allocation15_spill] sm:$0xff] %v4081_v12  ;;  %8685 = vst [vmem:[#allocation16_spill] sm:$0xff] %v4085_v13  ;;  %v111_v21 = vsel %vm8010_vm1, %v4085_v13, 0.0  ;;  %v319_v22 = vsel %vm271_vm2, %v4093_v15, 0.0  ;;  %v323_v23 = vsel %vm8008_vm3, %v4093_v15, 0.0  ;;  %vm479_vm4 = vcmp.eq.s32.totalorder %v4043_v1, %v4097_v16 }
   0xc   :  { %8686 = vst [vmem:[#allocation17_spill] sm:$0xff] %v4089_v14  ;;  %8687 = vst [vmem:[#allocation18_spill] sm:$0xff] %v4093_v15  ;;  %v351_v24 = vadd.f32 %v319_v22, %v107_v20  ;;  %v355_v25 = vadd.f32 %v323_v23, %v111_v21  ;;  %vm8004_vm5 = vcmp.eq.s32.totalorder %v4056_v4, %v4097_v16  ;;  %v527_v26 = vsel %vm479_vm4, %v4101_v17, 0.0 }
   0xd   :  { %8688 = vst [vmem:[#allocation19_spill] sm:$0xff] %v4097_v16  ;;  %8689 = vst [vmem:[#allocation20_spill] sm:$0xff] %v4101_v17  ;;  %v531_v27 = vsel %vm8004_vm5, %v4101_v17, 0.0  ;;  %vm8087_vm6 = vcmp.eq.s32.totalorder %v4043_v1, %v4105_v18  ;;  %vm8002_vm7 = vcmp.eq.s32.totalorder %v4056_v4, %v4105_v18  ;;  %v4161_v32 = vrot.slane %v4048_v2, %v4071_v9 }
   0xe   :  { %8690 = vst [vmem:[#allocation21_spill] sm:$0xff] %v4105_v18  ;;  %v559_v28 = vadd.f32 %v527_v26, %v351_v24  ;;  %v563_v29 = vadd.f32 %v531_v27, %v355_v25  ;;  %v735_v30 = vsel %vm8087_vm6, %v4109_v19, 0.0  ;;  %v739_v31 = vsel %vm8002_vm7, %v4109_v19, 0.0  ;;  %8694 = vst [vmem:[#allocation25_spill] sm:$0xff] %v4230_v50 }
   0xf   :  { %8691 = vst [vmem:[#allocation22_spill] sm:$0xff] %v4161_v32  ;;  %v4165_v33 = vrot.slane %v4053_v3, %v4071_v9  ;;  %v4169_v34 = vrot.slane %v4048_v2, %v4074_v10  ;;  %v4173_v35 = vrot.slane %v4053_v3, %v4074_v10  ;;  %v4177_v38 = vrot.slane %v4048_v2, %v4077_v11 }
  0x10   :  { %v767_v36 = vadd.f32 %v735_v30, %v559_v28  ;;  %v771_v37 = vadd.f32 %v739_v31, %v563_v29  ;;  %v4181_v39 = vrot.slane %v4053_v3, %v4077_v11  ;;  %vm8037_vm8 = vcmp.eq.s32.totalorder %v4043_v1, %v4161_v32 }
  0x11   :  { %8692 = vst [vmem:[#allocation23_spill] sm:$0xff] %v4169_v34  ;;  %8693 = vst [vmem:[#allocation24_spill] sm:$0xff] %v4177_v38  ;;  %vm8001_vm9 = vcmp.eq.s32.totalorder %v4056_v4, %v4161_v32  ;;  %vm8018_vm10 = vcmp.eq.s32.totalorder %v4043_v1, %v4169_v34  ;;  %vm8000_vm11 = vcmp.eq.s32.totalorder %v4056_v4, %v4169_v34  ;;  %v943_v41 = vsel %vm8037_vm8, %v4165_v33, 0.0 }
  0x12   :  { %v947_v42 = vsel %vm8001_vm9, %v4165_v33, 0.0  ;;  %v1151_v43 = vsel %vm8018_vm10, %v4173_v35, 0.0  ;;  %v1155_v44 = vsel %vm8000_vm11, %v4173_v35, 0.0  ;;  %v975_v46 = vadd.f32 %v943_v41, %v767_v36 }
  0x13   :  { %v979_v47 = vadd.f32 %v947_v42, %v771_v37  ;;  %vm8012_vm12 = vcmp.eq.s32.totalorder %v4043_v1, %v4177_v38  ;;  %vm7999_vm13 = vcmp.eq.s32.totalorder %v4056_v4, %v4177_v38  ;;  %v4234_v51 = vrot.slane %v4194_v40, %v4059_v5 }
  0x14   :  { %v1359_v48 = vsel %vm8012_vm12, %v4181_v39, 0.0  ;;  %v1363_v49 = vsel %vm7999_vm13, %v4181_v39, 0.0  ;;  %v1183_v52 = vadd.f32 %v1151_v43, %v975_v46  ;;  %v4238_v54 = vrot.slane %v4215_v45, %v4059_v5 }
  0x15   :  { %8695 = vst [vmem:[#allocation26_spill] sm:$0xff] %v4234_v51  ;;  %v1187_v53 = vadd.f32 %v1155_v44, %v979_v47  ;;  %v4242_v55 = vrot.slane %v4194_v40, %v4062_v6  ;;  %v4246_v56 = vrot.slane %v4048_v2, %v4230_v50  ;;  %v4250_v57 = vrot.slane %v4053_v3, %v4230_v50 }
  0x16   :  { %vm61_vm14 = vcmp.eq.s32.totalorder %v4043_v1, %v4234_v51  ;;  %vm8006_vm15 = vcmp.eq.s32.totalorder %v4056_v4, %v4234_v51  ;;  %v1391_v58 = vadd.f32 %v1359_v48, %v1183_v52  ;;  %v4282_v2 = vrot.slane %v4215_v45, %v4062_v6 }
  0x17   :  { %8696 = vst [vmem:[#allocation27_spill] sm:$0xff] %v4242_v55  ;;  %8697 = vst [vmem:[#allocation28_spill] sm:$0xff] %v4246_v56  ;;  %v1395_v59 = vadd.f32 %v1363_v49, %v1187_v53  ;;  %v109_v60 = vsel %vm61_vm14, %v4238_v54, 0.0  ;;  %v113_v61 = vsel %vm8006_vm15, %v4238_v54, 0.0  ;;  %vm8011_vm13 = vcmp.eq.s32.totalorder %v4043_v1, %v4246_v56 }
  0x18   :  { %vm8003_vm11 = vcmp.eq.s32.totalorder %v4056_v4, %v4246_v56  ;;  %vm273_vm9 = vcmp.eq.s32.totalorder %v4043_v1, %v4242_v55  ;;  %vm8005_vm7 = vcmp.eq.s32.totalorder %v4056_v4, %v4242_v55  ;;  %v1567_v62 = vsel %vm8011_vm13, %v4250_v57, 0.0 }
  0x19   :  { %v1571_v63 = vsel %vm8003_vm11, %v4250_v57, 0.0  ;;  %v4286_v3 = vrot.slane %v4194_v40, %v4065_v7  ;;  %v4288_v20 = vadd.f32 %v1567_v62, %v1391_v58  ;;  %v4294_v22 = vrot.slane %v4215_v45, %v4065_v7 }
  0x1a   :  { %v4290_v21 = vadd.f32 %v1571_v63, %v1395_v59  ;;  %v4298_v23 = vrot.slane %v4194_v40, %v4068_v8  ;;  %v321_v24 = vsel %vm273_vm9, %v4282_v2, 0.0  ;;  %v325_v25 = vsel %vm8005_vm7, %v4282_v2, 0.0 }
  0x1b   :  { %8698 = vst [vmem:[#allocation29_spill] sm:$0xff] %v4286_v3  ;;  %8699 = vst [vmem:[#allocation30_spill] sm:$0xff] %v4288_v20  ;;  %vm8108_vm11 = vcmp.eq.s32.totalorder %v4043_v1, %v4286_v3  ;;  %vm8007_vm5 = vcmp.eq.s32.totalorder %v4056_v4, %v4286_v3  ;;  %v1727_v26 = vand.u32 4294901760, %v4288_v20  ;;  %v353_v28 = vadd.f32 %v321_v24, %v109_v60  ;;  %v4394_v24 = vld [vmem:[%s7996_s4] sm:$0xff] }
  0x1c   :  { %8700 = vst [vmem:[#allocation31_spill] sm:$0xff] %v4290_v21  ;;  %8701 = vst [vmem:[#allocation32_spill] sm:$0xff] %v4298_v23  ;;  %v1731_v27 = vand.u32 4294901760, %v4290_v21  ;;  %v357_v29 = vadd.f32 %v325_v25, %v113_v61  ;;  %v529_v30 = vsel %vm8108_vm11, %v4294_v22, 0.0  ;;  %v533_v31 = vsel %vm8007_vm5, %v4294_v22, 0.0  ;;  %v4399_v25 = vld [vmem:[%s7997_s5] sm:$0xff] }
  0x1d   :  { %vm8071_vm7 = vcmp.eq.s32.totalorder %v4043_v1, %v4298_v23  ;;  %vm8009_vm15 = vcmp.eq.s32.totalorder %v4056_v4, %v4298_v23  ;;  %v4329_v37 = vsub.f32 %v4288_v20, %v1727_v26  ;;  %v561_v42 = vadd.f32 %v529_v30, %v353_v28 }
  0x1e   :  { %v4326_v36 = vpack.c.bf16 %v1731_v27, %v1727_v26  ;;  %v4332_v41 = vsub.f32 %v4290_v21, %v1731_v27  ;;  %v565_v43 = vadd.f32 %v533_v31, %v357_v29  ;;  %v4336_v44 = vrot.slane %v4215_v45, %v4068_v8 }
  0x1f   :  { %8703 = vst [vmem:[#allocation34_spill] sm:$0xff] %v4329_v37  ;;  %v4340_v46 = vrot.slane %v4194_v40, %v4071_v9  ;;  %v4344_v47 = vrot.slane %v4215_v45, %v4071_v9  ;;  %v4349_v48 = vrot.slane %v4194_v40, %v4074_v10  ;;  %v4353_v49 = vrot.slane %v4215_v45, %v4074_v10 }
  0x20   :  { %8702 = vst [vmem:[#allocation33_spill] sm:$0xff] %v4326_v36  ;;  %8704 = vst [vmem:[#allocation35_spill] sm:$0xff] %v4332_v41  ;;  %3698 = vmatprep.subr.bf16.mxu0 %v4326_v36  ;;  %v4357_v52 = vrot.slane %v4194_v40, %v4077_v11  ;;  %v4361_v53 = vrot.slane %v4215_v45, %v4077_v11  ;;  %v737_v58 = vsel %vm8071_vm7, %v4336_v44, 0.0  ;;  %v741_v59 = vsel %vm8009_vm15, %v4336_v44, 0.0 }
  0x21   :  { %8705 = vst [vmem:[#allocation36_spill] sm:$0xff] %v4340_v46  ;;  %8706 = vst [vmem:[#allocation37_spill] sm:$0xff] %v4349_v48  ;;  %vm8036_vm5 = vcmp.eq.s32.totalorder %v4043_v1, %v4340_v46  ;;  %vm8015_vm3 = vcmp.eq.s32.totalorder %v4056_v4, %v4340_v46  ;;  %v769_v60 = vadd.f32 %v737_v58, %v561_v42 }
  0x22   :  { %8707 = vst [vmem:[#allocation38_spill] sm:$0xff] %v4357_v52  ;;  %v773_v61 = vadd.f32 %v741_v59, %v565_v43  ;;  %v945_v62 = vsel %vm8036_vm5, %v4344_v47, 0.0  ;;  %v949_v63 = vsel %vm8015_vm3, %v4344_v47, 0.0  ;;  %vm8017_vm15 = vcmp.eq.s32.totalorder %v4043_v1, %v4349_v48 }
  0x23   :  { %vm8014_vm1 = vcmp.eq.s32.totalorder %v4056_v4, %v4349_v48  ;;  %vm8016_vm13 = vcmp.eq.s32.totalorder %v4043_v1, %v4357_v52  ;;  %vm8013_vm12 = vcmp.eq.s32.totalorder %v4056_v4, %v4357_v52  ;;  %v977_v26 = vadd.f32 %v945_v62, %v769_v60 }
  0x24   :  { %v981_v27 = vadd.f32 %v949_v63, %v773_v61  ;;  %v1153_v28 = vsel %vm8017_vm15, %v4353_v49, 0.0  ;;  %v1157_v29 = vsel %vm8014_vm1, %v4353_v49, 0.0  ;;  %v1361_v30 = vsel %vm8016_vm13, %v4361_v53, 0.0 }
  0x25   :  { %v1365_v31 = vsel %vm8013_vm12, %v4361_v53, 0.0  ;;  %v4419_v42 = vrot.slane %v4194_v40, %v4230_v50  ;;  %v4423_v43 = vrot.slane %v4215_v45, %v4230_v50  ;;  %v1185_v58 = vadd.f32 %v1153_v28, %v977_v26 }
  0x26   :  { %v1189_v59 = vadd.f32 %v1157_v29, %v981_v27  ;;  %v4427_v60 = vrot.slane %v4394_v24, %v4059_v5  ;;  %v4431_v61 = vrot.slane %v4399_v25, %v4059_v5  ;;  %v4439_v40 = vrot.slane %v4394_v24, %v4062_v6 }
  0x27   :  { %8708 = vst [vmem:[#allocation39_spill] sm:$0xff] %v4419_v42  ;;  %vm8029_vm12 = vcmp.eq.s32.totalorder %v4043_v1, %v4419_v42  ;;  %vm8021_vm1 = vcmp.eq.s32.totalorder %v4056_v4, %v4419_v42  ;;  %v4443_v45 = vrot.slane %v4399_v25, %v4062_v6  ;;  %v1393_v62 = vadd.f32 %v1361_v30, %v1185_v58 }
  0x28   :  { %8709 = vst [vmem:[#allocation40_spill] sm:$0xff] %v4427_v60  ;;  %8710 = vst [vmem:[#allocation41_spill] sm:$0xff] %v4439_v40  ;;  %v1397_v63 = vadd.f32 %v1365_v31, %v1189_v59  ;;  %v1569_v26 = vsel %vm8029_vm12, %v4423_v43, 0.0  ;;  %v1573_v27 = vsel %vm8021_vm1, %v4423_v43, 0.0  ;;  %vm58_vm3 = vcmp.eq.s32.totalorder %v4043_v1, %v4427_v60 }
  0x29   :  { %vm8028_vm13 = vcmp.eq.s32.totalorder %v4056_v4, %v4427_v60  ;;  %vm270_vm15 = vcmp.eq.s32.totalorder %v4043_v1, %v4439_v40  ;;  %vm8022_vm10 = vcmp.eq.s32.totalorder %v4056_v4, %v4439_v40  ;;  %v4461_v28 = vadd.f32 %v1569_v26, %v1393_v62 }
  0x2a   :  { %v4463_v29 = vadd.f32 %v1573_v27, %v1397_v63  ;;  %v106_v30 = vsel %vm58_vm3, %v4431_v61, 0.0  ;;  %v110_v31 = vsel %vm8028_vm13, %v4431_v61, 0.0  ;;  %v318_v58 = vsel %vm270_vm15, %v4443_v45, 0.0 }
  0x2b   :  { %8711 = vst [vmem:[#allocation42_spill] sm:$0xff] %v4461_v28  ;;  %v322_v59 = vsel %vm8022_vm10, %v4443_v45, 0.0  ;;  %v4483_v62 = vrot.slane %v4394_v24, %v4065_v7  ;;  %v4487_v63 = vrot.slane %v4399_v25, %v4065_v7  ;;  %v2521_v26 = vand.u32 4294901760, %v4461_v28 }
  0x2c   :  { %8712 = vst [vmem:[#allocation43_spill] sm:$0xff] %v4463_v29  ;;  %v2525_v27 = vand.u32 4294901760, %v4463_v29  ;;  %v350_v0 = vadd.f32 %v318_v58, %v106_v30  ;;  %v354_v21 = vadd.f32 %v322_v59, %v110_v31  ;;  %v4497_v20 = vrot.slane %v4394_v24, %v4068_v8 }
  0x2d   :  { %8713 = vst [vmem:[#allocation44_spill] sm:$0xff] %v4483_v62  ;;  %vm478_vm1 = vcmp.eq.s32.totalorder %v4043_v1, %v4483_v62  ;;  %vm8035_vm10 = vcmp.eq.s32.totalorder %v4056_v4, %v4483_v62  ;;  %v4501_v36 = vrot.slane %v4399_v25, %v4068_v8  ;;  %v4506_v37 = vsub.f32 %v4461_v28, %v2521_v26 }
  0x2e   :  { %8714 = vst [vmem:[#allocation45_spill] sm:$0xff] %v4497_v20  ;;  %v4503_v41 = vpack.c.bf16 %v2525_v27, %v2521_v26  ;;  %v4509_v30 = vsub.f32 %v4463_v29, %v2525_v27  ;;  %v526_v31 = vsel %vm478_vm1, %v4487_v63, 0.0  ;;  %v530_v58 = vsel %vm8035_vm10, %v4487_v63, 0.0 }
  0x2f   :  { %8715 = vst [vmem:[#allocation46_spill] sm:$0xff] %v4501_v36  ;;  %8717 = vst [vmem:[#allocation48_spill] sm:$0xff] %v4506_v37  ;;  %v558_v59 = vadd.f32 %v526_v31, %v350_v0  ;;  %vm8093_vm13 = vcmp.eq.s32.totalorder %v4043_v1, %v4497_v20  ;;  %vm8034_vm12 = vcmp.eq.s32.totalorder %v4056_v4, %v4497_v20 }
  0x30   :  { %8716 = vst [vmem:[#allocation47_spill] sm:$0xff] %v4503_v41  ;;  %8718 = vst [vmem:[#allocation49_spill] sm:$0xff] %v4509_v30  ;;  %3794 = vmatprep.subr.bf16.mxu1 %v4503_v41  ;;  %v562_v26 = vadd.f32 %v530_v58, %v354_v21  ;;  %v734_v27 = vsel %vm8093_vm13, %v4501_v36, 0.0  ;;  %v738_v29 = vsel %vm8034_vm12, %v4501_v36, 0.0  ;;  %v4534_v0 = vrot.slane %v4394_v24, %v4071_v9 }
  0x31   :  { %v766_v31 = vadd.f32 %v734_v27, %v558_v59  ;;  %v4538_v28 = vrot.slane %v4399_v25, %v4071_v9  ;;  %v4542_v21 = vrot.slane %v4394_v24, %v4074_v10  ;;  %v4546_v58 = vrot.slane %v4399_v25, %v4074_v10 }
  0x32   :  { %8719 = vst [vmem:[#allocation50_spill] sm:$0xff] %v4534_v0  ;;  %v770_v41 = vadd.f32 %v738_v29, %v562_v26  ;;  %vm8045_vm12 = vcmp.eq.s32.totalorder %v4043_v1, %v4534_v0  ;;  %vm8044_vm10 = vcmp.eq.s32.totalorder %v4056_v4, %v4534_v0  ;;  %v4554_v59 = vrot.slane %v4394_v24, %v4077_v11  ;;  %v4571_v26 = vld [vmem:[%s7996_s4 + $0x10] sm:$0xff] }
  0x33   :  { %8720 = vst [vmem:[#allocation51_spill] sm:$0xff] %v4538_v28  ;;  %8721 = vst [vmem:[#allocation52_spill] sm:$0xff] %v4542_v21  ;;  %v942_v27 = vsel %vm8045_vm12, %v4538_v28, 0.0  ;;  %v946_v29 = vsel %vm8044_vm10, %v4538_v28, 0.0  ;;  %vm8053_vm5 = vcmp.eq.s32.totalorder %v4043_v1, %v4542_v21  ;;  %vm8052_vm8 = vcmp.eq.s32.totalorder %v4056_v4, %v4542_v21 }
  0x34   :  { %8722 = vst [vmem:[#allocation53_spill] sm:$0xff] %v4546_v58  ;;  %8723 = vst [vmem:[#allocation54_spill] sm:$0xff] %v4554_v59  ;;  %v974_v30 = vadd.f32 %v942_v27, %v766_v31  ;;  %v978_v37 = vadd.f32 %v946_v29, %v770_v41  ;;  %v1150_v36 = vsel %vm8053_vm5, %v4546_v58, 0.0  ;;  %v1154_v28 = vsel %vm8052_vm8, %v4546_v58, 0.0  ;;  %v4600_v58 = vld [vmem:[%s7997_s5 + $0x10] sm:$0xff] }
  0x35   :  { %vm8055_vm10 = vcmp.eq.s32.totalorder %v4043_v1, %v4554_v59  ;;  %vm8054_vm12 = vcmp.eq.s32.totalorder %v4056_v4, %v4554_v59  ;;  %v4587_v31 = vrot.slane %v4399_v25, %v4077_v11  ;;  %v4591_v41 = vrot.slane %v4394_v24, %v4230_v50 }
  0x36   :  { %v1182_v27 = vadd.f32 %v1150_v36, %v974_v30  ;;  %v1186_v29 = vadd.f32 %v1154_v28, %v978_v37  ;;  %v4595_v21 = vrot.slane %v4399_v25, %v4230_v50  ;;  %v4604_v0 = vrot.slane %v4571_v26, %v4059_v5 }
  0x37   :  { %8724 = vst [vmem:[#allocation55_spill] sm:$0xff] %v4587_v31  ;;  %8725 = vst [vmem:[#allocation56_spill] sm:$0xff] %v4591_v41  ;;  %v1358_v24 = vsel %vm8055_vm10, %v4587_v31, 0.0  ;;  %v1362_v36 = vsel %vm8054_vm12, %v4587_v31, 0.0  ;;  %vm8063_vm8 = vcmp.eq.s32.totalorder %v4043_v1, %v4591_v41  ;;  %vm8062_vm5 = vcmp.eq.s32.totalorder %v4056_v4, %v4591_v41 }
  0x38   :  { %8726 = vst [vmem:[#allocation57_spill] sm:$0xff] %v4595_v21  ;;  %8727 = vst [vmem:[#allocation58_spill] sm:$0xff] %v4604_v0  ;;  %v1390_v37 = vadd.f32 %v1358_v24, %v1182_v27  ;;  %v1394_v25 = vadd.f32 %v1362_v36, %v1186_v29  ;;  %v1566_v28 = vsel %vm8063_vm8, %v4595_v21, 0.0  ;;  %v1570_v30 = vsel %vm8062_vm5, %v4595_v21, 0.0 }
  0x39   :  { %vm60_vm12 = vcmp.eq.s32.totalorder %v4043_v1, %v4604_v0  ;;  %vm8070_vm10 = vcmp.eq.s32.totalorder %v4056_v4, %v4604_v0  ;;  %v4632_v27 = vrot.slane %v4600_v58, %v4059_v5  ;;  %v4636_v29 = vrot.slane %v4571_v26, %v4062_v6 }
  0x3a   :  { %v4638_v24 = vadd.f32 %v1566_v28, %v1390_v37  ;;  %v4640_v36 = vadd.f32 %v1570_v30, %v1394_v25  ;;  %v4644_v21 = vrot.slane %v4600_v58, %v4062_v6  ;;  %v4648_v41 = vrot.slane %v4571_v26, %v4065_v7 }
  0x3b   :  { %8728 = vst [vmem:[#allocation59_spill] sm:$0xff] %v4632_v27  ;;  %8729 = vst [vmem:[#allocation60_spill] sm:$0xff] %v4636_v29  ;;  %v108_v5 = vsel %vm60_vm12, %v4632_v27, 0.0  ;;  %v112_v37 = vsel %vm8070_vm10, %v4632_v27, 0.0  ;;  %vm272_vm5 = vcmp.eq.s32.totalorder %v4043_v1, %v4636_v29  ;;  %vm8086_vm8 = vcmp.eq.s32.totalorder %v4056_v4, %v4636_v29 }
  0x3c   :  { %8730 = vst [vmem:[#allocation61_spill] sm:$0xff] %v4638_v24  ;;  %8731 = vst [vmem:[#allocation62_spill] sm:$0xff] %v4640_v36  ;;  %v1729_v25 = vand.u32 4294901760, %v4638_v24  ;;  %v1733_v28 = vand.u32 4294901760, %v4640_v36  ;;  %v320_v30 = vsel %vm272_vm5, %v4644_v21, 0.0  ;;  %v324_v6 = vsel %vm8086_vm8, %v4644_v21, 0.0 }
  0x3d   :  { %8732 = vst [vmem:[#allocation63_spill] sm:$0xff] %v4648_v41  ;;  %v352_v27 = vadd.f32 %v320_v30, %v108_v5  ;;  %v356_v0 = vadd.f32 %v324_v6, %v112_v37  ;;  %vm8109_vm10 = vcmp.eq.s32.totalorder %v4043_v1, %v4648_v41  ;;  %vm8092_vm7 = vcmp.eq.s32.totalorder %v4056_v4, %v4648_v41 }
  0x3e   :  { %v4676_v31 = vpack.c.bf16 %v1733_v28, %v1729_v25  ;;  %v4679_v59 = vsub.f32 %v4638_v24, %v1729_v25  ;;  %v4682_v20 = vsub.f32 %v4640_v36, %v1733_v28  ;;  %v4686_v29 = vrot.slane %v4600_v58, %v4065_v7 }
  0x3f   :  { %v4690_v5 = vrot.slane %v4571_v26, %v4068_v8  ;;  %v4694_v6 = vrot.slane %v4600_v58, %v4068_v8  ;;  %v4698_v37 = vrot.slane %v4571_v26, %v4071_v9  ;;  %v4702_v25 = vrot.slane %v4600_v58, %v4071_v9 }
  0x40   :  { %8733 = vst [vmem:[#allocation64_spill] sm:$0xff] %v4676_v31  ;;  %8734 = vst [vmem:[#allocation65_spill] sm:$0xff] %v4679_v59  ;;  %3700 = vmatpush1.bf16.msra.mxu0 %v4676_v31  ;;  %v528_v28 = vsel %vm8109_vm10, %v4686_v29, 0.0  ;;  %v532_v30 = vsel %vm8092_vm7, %v4686_v29, 0.0  ;;  %v4715_v36 = vrot.slane %v4571_v26, %v4074_v10  ;;  %v4719_v24 = vrot.slane %v4600_v58, %v4074_v10 }
  0x41   :  { %8735 = vst [vmem:[#allocation66_spill] sm:$0xff] %v4682_v20  ;;  %8736 = vst [vmem:[#allocation67_spill] sm:$0xff] %v4686_v29  ;;  %v560_v9 = vadd.f32 %v528_v28, %v352_v27  ;;  %v564_v8 = vadd.f32 %v532_v30, %v356_v0  ;;  %vm8095_vm8 = vcmp.eq.s32.totalorder %v4043_v1, %v4690_v5 }
  0x42   :  { %8737 = vst [vmem:[#allocation68_spill] sm:$0xff] %v4690_v5  ;;  %8738 = vst [vmem:[#allocation69_spill] sm:$0xff] %v4698_v37  ;;  %vm8094_vm6 = vcmp.eq.s32.totalorder %v4056_v4, %v4690_v5  ;;  %v736_v7 = vsel %vm8095_vm8, %v4694_v6, 0.0  ;;  %vm8100_vm7 = vcmp.eq.s32.totalorder %v4043_v1, %v4698_v37  ;;  %vm8099_vm13 = vcmp.eq.s32.totalorder %v4056_v4, %v4698_v37 }
  0x43   :  { %8739 = vst [vmem:[#allocation70_spill] sm:$0xff] %v4715_v36  ;;  %v740_v31 = vsel %vm8094_vm6, %v4694_v6, 0.0  ;;  %v768_v0 = vadd.f32 %v736_v7, %v560_v9  ;;  %v944_v28 = vsel %vm8100_vm7, %v4702_v25, 0.0  ;;  %v948_v30 = vsel %vm8099_vm13, %v4702_v25, 0.0 }
  0x44   :  { %v772_v27 = vadd.f32 %v740_v31, %v564_v8  ;;  %vm8105_vm6 = vcmp.eq.s32.totalorder %v4043_v1, %v4715_v36  ;;  %vm8104_vm8 = vcmp.eq.s32.totalorder %v4056_v4, %v4715_v36  ;;  %v4751_v7 = vrot.slane %v4571_v26, %v4077_v11 }
  0x45   :  { %v4755_v8 = vrot.slane %v4600_v58, %v4077_v11  ;;  %v976_v9 = vadd.f32 %v944_v28, %v768_v0  ;;  %v1152_v10 = vsel %vm8105_vm6, %v4719_v24, 0.0  ;;  %v1156_v20 = vsel %vm8104_vm8, %v4719_v24, 0.0 }
  0x46   :  { %8740 = vst [vmem:[#allocation71_spill] sm:$0xff] %v4751_v7  ;;  %v980_v31 = vadd.f32 %v948_v30, %v772_v27  ;;  %vm8107_vm13 = vcmp.eq.s32.totalorder %v4043_v1, %v4751_v7  ;;  %vm8106_vm7 = vcmp.eq.s32.totalorder %v4056_v4, %v4751_v7  ;;  %v4771_v0 = vrot.slane %v4571_v26, %v4230_v50 }
  0x47   :  { %8741 = vst [vmem:[#allocation72_spill] sm:$0xff] %v4755_v8  ;;  %v4775_v27 = vrot.slane %v4600_v58, %v4230_v50  ;;  %v1184_v28 = vadd.f32 %v1152_v10, %v976_v9  ;;  %v1360_v11 = vsel %vm8107_vm13, %v4755_v8, 0.0  ;;  %v1364_v59 = vsel %vm8106_vm7, %v4755_v8, 0.0 }
  0x48   :  { %8742 = vst [vmem:[#allocation73_spill] sm:$0xff] %v4771_v0  ;;  %v1188_v30 = vadd.f32 %v1156_v20, %v980_v31  ;;  %vm8113_vm8 = vcmp.eq.s32.totalorder %v4043_v1, %v4771_v0  ;;  %vm8112_vm6 = vcmp.eq.s32.totalorder %v4056_v4, %v4771_v0  ;;  %v4790_v58 = vadd.s32 16, %v4043_v1 }
  0x49   :  { %8743 = vst [vmem:[#allocation74_spill] sm:$0xff] %v4775_v27  ;;  %v4793_v10 = vadd.s32 24, %v4043_v1  ;;  %v1392_v20 = vadd.f32 %v1360_v11, %v1184_v28  ;;  %v1568_v9 = vsel %vm8113_vm8, %v4775_v27, 0.0  ;;  %v1572_v31 = vsel %vm8112_vm6, %v4775_v27, 0.0 }
  0x4a   :  { %8744 = vst [vmem:[#allocation75_spill] sm:$0xff] %v4790_v58  ;;  %v1396_v26 = vadd.f32 %v1364_v59, %v1188_v30  ;;  %vm8159_vm7 = vcmp.eq.s32.totalorder %v4790_v58, %v4081_v12  ;;  %vm8158_vm11 = vcmp.eq.s32.totalorder %v4790_v58, %v4089_v14  ;;  %vm8129_vm6 = vcmp.eq.s32.totalorder %v4790_v58, %v4097_v16 }
  0x4b   :  { %8745 = vst [vmem:[#allocation76_spill] sm:$0xff] %v4793_v10  ;;  %vm8121_vm13 = vcmp.eq.s32.totalorder %v4793_v10, %v4081_v12  ;;  %vm8120_vm10 = vcmp.eq.s32.totalorder %v4793_v10, %v4089_v14  ;;  %v4811_v11 = vadd.f32 %v1568_v9, %v1392_v20  ;;  %v115_v28 = vsel %vm8159_vm7, %v4085_v13, 0.0 }
  0x4c   :  { %v4813_v59 = vadd.f32 %v1572_v31, %v1396_v26  ;;  %v119_v30 = vsel %vm8121_vm13, %v4085_v13, 0.0  ;;  %v327_v4 = vsel %vm8158_vm11, %v4093_v15, 0.0  ;;  %v331_v20 = vsel %vm8120_vm10, %v4093_v15, 0.0 }
  0x4d   :  { %8746 = vst [vmem:[#allocation77_spill] sm:$0xff] %v4811_v11  ;;  %vm8128_vm8 = vcmp.eq.s32.totalorder %v4793_v10, %v4097_v16  ;;  %v2523_v26 = vand.u32 4294901760, %v4811_v11  ;;  %v359_v31 = vadd.f32 %v327_v4, %v115_v28  ;;  %v363_v50 = vadd.f32 %v331_v20, %v119_v30 }
  0x4e   :  { %8747 = vst [vmem:[#allocation78_spill] sm:$0xff] %v4813_v59  ;;  %v2527_v9 = vand.u32 4294901760, %v4813_v59  ;;  %v535_v13 = vsel %vm8129_vm6, %v4101_v17, 0.0  ;;  %v539_v15 = vsel %vm8128_vm8, %v4101_v17, 0.0  ;;  %vm8130_vm10 = vcmp.eq.s32.totalorder %v4790_v58, %v4105_v18 }
  0x4f   :  { %vm8131_vm13 = vcmp.eq.s32.totalorder %v4793_v10, %v4105_v18  ;;  %v4852_v4 = vsub.f32 %v4811_v11, %v2523_v26  ;;  %v567_v30 = vadd.f32 %v535_v13, %v359_v31  ;;  %v571_v20 = vadd.f32 %v539_v15, %v363_v50 }
  0x50   :  { %v4849_v14 = vpack.c.bf16 %v2527_v9, %v2523_v26  ;;  %v4855_v28 = vsub.f32 %v4813_v59, %v2527_v9  ;;  %v743_v17 = vsel %vm8130_vm10, %v4109_v19, 0.0  ;;  %v747_v16 = vsel %vm8131_vm13, %v4109_v19, 0.0 }
  0x51   :  { %8749 = vst [vmem:[#allocation80_spill] sm:$0xff] %v4852_v4  ;;  %vm8132_vm8 = vcmp.eq.s32.totalorder %v4790_v58, %v4161_v32  ;;  %v775_v26 = vadd.f32 %v743_v17, %v567_v30  ;;  %vm8133_vm6 = vcmp.eq.s32.totalorder %v4793_v10, %v4161_v32  ;;  %vm8135_vm10 = vcmp.eq.s32.totalorder %v4790_v58, %v4169_v34  ;;  %v8762_v4 = vld [vmem:[#allocation46_spill] sm:$0xff] }
  0x52   :  { %8748 = vst [vmem:[#allocation79_spill] sm:$0xff] %v4849_v14  ;;  %8750 = vst [vmem:[#allocation81_spill] sm:$0xff] %v4855_v28  ;;  %3796 = vmatpush1.bf16.msra.mxu1 %v4849_v14  ;;  %v951_v13 = vsel %vm8132_vm8, %v4165_v33, 0.0  ;;  %v779_v15 = vadd.f32 %v747_v16, %v571_v20  ;;  %v955_v50 = vsel %vm8133_vm6, %v4165_v33, 0.0  ;;  %vm8134_vm13 = vcmp.eq.s32.totalorder %v4793_v10, %v4169_v34 }
  0x53   :  { %v1159_v17 = vsel %vm8135_vm10, %v4173_v35, 0.0  ;;  %v983_v9 = vadd.f32 %v951_v13, %v775_v26  ;;  %v1163_v31 = vsel %vm8134_vm13, %v4173_v35, 0.0  ;;  %vm8136_vm8 = vcmp.eq.s32.totalorder %v4790_v58, %v4177_v38 }
  0x54   :  { %vm8137_vm6 = vcmp.eq.s32.totalorder %v4793_v10, %v4177_v38  ;;  %v987_v16 = vadd.f32 %v955_v50, %v779_v15  ;;  %v1367_v30 = vsel %vm8136_vm8, %v4181_v39, 0.0  ;;  %vm8139_vm13 = vcmp.eq.s32.totalorder %v4790_v58, %v4246_v56 }
  0x55   :  { %v1371_v20 = vsel %vm8137_vm6, %v4181_v39, 0.0  ;;  %v1191_v26 = vadd.f32 %v1159_v17, %v983_v9  ;;  %vm8140_vm10 = vcmp.eq.s32.totalorder %v4793_v10, %v4246_v56  ;;  %v1575_v13 = vsel %vm8139_vm13, %v4250_v57, 0.0 }
  0x56   :  { %vm8145_vm8 = vcmp.eq.s32.totalorder %v4790_v58, %v4234_v51  ;;  %v1195_v15 = vadd.f32 %v1163_v31, %v987_v16  ;;  %v1579_v50 = vsel %vm8140_vm10, %v4250_v57, 0.0  ;;  %vm8141_vm6 = vcmp.eq.s32.totalorder %v4793_v10, %v4234_v51 }
  0x57   :  { %v117_v17 = vsel %vm8145_vm8, %v4238_v54, 0.0  ;;  %v1399_v9 = vadd.f32 %v1367_v30, %v1191_v26  ;;  %v121_v59 = vsel %vm8141_vm6, %v4238_v54, 0.0  ;;  %vm8148_vm13 = vcmp.eq.s32.totalorder %v4790_v58, %v4242_v55 }
  0x58   :  { %vm8147_vm10 = vcmp.eq.s32.totalorder %v4793_v10, %v4242_v55  ;;  %v1403_v31 = vadd.f32 %v1371_v20, %v1195_v15  ;;  %v329_v16 = vsel %vm8148_vm13, %v4282_v2, 0.0  ;;  %vm8150_vm6 = vcmp.eq.s32.totalorder %v4790_v58, %v4286_v3 }
  0x59   :  { %v333_v30 = vsel %vm8147_vm10, %v4282_v2, 0.0  ;;  %v4940_v26 = vadd.f32 %v1575_v13, %v1399_v9  ;;  %v361_v11 = vadd.f32 %v329_v16, %v117_v17  ;;  %vm8149_vm8 = vcmp.eq.s32.totalorder %v4793_v10, %v4286_v3 }
  0x5a   :  { %v365_v14 = vadd.f32 %v333_v30, %v121_v59  ;;  %v4944_v20 = vadd.f32 %v1579_v50, %v1403_v31  ;;  %v537_v15 = vsel %vm8150_vm6, %v4294_v22, 0.0  ;;  %v541_v28 = vsel %vm8149_vm8, %v4294_v22, 0.0 }
  0x5b   :  { %8751 = vst [vmem:[#allocation82_spill] sm:$0xff] %v4940_v26  ;;  %vm8153_vm10 = vcmp.eq.s32.totalorder %v4790_v58, %v4298_v23  ;;  %v1735_v59 = vand.u32 4294901760, %v4940_v26  ;;  %v569_v13 = vadd.f32 %v537_v15, %v361_v11  ;;  %vm8152_vm13 = vcmp.eq.s32.totalorder %v4793_v10, %v4298_v23 }
  0x5c   :  { %8752 = vst [vmem:[#allocation83_spill] sm:$0xff] %v4944_v20  ;;  %v573_v17 = vadd.f32 %v541_v28, %v365_v14  ;;  %v1739_v50 = vand.u32 4294901760, %v4944_v20  ;;  %v745_v9 = vsel %vm8153_vm10, %v4336_v44, 0.0  ;;  %v749_v31 = vsel %vm8152_vm13, %v4336_v44, 0.0 }
  0x5d   :  { %vm8155_vm8 = vcmp.eq.s32.totalorder %v4790_v58, %v4340_v46  ;;  %v4971_v14 = vsub.f32 %v4940_v26, %v1735_v59  ;;  %v777_v11 = vadd.f32 %v745_v9, %v569_v13  ;;  %vm8154_vm6 = vcmp.eq.s32.totalorder %v4793_v10, %v4340_v46 }
  0x5e   :  { %v781_v28 = vadd.f32 %v749_v31, %v573_v17  ;;  %v4975_v16 = vpack.c.bf16 %v1739_v50, %v1735_v59  ;;  %v4978_v30 = vsub.f32 %v4944_v20, %v1739_v50  ;;  %v953_v15 = vsel %vm8155_vm8, %v4344_v47, 0.0 }
  0x5f   :  { %8753 = vst [vmem:[#allocation84_spill] sm:$0xff] %v4971_v14  ;;  %v957_v26 = vsel %vm8154_vm6, %v4344_v47, 0.0  ;;  %v985_v13 = vadd.f32 %v953_v15, %v777_v11  ;;  %vm8157_vm13 = vcmp.eq.s32.totalorder %v4790_v58, %v4349_v48  ;;  %vm8156_vm10 = vcmp.eq.s32.totalorder %v4793_v10, %v4349_v48 }
  0x60   :  { %8754 = vst [vmem:[#allocation85_spill] sm:$0xff] %v4975_v16  ;;  %8755 = vst [vmem:[#allocation86_spill] sm:$0xff] %v4978_v30  ;;  %v989_v17 = vadd.f32 %v957_v26, %v781_v28  ;;  %3702 = vmatprep.subr.bf16.mxu0 %v4975_v16  ;;  %v1161_v59 = vsel %vm8157_vm13, %v4353_v49, 0.0  ;;  %v1165_v50 = vsel %vm8156_vm10, %v4353_v49, 0.0  ;;  %vm8168_vm6 = vcmp.eq.s32.totalorder %v4790_v58, %v4357_v52 }
  0x61   :  { %vm8160_vm8 = vcmp.eq.s32.totalorder %v4793_v10, %v4357_v52  ;;  %v1193_v26 = vadd.f32 %v1161_v59, %v985_v13  ;;  %v1369_v31 = vsel %vm8168_vm6, %v4361_v53, 0.0  ;;  %vm8161_vm10 = vcmp.eq.s32.totalorder %v4790_v58, %v4419_v42 }
  0x62   :  { %v1197_v9 = vadd.f32 %v1165_v50, %v989_v17  ;;  %v1373_v11 = vsel %vm8160_vm8, %v4361_v53, 0.0  ;;  %vm8165_vm13 = vcmp.eq.s32.totalorder %v4793_v10, %v4419_v42  ;;  %vm8214_vm11 = vcmp.eq.s32.totalorder %v4790_v58, %v4427_v60 }
  0x63   :  { %vm8166_vm7 = vcmp.eq.s32.totalorder %v4793_v10, %v4427_v60  ;;  %v1401_v28 = vadd.f32 %v1369_v31, %v1193_v26  ;;  %v1577_v13 = vsel %vm8161_vm10, %v4423_v43, 0.0  ;;  %v1581_v17 = vsel %vm8165_vm13, %v4423_v43, 0.0 }
  0x64   :  { %v1405_v15 = vadd.f32 %v1373_v11, %v1197_v9  ;;  %v114_v59 = vsel %vm8214_vm11, %v4431_v61, 0.0  ;;  %v118_v50 = vsel %vm8166_vm7, %v4431_v61, 0.0  ;;  %vm8213_vm8 = vcmp.eq.s32.totalorder %v4790_v58, %v4439_v40 }
  0x65   :  { %vm8167_vm10 = vcmp.eq.s32.totalorder %v4793_v10, %v4439_v40  ;;  %v5041_v26 = vadd.f32 %v1577_v13, %v1401_v28  ;;  %v326_v31 = vsel %vm8213_vm8, %v4443_v45, 0.0  ;;  %vm8173_vm13 = vcmp.eq.s32.totalorder %v4790_v58, %v4483_v62 }
  0x66   :  { %v5043_v9 = vadd.f32 %v1581_v17, %v1405_v15  ;;  %v330_v11 = vsel %vm8167_vm10, %v4443_v45, 0.0  ;;  %v358_v20 = vadd.f32 %v326_v31, %v114_v59  ;;  %vm8172_vm7 = vcmp.eq.s32.totalorder %v4793_v10, %v4483_v62  ;;  %v8758_v31 = vld [vmem:[#allocation45_spill] sm:$0xff] }
  0x67   :  { %8756 = vst [vmem:[#allocation87_spill] sm:$0xff] %v5041_v26  ;;  %v362_v16 = vadd.f32 %v330_v11, %v118_v50  ;;  %v2529_v28 = vand.u32 4294901760, %v5041_v26  ;;  %v534_v13 = vsel %vm8173_vm13, %v4487_v63, 0.0  ;;  %v538_v17 = vsel %vm8172_vm7, %v4487_v63, 0.0 }
  0x68   :  { %8757 = vst [vmem:[#allocation88_spill] sm:$0xff] %v5043_v9  ;;  %v2533_v15 = vand.u32 4294901760, %v5043_v9  ;;  %v566_v59 = vadd.f32 %v534_v13, %v358_v20  ;;  %vm8177_vm10 = vcmp.eq.s32.totalorder %v4790_v58, %v8758_v31  ;;  %vm8176_vm6 = vcmp.eq.s32.totalorder %v4793_v10, %v8758_v31 }
  0x69   :  { %v570_v50 = vadd.f32 %v538_v17, %v362_v16  ;;  %v5074_v30 = vsub.f32 %v5041_v26, %v2529_v28  ;;  %v742_v20 = vsel %vm8177_vm10, %v8762_v4, 0.0  ;;  %v746_v16 = vsel %vm8176_vm6, %v8762_v4, 0.0  ;;  %v8763_v17 = vld [vmem:[#allocation50_spill] sm:$0xff] }
  0x6a   :  { %v5071_v11 = vpack.c.bf16 %v2533_v15, %v2529_v28  ;;  %v5077_v14 = vsub.f32 %v5043_v9, %v2533_v15  ;;  %v774_v13 = vadd.f32 %v742_v20, %v566_v59  ;;  %vm8179_vm7 = vcmp.eq.s32.totalorder %v4790_v58, %v8763_v17  ;;  %v8764_v15 = vld [vmem:[#allocation51_spill] sm:$0xff]  ;;  %v8765_v59 = vld [vmem:[#allocation52_spill] sm:$0xff] }
  0x6b   :  { %8760 = vst [vmem:[#allocation90_spill] sm:$0xff] %v5074_v30  ;;  %vm8183_vm13 = vcmp.eq.s32.totalorder %v4793_v10, %v8763_v17  ;;  %v778_v28 = vadd.f32 %v746_v16, %v570_v50  ;;  %v950_v9 = vsel %vm8179_vm7, %v8764_v15, 0.0  ;;  %vm8186_vm6 = vcmp.eq.s32.totalorder %v4790_v58, %v8765_v59  ;;  %v8767_v16 = vld [vmem:[#allocation54_spill] sm:$0xff] }
  0x6c   :  { %8759 = vst [vmem:[#allocation89_spill] sm:$0xff] %v5071_v11  ;;  %8761 = vst [vmem:[#allocation91_spill] sm:$0xff] %v5077_v14  ;;  %3798 = vmatprep.subr.bf16.mxu1 %v5071_v11  ;;  %v954_v26 = vsel %vm8183_vm13, %v8764_v15, 0.0  ;;  %v982_v20 = vadd.f32 %v950_v9, %v774_v13  ;;  %vm8187_vm10 = vcmp.eq.s32.totalorder %v4793_v10, %v8765_v59  ;;  %v8766_v14 = vld [vmem:[#allocation53_spill] sm:$0xff]  ;;  %v8768_v9 = vld [vmem:[#allocation55_spill] sm:$0xff] }
  0x6d   :  { %v1158_v50 = vsel %vm8186_vm6, %v8766_v14, 0.0  ;;  %vm8192_vm7 = vcmp.eq.s32.totalorder %v4790_v58, %v8767_v16  ;;  %v986_v11 = vadd.f32 %v954_v26, %v778_v28  ;;  %v1162_v30 = vsel %vm8187_vm10, %v8766_v14, 0.0  ;;  %v8769_v26 = vld [vmem:[#allocation56_spill] sm:$0xff]  ;;  %v8770_v14 = vld [vmem:[#allocation57_spill] sm:$0xff] }
  0x6e   :  { %vm8190_vm13 = vcmp.eq.s32.totalorder %v4793_v10, %v8767_v16  ;;  %v1366_v13 = vsel %vm8192_vm7, %v8768_v9, 0.0  ;;  %v1190_v15 = vadd.f32 %v1158_v50, %v982_v20  ;;  %vm8194_vm6 = vcmp.eq.s32.totalorder %v4790_v58, %v8769_v26  ;;  %v8771_v50 = vld [vmem:[#allocation58_spill] sm:$0xff]  ;;  %v8772_v16 = vld [vmem:[#allocation59_spill] sm:$0xff] }
  0x6f   :  { %v1370_v17 = vsel %vm8190_vm13, %v8768_v9, 0.0  ;;  %vm8197_vm10 = vcmp.eq.s32.totalorder %v4793_v10, %v8769_v26  ;;  %v1194_v28 = vadd.f32 %v1162_v30, %v986_v11  ;;  %v1574_v59 = vsel %vm8194_vm6, %v8770_v14, 0.0  ;;  %v8773_v11 = vld [vmem:[#allocation60_spill] sm:$0xff] }
  0x70   :  { %v1578_v20 = vsel %vm8197_vm10, %v8770_v14, 0.0  ;;  %vm8198_vm13 = vcmp.eq.s32.totalorder %v4790_v58, %v8771_v50  ;;  %v1398_v9 = vadd.f32 %v1366_v13, %v1190_v15  ;;  %vm8201_vm7 = vcmp.eq.s32.totalorder %v4793_v10, %v8771_v50 }
  0x71   :  { %v116_v30 = vsel %vm8198_vm13, %v8772_v16, 0.0  ;;  %vm8203_vm6 = vcmp.eq.s32.totalorder %v4790_v58, %v8773_v11  ;;  %v1402_v4 = vadd.f32 %v1370_v17, %v1194_v28  ;;  %v120_v14 = vsel %vm8201_vm7, %v8772_v16, 0.0 }
  0x72   :  { %vm8202_vm10 = vcmp.eq.s32.totalorder %v4793_v10, %v8773_v11  ;;  %v328_v15 = vsel %vm8203_vm6, %v4644_v21, 0.0  ;;  %v5156_v13 = vadd.f32 %v1574_v59, %v1398_v9  ;;  %vm8210_vm13 = vcmp.eq.s32.totalorder %v4790_v58, %v4648_v41 }
  0x73   :  { %v332_v17 = vsel %vm8202_vm10, %v4644_v21, 0.0  ;;  %v360_v28 = vadd.f32 %v328_v15, %v116_v30  ;;  %v5164_v16 = vadd.f32 %v1578_v20, %v1402_v4  ;;  %vm8204_vm7 = vcmp.eq.s32.totalorder %v4793_v10, %v4648_v41 }
  0x74   :  { %8774 = vst [vmem:[#allocation92_spill] sm:$0xff] %v5156_v13  ;;  %v364_v50 = vadd.f32 %v332_v17, %v120_v14  ;;  %v536_v59 = vsel %vm8210_vm13, %v4686_v29, 0.0  ;;  %v1737_v9 = vand.u32 4294901760, %v5156_v13  ;;  %v540_v30 = vsel %vm8204_vm7, %v4686_v29, 0.0 }
  0x75   :  { %8775 = vst [vmem:[#allocation93_spill] sm:$0xff] %v5164_v16  ;;  %v568_v15 = vadd.f32 %v536_v59, %v360_v28  ;;  %vm8207_vm10 = vcmp.eq.s32.totalorder %v4790_v58, %v4690_v5  ;;  %v1741_v4 = vand.u32 4294901760, %v5164_v16  ;;  %vm8209_vm6 = vcmp.eq.s32.totalorder %v4793_v10, %v4690_v5 }
  0x76   :  { %v572_v14 = vadd.f32 %v540_v30, %v364_v50  ;;  %v744_v20 = vsel %vm8207_vm10, %v4694_v6, 0.0  ;;  %v5187_v17 = vsub.f32 %v5156_v13, %v1737_v9  ;;  %v748_v28 = vsel %vm8209_vm6, %v4694_v6, 0.0 }
  0x77   :  { %v776_v59 = vadd.f32 %v744_v20, %v568_v15  ;;  %vm8212_vm7 = vcmp.eq.s32.totalorder %v4790_v58, %v4698_v37  ;;  %v5195_v50 = vpack.c.bf16 %v1741_v4, %v1737_v9  ;;  %v5198_v30 = vsub.f32 %v5164_v16, %v1741_v4 }
  0x78   :  { %8776 = vst [vmem:[#allocation94_spill] sm:$0xff] %v5187_v17  ;;  %v780_v29 = vadd.f32 %v748_v28, %v572_v14  ;;  %vm8211_vm10 = vcmp.eq.s32.totalorder %v4793_v10, %v4698_v37  ;;  %v952_v13 = vsel %vm8212_vm7, %v4702_v25, 0.0  ;;  %vm8274_vm6 = vcmp.eq.s32.totalorder %v4790_v58, %v4715_v36 }
  0x79   :  { %8777 = vst [vmem:[#allocation95_spill] sm:$0xff] %v5195_v50  ;;  %8778 = vst [vmem:[#allocation96_spill] sm:$0xff] %v5198_v30  ;;  %v956_v15 = vsel %vm8211_vm10, %v4702_v25, 0.0  ;;  %vm8223_vm13 = vcmp.eq.s32.totalorder %v4793_v10, %v4715_v36  ;;  %3704 = vmatpush1.bf16.msra.mxu0 %v5195_v50  ;;  %v984_v9 = vadd.f32 %v952_v13, %v776_v59  ;;  %v1160_v14 = vsel %vm8274_vm6, %v4719_v24, 0.0 }
  0x7a   :  { %v988_v4 = vadd.f32 %v956_v15, %v780_v29  ;;  %v1164_v20 = vsel %vm8223_vm13, %v4719_v24, 0.0  ;;  %vm8230_vm10 = vcmp.eq.s32.totalorder %v4790_v58, %v4751_v7  ;;  %vm8219_vm7 = vcmp.eq.s32.totalorder %v4793_v10, %v4751_v7 }
  0x7b   :  { %vm8224_vm8 = vcmp.eq.s32.totalorder %v4790_v58, %v4771_v0  ;;  %vm8220_vm11 = vcmp.eq.s32.totalorder %v4793_v10, %v4771_v0  ;;  %v1192_v29 = vadd.f32 %v1160_v14, %v984_v9  ;;  %v1368_v28 = vsel %vm8230_vm10, %v4755_v8, 0.0  ;;  %v8783_v10 = vld [vmem:[#allocation17_spill] sm:$0xff] }
  0x7c   :  { %v1196_v13 = vadd.f32 %v1164_v20, %v988_v4  ;;  %v1372_v59 = vsel %vm8219_vm7, %v4755_v8, 0.0  ;;  %v1576_v15 = vsel %vm8224_vm8, %v4775_v27, 0.0  ;;  %v1580_v9 = vsel %vm8220_vm11, %v4775_v27, 0.0 }
  0x7d   :  { %v5248_v4 = vadd.s32 32, %v4043_v1  ;;  %v5251_v14 = vadd.s32 40, %v4043_v1  ;;  %v1400_v20 = vadd.f32 %v1368_v28, %v1192_v29  ;;  %v5254_v50 = vadd.s32 48, %v4043_v1  ;;  %v8786_v28 = vld [vmem:[#allocation16_spill] sm:$0xff] }
  0x7e   :  { %v1404_v16 = vadd.f32 %v1372_v59, %v1196_v13  ;;  %v5257_v30 = vadd.s32 56, %v4043_v1  ;;  %v8787_v1 = vld [vmem:[#allocation18_spill] sm:$0xff] }
  0x7f   :  { %8779 = vst [vmem:[#allocation97_spill] sm:$0xff] %v5248_v4  ;;  %8780 = vst [vmem:[#allocation98_spill] sm:$0xff] %v5251_v14  ;;  %vm8231_vm7 = vcmp.eq.s32.totalorder %v5248_v4, %v4081_v12  ;;  %vm8239_vm11 = vcmp.eq.s32.totalorder %v5251_v14, %v4081_v12  ;;  %vm8273_vm13 = vcmp.eq.s32.totalorder %v5248_v4, %v8783_v10 }
  0x80   :  { %8781 = vst [vmem:[#allocation99_spill] sm:$0xff] %v5254_v50  ;;  %8782 = vst [vmem:[#allocation100_spill] sm:$0xff] %v5257_v30  ;;  %vm8238_vm8 = vcmp.eq.s32.totalorder %v5251_v14, %v8783_v10  ;;  %v5267_v29 = vadd.f32 %v1576_v15, %v1400_v20  ;;  %v5269_v13 = vadd.f32 %v1580_v9, %v1404_v16  ;;  %v123_v59 = vsel %vm8231_vm7, %v8786_v28, 0.0  ;;  %v8788_v15 = vld [vmem:[#allocation19_spill] sm:$0xff]  ;;  %v8789_v50 = vld [vmem:[#allocation20_spill] sm:$0xff] }
  0x81   :  { %v127_v58 = vsel %vm8239_vm11, %v8786_v28, 0.0  ;;  %v335_v17 = vsel %vm8273_vm13, %v8787_v1, 0.0  ;;  %v339_v16 = vsel %vm8238_vm8, %v8787_v1, 0.0  ;;  %vm8244_vm10 = vcmp.eq.s32.totalorder %v5248_v4, %v8788_v15 }
  0x82   :  { %8784 = vst [vmem:[#allocation101_spill] sm:$0xff] %v5267_v29  ;;  %8785 = vst [vmem:[#allocation102_spill] sm:$0xff] %v5269_v13  ;;  %vm8243_vm7 = vcmp.eq.s32.totalorder %v5251_v14, %v8788_v15  ;;  %v2531_v9 = vand.u32 4294901760, %v5267_v29  ;;  %v2535_v20 = vand.u32 4294901760, %v5269_v13  ;;  %v367_v28 = vadd.f32 %v335_v17, %v123_v59 }
  0x83   :  { %v371_v30 = vadd.f32 %v339_v16, %v127_v58  ;;  %v543_v12 = vsel %vm8244_vm10, %v8789_v50, 0.0  ;;  %v547_v1 = vsel %vm8243_vm7, %v8789_v50, 0.0  ;;  %vm8245_vm8 = vcmp.eq.s32.totalorder %v5248_v4, %v4105_v18 }
  0x84   :  { %vm8246_vm11 = vcmp.eq.s32.totalorder %v5251_v14, %v4105_v18  ;;  %v5305_v10 = vpack.c.bf16 %v2535_v20, %v2531_v9  ;;  %v5308_v58 = vsub.f32 %v5267_v29, %v2531_v9  ;;  %v5311_v17 = vsub.f32 %v5269_v13, %v2535_v20 }
  0x85   :  { %v575_v59 = vadd.f32 %v543_v12, %v367_v28  ;;  %v579_v16 = vadd.f32 %v547_v1, %v371_v30  ;;  %v751_v50 = vsel %vm8245_vm8, %v4109_v19, 0.0  ;;  %v755_v15 = vsel %vm8246_vm11, %v4109_v19, 0.0 }
  0x86   :  { %8790 = vst [vmem:[#allocation103_spill] sm:$0xff] %v5305_v10  ;;  %8791 = vst [vmem:[#allocation104_spill] sm:$0xff] %v5308_v58  ;;  %vm8247_vm7 = vcmp.eq.s32.totalorder %v5248_v4, %v4161_v32  ;;  %3800 = vmatpush1.bf16.msra.mxu1 %v5305_v10  ;;  %vm8248_vm10 = vcmp.eq.s32.totalorder %v5251_v14, %v4161_v32  ;;  %vm8250_vm8 = vcmp.eq.s32.totalorder %v5248_v4, %v4169_v34 }
  0x87   :  { %8792 = vst [vmem:[#allocation105_spill] sm:$0xff] %v5311_v17  ;;  %v783_v9 = vadd.f32 %v751_v50, %v575_v59  ;;  %v959_v1 = vsel %vm8247_vm7, %v4165_v33, 0.0  ;;  %v787_v12 = vadd.f32 %v755_v15, %v579_v16  ;;  %v963_v30 = vsel %vm8248_vm10, %v4165_v33, 0.0 }
  0x88   :  { %vm8249_vm11 = vcmp.eq.s32.totalorder %v5251_v14, %v4169_v34  ;;  %v1167_v50 = vsel %vm8250_vm8, %v4173_v35, 0.0  ;;  %vm8251_vm7 = vcmp.eq.s32.totalorder %v5248_v4, %v4177_v38  ;;  %vm8252_vm10 = vcmp.eq.s32.totalorder %v5251_v14, %v4177_v38 }
  0x89   :  { %v991_v28 = vadd.f32 %v959_v1, %v783_v9  ;;  %v1171_v20 = vsel %vm8249_vm11, %v4173_v35, 0.0  ;;  %v995_v15 = vadd.f32 %v963_v30, %v787_v12  ;;  %v1375_v59 = vsel %vm8251_vm7, %v4181_v39, 0.0 }
  0x8a   :  { %v1379_v16 = vsel %vm8252_vm10, %v4181_v39, 0.0  ;;  %vm8254_vm11 = vcmp.eq.s32.totalorder %v5248_v4, %v4246_v56  ;;  %vm8255_vm8 = vcmp.eq.s32.totalorder %v5251_v14, %v4246_v56  ;;  %vm8260_vm7 = vcmp.eq.s32.totalorder %v5248_v4, %v4234_v51 }
  0x8b   :  { %v1199_v9 = vadd.f32 %v1167_v50, %v991_v28  ;;  %v1583_v1 = vsel %vm8254_vm11, %v4250_v57, 0.0  ;;  %v1203_v12 = vadd.f32 %v1171_v20, %v995_v15  ;;  %v1587_v30 = vsel %vm8255_vm8, %v4250_v57, 0.0 }
  0x8c   :  { %vm8256_vm10 = vcmp.eq.s32.totalorder %v5251_v14, %v4234_v51  ;;  %v125_v50 = vsel %vm8260_vm7, %v4238_v54, 0.0  ;;  %vm8263_vm11 = vcmp.eq.s32.totalorder %v5248_v4, %v4242_v55  ;;  %vm8262_vm8 = vcmp.eq.s32.totalorder %v5251_v14, %v4242_v55 }
  0x8d   :  { %v1407_v28 = vadd.f32 %v1375_v59, %v1199_v9  ;;  %v129_v13 = vsel %vm8256_vm10, %v4238_v54, 0.0  ;;  %v1411_v20 = vadd.f32 %v1379_v16, %v1203_v12  ;;  %v337_v15 = vsel %vm8263_vm11, %v4282_v2, 0.0 }
  0x8e   :  { %v341_v59 = vsel %vm8262_vm8, %v4282_v2, 0.0  ;;  %vm8265_vm10 = vcmp.eq.s32.totalorder %v5248_v4, %v4286_v3  ;;  %v369_v29 = vadd.f32 %v337_v15, %v125_v50  ;;  %vm8264_vm7 = vcmp.eq.s32.totalorder %v5251_v14, %v4286_v3 }
  0x8f   :  { %v5396_v9 = vadd.f32 %v1583_v1, %v1407_v28  ;;  %v373_v10 = vadd.f32 %v341_v59, %v129_v13  ;;  %v5400_v16 = vadd.f32 %v1587_v30, %v1411_v20  ;;  %v545_v12 = vsel %vm8265_vm10, %v4294_v22, 0.0 }
  0x90   :  { %v549_v17 = vsel %vm8264_vm7, %v4294_v22, 0.0  ;;  %vm8268_vm8 = vcmp.eq.s32.totalorder %v5248_v4, %v4298_v23  ;;  %v577_v1 = vadd.f32 %v545_v12, %v369_v29  ;;  %vm8267_vm11 = vcmp.eq.s32.totalorder %v5251_v14, %v4298_v23 }
  0x91   :  { %8793 = vst [vmem:[#allocation106_spill] sm:$0xff] %v5396_v9  ;;  %8794 = vst [vmem:[#allocation107_spill] sm:$0xff] %v5400_v16  ;;  %v1743_v13 = vand.u32 4294901760, %v5396_v9  ;;  %v581_v50 = vadd.f32 %v549_v17, %v373_v10  ;;  %v1747_v30 = vand.u32 4294901760, %v5400_v16  ;;  %v753_v28 = vsel %vm8268_vm8, %v4336_v44, 0.0 }
  0x92   :  { %v757_v20 = vsel %vm8267_vm11, %v4336_v44, 0.0  ;;  %vm8270_vm7 = vcmp.eq.s32.totalorder %v5248_v4, %v4340_v46  ;;  %v785_v29 = vadd.f32 %v753_v28, %v577_v1  ;;  %vm8269_vm10 = vcmp.eq.s32.totalorder %v5251_v14, %v4340_v46 }
  0x93   :  { %v5427_v10 = vsub.f32 %v5396_v9, %v1743_v13  ;;  %v789_v17 = vadd.f32 %v757_v20, %v581_v50  ;;  %v5431_v15 = vpack.c.bf16 %v1747_v30, %v1743_v13  ;;  %v5434_v59 = vsub.f32 %v5400_v16, %v1747_v30 }
  0x94   :  { %v961_v12 = vsel %vm8270_vm7, %v4344_v47, 0.0  ;;  %v965_v9 = vsel %vm8269_vm10, %v4344_v47, 0.0  ;;  %vm8272_vm11 = vcmp.eq.s32.totalorder %v5248_v4, %v4349_v48  ;;  %vm8271_vm8 = vcmp.eq.s32.totalorder %v5251_v14, %v4349_v48 }
  0x95   :  { %8795 = vst [vmem:[#allocation108_spill] sm:$0xff] %v5427_v10  ;;  %8796 = vst [vmem:[#allocation109_spill] sm:$0xff] %v5431_v15  ;;  %v993_v1 = vadd.f32 %v961_v12, %v785_v29  ;;  %v997_v50 = vadd.f32 %v965_v9, %v789_v17  ;;  %3706 = vmatprep.subr.bf16.mxu0 %v5431_v15  ;;  %v1169_v13 = vsel %vm8272_vm11, %v4353_v49, 0.0  ;;  %v1173_v30 = vsel %vm8271_vm8, %v4353_v49, 0.0  ;;  %v8803_v10 = vld [vmem:[#allocation46_spill] sm:$0xff] }
  0x96   :  { %8797 = vst [vmem:[#allocation110_spill] sm:$0xff] %v5434_v59  ;;  %vm8281_vm10 = vcmp.eq.s32.totalorder %v5248_v4, %v4357_v52  ;;  %vm8275_vm7 = vcmp.eq.s32.totalorder %v5251_v14, %v4357_v52  ;;  %vm8276_vm8 = vcmp.eq.s32.totalorder %v5248_v4, %v4419_v42  ;;  %vm8280_vm11 = vcmp.eq.s32.totalorder %v5251_v14, %v4419_v42 }
  0x97   :  { %v1201_v9 = vadd.f32 %v1169_v13, %v993_v1  ;;  %v1205_v28 = vadd.f32 %v1173_v30, %v997_v50  ;;  %v1377_v20 = vsel %vm8281_vm10, %v4361_v53, 0.0  ;;  %v1381_v29 = vsel %vm8275_vm7, %v4361_v53, 0.0 }
  0x98   :  { %vm8326_vm13 = vcmp.eq.s32.totalorder %v5248_v4, %v4427_v60  ;;  %vm8283_vm6 = vcmp.eq.s32.totalorder %v5251_v14, %v4427_v60  ;;  %v1585_v1 = vsel %vm8276_vm8, %v4423_v43, 0.0  ;;  %v1589_v50 = vsel %vm8280_vm11, %v4423_v43, 0.0 }
  0x99   :  { %v1409_v17 = vadd.f32 %v1377_v20, %v1201_v9  ;;  %v1413_v12 = vadd.f32 %v1381_v29, %v1205_v28  ;;  %v122_v13 = vsel %vm8326_vm13, %v4431_v61, 0.0  ;;  %v126_v30 = vsel %vm8283_vm6, %v4431_v61, 0.0 }
  0x9a   :  { %vm8325_vm7 = vcmp.eq.s32.totalorder %v5248_v4, %v4439_v40  ;;  %vm8282_vm8 = vcmp.eq.s32.totalorder %v5251_v14, %v4439_v40  ;;  %vm8287_vm11 = vcmp.eq.s32.totalorder %v5248_v4, %v4483_v62  ;;  %vm8286_vm10 = vcmp.eq.s32.totalorder %v5251_v14, %v4483_v62 }
  0x9b   :  { %v5497_v9 = vadd.f32 %v1585_v1, %v1409_v17  ;;  %v5499_v28 = vadd.f32 %v1589_v50, %v1413_v12  ;;  %v334_v20 = vsel %vm8325_vm7, %v4443_v45, 0.0  ;;  %v338_v29 = vsel %vm8282_vm8, %v4443_v45, 0.0 }
  0x9c   :  { %v366_v16 = vadd.f32 %v334_v20, %v122_v13  ;;  %v370_v15 = vadd.f32 %v338_v29, %v126_v30  ;;  %v542_v1 = vsel %vm8287_vm11, %v4487_v63, 0.0  ;;  %v546_v50 = vsel %vm8286_vm10, %v4487_v63, 0.0 }
  0x9d   :  { %8798 = vst [vmem:[#allocation111_spill] sm:$0xff] %v5497_v9  ;;  %8799 = vst [vmem:[#allocation112_spill] sm:$0xff] %v5499_v28  ;;  %v2537_v17 = vand.u32 4294901760, %v5497_v9  ;;  %v2541_v12 = vand.u32 4294901760, %v5499_v28  ;;  %vm8291_vm8 = vcmp.eq.s32.totalorder %v5248_v4, %v8758_v31  ;;  %vm8290_vm6 = vcmp.eq.s32.totalorder %v5251_v14, %v8758_v31 }
  0x9e   :  { %v574_v13 = vadd.f32 %v542_v1, %v366_v16  ;;  %v578_v30 = vadd.f32 %v546_v50, %v370_v15  ;;  %v750_v16 = vsel %vm8291_vm8, %v8803_v10, 0.0  ;;  %v754_v15 = vsel %vm8290_vm6, %v8803_v10, 0.0  ;;  %v8804_v50 = vld [vmem:[#allocation50_spill] sm:$0xff] }
  0x9f   :  { %v5527_v20 = vpack.c.bf16 %v2541_v12, %v2537_v17  ;;  %v5530_v29 = vsub.f32 %v5497_v9, %v2537_v17  ;;  %v5533_v59 = vsub.f32 %v5499_v28, %v2541_v12  ;;  %vm8293_vm10 = vcmp.eq.s32.totalorder %v5248_v4, %v8804_v50  ;;  %v8805_v12 = vld [vmem:[#allocation51_spill] sm:$0xff] }
  0xa0   :  { %v782_v1 = vadd.f32 %v750_v16, %v574_v13  ;;  %vm8297_vm11 = vcmp.eq.s32.totalorder %v5251_v14, %v8804_v50  ;;  %v786_v17 = vadd.f32 %v754_v15, %v578_v30  ;;  %v958_v28 = vsel %vm8293_vm10, %v8805_v12, 0.0  ;;  %v8806_v13 = vld [vmem:[#allocation52_spill] sm:$0xff]  ;;  %v8808_v15 = vld [vmem:[#allocation54_spill] sm:$0xff] }
  0xa1   :  { %8800 = vst [vmem:[#allocation113_spill] sm:$0xff] %v5527_v20  ;;  %8801 = vst [vmem:[#allocation114_spill] sm:$0xff] %v5530_v29  ;;  %3802 = vmatprep.subr.bf16.mxu1 %v5527_v20  ;;  %v962_v9 = vsel %vm8297_vm11, %v8805_v12, 0.0  ;;  %vm8300_vm6 = vcmp.eq.s32.totalorder %v5248_v4, %v8806_v13  ;;  %vm8301_vm8 = vcmp.eq.s32.totalorder %v5251_v14, %v8806_v13 }
  0xa2   :  { %8802 = vst [vmem:[#allocation115_spill] sm:$0xff] %v5533_v59  ;;  %v990_v16 = vadd.f32 %v958_v28, %v782_v1  ;;  %v8807_v59 = vld [vmem:[#allocation53_spill] sm:$0xff]  ;;  %vm8305_vm10 = vcmp.eq.s32.totalorder %v5248_v4, %v8808_v15  ;;  %v994_v20 = vadd.f32 %v962_v9, %v786_v17  ;;  %vm8303_vm11 = vcmp.eq.s32.totalorder %v5251_v14, %v8808_v15  ;;  %v8809_v28 = vld [vmem:[#allocation55_spill] sm:$0xff] }
  0xa3   :  { %v1166_v30 = vsel %vm8300_vm6, %v8807_v59, 0.0  ;;  %v1170_v29 = vsel %vm8301_vm8, %v8807_v59, 0.0  ;;  %v1374_v1 = vsel %vm8305_vm10, %v8809_v28, 0.0  ;;  %v1378_v12 = vsel %vm8303_vm11, %v8809_v28, 0.0  ;;  %v8810_v17 = vld [vmem:[#allocation57_spill] sm:$0xff]  ;;  %v8812_v15 = vld [vmem:[#allocation59_spill] sm:$0xff] }
  0xa4   :  { %v1198_v58 = vadd.f32 %v1166_v30, %v990_v16  ;;  %vm8307_vm6 = vcmp.eq.s32.totalorder %v5248_v4, %v8769_v26  ;;  %vm8309_vm8 = vcmp.eq.s32.totalorder %v5251_v14, %v8769_v26  ;;  %v1202_v9 = vadd.f32 %v1170_v29, %v994_v20  ;;  %v8811_v30 = vld [vmem:[#allocation58_spill] sm:$0xff]  ;;  %v8815_v26 = vld [vmem:[#allocation67_spill] sm:$0xff] }
  0xa5   :  { %v1582_v59 = vsel %vm8307_vm6, %v8810_v17, 0.0  ;;  %v1586_v16 = vsel %vm8309_vm8, %v8810_v17, 0.0  ;;  %vm8310_vm11 = vcmp.eq.s32.totalorder %v5248_v4, %v8811_v30  ;;  %vm8313_vm10 = vcmp.eq.s32.totalorder %v5251_v14, %v8811_v30 }
  0xa6   :  { %v1406_v28 = vadd.f32 %v1374_v1, %v1198_v58  ;;  %v124_v20 = vsel %vm8310_vm11, %v8812_v15, 0.0  ;;  %vm8316_vm6 = vcmp.eq.s32.totalorder %v5248_v4, %v8773_v11  ;;  %v1410_v29 = vadd.f32 %v1378_v12, %v1202_v9 }
  0xa7   :  { %v128_v17 = vsel %vm8313_vm10, %v8812_v15, 0.0  ;;  %vm8315_vm8 = vcmp.eq.s32.totalorder %v5251_v14, %v8773_v11  ;;  %v336_v58 = vsel %vm8316_vm6, %v4644_v21, 0.0  ;;  %vm8322_vm11 = vcmp.eq.s32.totalorder %v5248_v4, %v4648_v41 }
  0xa8   :  { %v5612_v1 = vadd.f32 %v1582_v59, %v1406_v28  ;;  %v340_v12 = vsel %vm8315_vm8, %v4644_v21, 0.0  ;;  %v368_v9 = vadd.f32 %v336_v58, %v124_v20  ;;  %v5620_v15 = vadd.f32 %v1586_v16, %v1410_v29 }
  0xa9   :  { %v372_v30 = vadd.f32 %v340_v12, %v128_v17  ;;  %vm8317_vm10 = vcmp.eq.s32.totalorder %v5251_v14, %v4648_v41  ;;  %v544_v59 = vsel %vm8322_vm11, %v8815_v26, 0.0  ;;  %vm8319_vm8 = vcmp.eq.s32.totalorder %v5248_v4, %v4690_v5 }
  0xaa   :  { %8813 = vst [vmem:[#allocation46_spill] sm:$0xff] %v5612_v1  ;;  %8814 = vst [vmem:[#allocation116_spill] sm:$0xff] %v5620_v15  ;;  %v1745_v28 = vand.u32 4294901760, %v5612_v1  ;;  %v548_v20 = vsel %vm8317_vm10, %v8815_v26, 0.0  ;;  %v576_v58 = vadd.f32 %v544_v59, %v368_v9  ;;  %v1749_v17 = vand.u32 4294901760, %v5620_v15 }
  0xab   :  { %v580_v16 = vadd.f32 %v548_v20, %v372_v30  ;;  %vm8321_vm6 = vcmp.eq.s32.totalorder %v5251_v14, %v4690_v5  ;;  %v752_v29 = vsel %vm8319_vm8, %v4694_v6, 0.0  ;;  %vm8324_vm10 = vcmp.eq.s32.totalorder %v5248_v4, %v4698_v37 }
  0xac   :  { %v5643_v12 = vsub.f32 %v5612_v1, %v1745_v28  ;;  %v756_v9 = vsel %vm8321_vm6, %v4694_v6, 0.0  ;;  %v784_v59 = vadd.f32 %v752_v29, %v576_v58  ;;  %v5651_v30 = vpack.c.bf16 %v1749_v17, %v1745_v28 }
  0xad   :  { %v5654_v20 = vsub.f32 %v5620_v15, %v1749_v17  ;;  %v788_v26 = vadd.f32 %v756_v9, %v580_v16  ;;  %vm8323_vm8 = vcmp.eq.s32.totalorder %v5251_v14, %v4698_v37  ;;  %v960_v1 = vsel %vm8324_vm10, %v4702_v25, 0.0 }
  0xae   :  { %8816 = vst [vmem:[#allocation117_spill] sm:$0xff] %v5643_v12  ;;  %8817 = vst [vmem:[#allocation118_spill] sm:$0xff] %v5651_v30  ;;  %v964_v58 = vsel %vm8323_vm8, %v4702_v25, 0.0  ;;  %vm8343_vm6 = vcmp.eq.s32.totalorder %v5248_v4, %v4715_v36  ;;  %vm8327_vm11 = vcmp.eq.s32.totalorder %v5251_v14, %v4715_v36  ;;  %3708 = vmatpush1.bf16.msra.mxu0 %v5651_v30 }
  0xaf   :  { %8818 = vst [vmem:[#allocation119_spill] sm:$0xff] %v5654_v20  ;;  %v992_v28 = vadd.f32 %v960_v1, %v784_v59  ;;  %v996_v17 = vadd.f32 %v964_v58, %v788_v26  ;;  %v1168_v16 = vsel %vm8343_vm6, %v4719_v24, 0.0  ;;  %v1172_v29 = vsel %vm8327_vm11, %v4719_v24, 0.0  ;;  %v8822_v20 = vld [vmem:[#allocation16_spill] sm:$0xff] }
  0xb0   :  { %vm8328_vm8 = vcmp.eq.s32.totalorder %v5248_v4, %v4751_v7  ;;  %vm8339_vm10 = vcmp.eq.s32.totalorder %v5251_v14, %v4751_v7  ;;  %vm8342_vm7 = vcmp.eq.s32.totalorder %v5248_v4, %v4771_v0  ;;  %vm8338_vm13 = vcmp.eq.s32.totalorder %v5251_v14, %v4771_v0  ;;  %v8823_v14 = vld [vmem:[#allocation17_spill] sm:$0xff]  ;;  %v8828_v0 = vld [vmem:[#allocation20_spill] sm:$0xff] }
  0xb1   :  { %v1200_v26 = vadd.f32 %v1168_v16, %v992_v28  ;;  %v1204_v1 = vadd.f32 %v1172_v29, %v996_v17  ;;  %v1376_v9 = vsel %vm8328_vm8, %v4755_v8, 0.0  ;;  %v1380_v59 = vsel %vm8339_vm10, %v4755_v8, 0.0  ;;  %v8819_v17 = vld [vmem:[#allocation15_spill] sm:$0xff]  ;;  %v8821_v29 = vld [vmem:[#allocation100_spill] sm:$0xff] }
  0xb2   :  { %v1584_v58 = vsel %vm8342_vm7, %v4775_v27, 0.0  ;;  %v1588_v28 = vsel %vm8338_vm13, %v4775_v27, 0.0  ;;  %v8820_v16 = vld [vmem:[#allocation99_spill] sm:$0xff]  ;;  %vm8349_vm8 = vcmp.eq.s32.totalorder %v8821_v29, %v8819_v17  ;;  %vm8350_vm10 = vcmp.eq.s32.totalorder %v8821_v29, %v8823_v14 }
  0xb3   :  { %vm8359_vm11 = vcmp.eq.s32.totalorder %v8820_v16, %v8819_v17  ;;  %v1408_v15 = vadd.f32 %v1376_v9, %v1200_v26  ;;  %v1412_v30 = vadd.f32 %v1380_v59, %v1204_v1  ;;  %v135_v4 = vsel %vm8349_vm8, %v8822_v20, 0.0  ;;  %v8824_v27 = vld [vmem:[#allocation19_spill] sm:$0xff]  ;;  %v8827_v9 = vld [vmem:[#allocation18_spill] sm:$0xff] }
  0xb4   :  { %v131_v12 = vsel %vm8359_vm11, %v8822_v20, 0.0  ;;  %vm8356_vm13 = vcmp.eq.s32.totalorder %v8820_v16, %v8823_v14  ;;  %vm8355_vm7 = vcmp.eq.s32.totalorder %v8820_v16, %v8824_v27  ;;  %vm8352_vm6 = vcmp.eq.s32.totalorder %v8821_v29, %v8824_v27  ;;  %v1713_v14 = vld [vmem:[%s7993_s1 + $0x18] sm:$0xff] }
  0xb5   :  { %v5723_v26 = vadd.f32 %v1584_v58, %v1408_v15  ;;  %v5725_v1 = vadd.f32 %v1588_v28, %v1412_v30  ;;  %v343_v20 = vsel %vm8356_vm13, %v8827_v9, 0.0  ;;  %v347_v59 = vsel %vm8350_vm10, %v8827_v9, 0.0 }
  0xb6   :  { %v375_v17 = vadd.f32 %v343_v20, %v131_v12  ;;  %v379_v8 = vadd.f32 %v347_v59, %v135_v4  ;;  %v551_v15 = vsel %vm8355_vm7, %v8828_v0, 0.0  ;;  %v555_v30 = vsel %vm8352_vm6, %v8828_v0, 0.0 }
  0xb7   :  { %8825 = vst [vmem:[#allocation16_spill] sm:$0xff] %v5723_v26  ;;  %8826 = vst [vmem:[#allocation120_spill] sm:$0xff] %v5725_v1  ;;  %v2539_v58 = vand.u32 4294901760, %v5723_v26  ;;  %v2543_v28 = vand.u32 4294901760, %v5725_v1  ;;  %vm8353_vm8 = vcmp.eq.s32.totalorder %v8820_v16, %v4105_v18  ;;  %vm8354_vm10 = vcmp.eq.s32.totalorder %v8821_v29, %v4105_v18 }
  0xb8   :  { %v583_v4 = vadd.f32 %v551_v15, %v375_v17  ;;  %v587_v12 = vadd.f32 %v555_v30, %v379_v8  ;;  %v759_v9 = vsel %vm8353_vm8, %v4109_v19, 0.0  ;;  %v763_v0 = vsel %vm8354_vm10, %v4109_v19, 0.0 }
  0xb9   :  { %v5757_v20 = vpack.c.bf16 %v2543_v28, %v2539_v58  ;;  %v5760_v59 = vsub.f32 %v5723_v26, %v2539_v58  ;;  %v5763_v27 = vsub.f32 %v5725_v1, %v2543_v28  ;;  %vm8358_vm6 = vcmp.eq.s32.totalorder %v8820_v16, %v4161_v32  ;;  %v8852_v26 = vld [vmem:[#allocation49_spill] sm:$0xff] }
  0xba   :  { %v791_v8 = vadd.f32 %v759_v9, %v583_v4  ;;  %v795_v17 = vadd.f32 %v763_v0, %v587_v12  ;;  %vm8357_vm8 = vcmp.eq.s32.totalorder %v8821_v29, %v4161_v32  ;;  %v967_v19 = vsel %vm8358_vm6, %v4165_v33, 0.0 }
  0xbb   :  { %3804 = vmatpush1.bf16.msra.mxu1 %v5757_v20  ;;  %v971_v15 = vsel %vm8357_vm8, %v4165_v33, 0.0  ;;  %vm8362_vm10 = vcmp.eq.s32.totalorder %v8820_v16, %v4169_v34  ;;  %vm8360_vm7 = vcmp.eq.s32.totalorder %v8821_v29, %v4169_v34  ;;  %vm8361_vm13 = vcmp.eq.s32.totalorder %v8820_v16, %v4177_v38  ;;  %v8864_v34 = vld [vmem:[#allocation91_spill] sm:$0xff] }
  0xbc   :  { %v999_v30 = vadd.f32 %v967_v19, %v791_v8  ;;  %v1003_v58 = vadd.f32 %v971_v15, %v795_v17  ;;  %v1175_v28 = vsel %vm8362_vm10, %v4173_v35, 0.0  ;;  %v1179_v33 = vsel %vm8360_vm7, %v4173_v35, 0.0 }
  0xbd   :  { %vm8364_vm8 = vcmp.eq.s32.totalorder %v8821_v29, %v4177_v38  ;;  %v1383_v4 = vsel %vm8361_vm13, %v4181_v39, 0.0  ;;  %vm8365_vm6 = vcmp.eq.s32.totalorder %v8820_v16, %v4246_v56  ;;  %vm8363_vm11 = vcmp.eq.s32.totalorder %v8821_v29, %v4246_v56 }
  0xbe   :  { %v1207_v12 = vadd.f32 %v1175_v28, %v999_v30  ;;  %v1211_v9 = vadd.f32 %v1179_v33, %v1003_v58  ;;  %v1387_v35 = vsel %vm8364_vm8, %v4181_v39, 0.0  ;;  %v1591_v0 = vsel %vm8365_vm6, %v4250_v57, 0.0 }
  0xbf   :  { %v1595_v8 = vsel %vm8363_vm11, %v4250_v57, 0.0  ;;  %vm8383_vm7 = vcmp.eq.s32.totalorder %v8820_v16, %v4234_v51  ;;  %vm8366_vm13 = vcmp.eq.s32.totalorder %v8821_v29, %v4234_v51  ;;  %vm8381_vm10 = vcmp.eq.s32.totalorder %v8820_v16, %v4242_v55  ;;  %v8877_v51 = vld [vmem:[#allocation119_spill] sm:$0xff] }
  0xc0   :  { %v1415_v39 = vadd.f32 %v1383_v4, %v1207_v12  ;;  %v1419_v17 = vadd.f32 %v1387_v35, %v1211_v9  ;;  %v133_v19 = vsel %vm8383_vm7, %v4238_v54, 0.0  ;;  %v137_v57 = vsel %vm8366_vm13, %v4238_v54, 0.0 }
  0xc1   :  { %vm8367_vm11 = vcmp.eq.s32.totalorder %v8821_v29, %v4242_v55  ;;  %v345_v15 = vsel %vm8381_vm10, %v4282_v2, 0.0  ;;  %vm8371_vm8 = vcmp.eq.s32.totalorder %v8820_v16, %v4286_v3  ;;  %vm8368_vm6 = vcmp.eq.s32.totalorder %v8821_v29, %v4286_v3 }
  0xc2   :  { %v5838_v30 = vadd.f32 %v1591_v0, %v1415_v39  ;;  %v5840_v58 = vadd.f32 %v1595_v8, %v1419_v17  ;;  %v349_v54 = vsel %vm8367_vm11, %v4282_v2, 0.0  ;;  %v377_v28 = vadd.f32 %v345_v15, %v133_v19 }
  0xc3   :  { %v381_v33 = vadd.f32 %v349_v54, %v137_v57  ;;  %v553_v4 = vsel %vm8371_vm8, %v4294_v22, 0.0  ;;  %v557_v12 = vsel %vm8368_vm6, %v4294_v22, 0.0  ;;  %vm8369_vm13 = vcmp.eq.s32.totalorder %v8820_v16, %v4298_v23 }
  0xc4   :  { %8829 = vst [vmem:[#allocation18_spill] sm:$0xff] %v5838_v30  ;;  %8830 = vst [vmem:[#allocation20_spill] sm:$0xff] %v5840_v58  ;;  %v1751_v9 = vand.u32 4294901760, %v5838_v30  ;;  %v1755_v35 = vand.u32 4294901760, %v5840_v58  ;;  %v585_v2 = vadd.f32 %v553_v4, %v377_v28  ;;  %vm8370_vm11 = vcmp.eq.s32.totalorder %v8821_v29, %v4298_v23 }
  0xc5   :  { %v589_v0 = vadd.f32 %v557_v12, %v381_v33  ;;  %v761_v8 = vsel %vm8369_vm13, %v4336_v44, 0.0  ;;  %v765_v22 = vsel %vm8370_vm11, %v4336_v44, 0.0  ;;  %vm8372_vm6 = vcmp.eq.s32.totalorder %v8820_v16, %v4340_v46 }
  0xc6   :  { %v5870_v39 = vpack.c.bf16 %v1755_v35, %v1751_v9  ;;  %v5873_v17 = vsub.f32 %v5838_v30, %v1751_v9  ;;  %v5876_v19 = vsub.f32 %v5840_v58, %v1755_v35  ;;  %v793_v57 = vadd.f32 %v761_v8, %v585_v2 }
  0xc7   :  { %v797_v15 = vadd.f32 %v765_v22, %v589_v0  ;;  %vm8373_vm13 = vcmp.eq.s32.totalorder %v8821_v29, %v4340_v46  ;;  %v969_v44 = vsel %vm8372_vm6, %v4344_v47, 0.0  ;;  %vm8375_vm11 = vcmp.eq.s32.totalorder %v8820_v16, %v4349_v48 }
  0xc8   :  { %3710 = vmatprep.subr.bf16.mxu0 %v5870_v39  ;;  %v973_v54 = vsel %vm8373_vm13, %v4344_v47, 0.0  ;;  %v1001_v28 = vadd.f32 %v969_v44, %v793_v57  ;;  %vm8374_vm8 = vcmp.eq.s32.totalorder %v8821_v29, %v4349_v48  ;;  %v1177_v33 = vsel %vm8375_vm11, %v4353_v49, 0.0 }
  0xc9   :  { %v1005_v4 = vadd.f32 %v973_v54, %v797_v15  ;;  %v1181_v12 = vsel %vm8374_vm8, %v4353_v49, 0.0  ;;  %vm8376_vm6 = vcmp.eq.s32.totalorder %v8820_v16, %v4357_v52  ;;  %vm8377_vm13 = vcmp.eq.s32.totalorder %v8821_v29, %v4357_v52 }
  0xca   :  { %v1209_v47 = vadd.f32 %v1177_v33, %v1001_v28  ;;  %v1385_v9 = vsel %vm8376_vm6, %v4361_v53, 0.0  ;;  %v1389_v35 = vsel %vm8377_vm13, %v4361_v53, 0.0  ;;  %vm8378_vm8 = vcmp.eq.s32.totalorder %v8820_v16, %v4419_v42 }
  0xcb   :  { %v1213_v49 = vadd.f32 %v1181_v12, %v1005_v4  ;;  %vm8379_vm11 = vcmp.eq.s32.totalorder %v8821_v29, %v4419_v42  ;;  %v1593_v2 = vsel %vm8378_vm8, %v4423_v43, 0.0  ;;  %vm8407_vm6 = vcmp.eq.s32.totalorder %v8820_v16, %v4427_v60 }
  0xcc   :  { %v1417_v0 = vadd.f32 %v1385_v9, %v1209_v47  ;;  %v1597_v53 = vsel %vm8379_vm11, %v4423_v43, 0.0  ;;  %vm8380_vm13 = vcmp.eq.s32.totalorder %v8821_v29, %v4427_v60  ;;  %v130_v8 = vsel %vm8407_vm6, %v4431_v61, 0.0 }
  0xcd   :  { %v1421_v22 = vadd.f32 %v1389_v35, %v1213_v49  ;;  %v134_v57 = vsel %vm8380_vm13, %v4431_v61, 0.0  ;;  %vm8389_vm8 = vcmp.eq.s32.totalorder %v8820_v16, %v4439_v40  ;;  %vm8382_vm11 = vcmp.eq.s32.totalorder %v8821_v29, %v4439_v40 }
  0xce   :  { %v5941_v43 = vadd.f32 %v1593_v2, %v1417_v0  ;;  %v342_v15 = vsel %vm8389_vm8, %v4443_v45, 0.0  ;;  %v346_v44 = vsel %vm8382_vm11, %v4443_v45, 0.0  ;;  %vm8385_vm13 = vcmp.eq.s32.totalorder %v8820_v16, %v4483_v62 }
  0xcf   :  { %v5953_v61 = vadd.f32 %v1597_v53, %v1421_v22  ;;  %v374_v54 = vadd.f32 %v342_v15, %v130_v8  ;;  %v378_v28 = vadd.f32 %v346_v44, %v134_v57  ;;  %vm8384_vm10 = vcmp.eq.s32.totalorder %v8821_v29, %v4483_v62  ;;  %v8834_v22 = vld [vmem:[#allocation51_spill] sm:$0xff]  ;;  %v8835_v44 = vld [vmem:[#allocation53_spill] sm:$0xff] }
  0xd0   :  { %8831 = vst [vmem:[#allocation121_spill] sm:$0xff] %v5941_v43  ;;  %v2545_v33 = vand.u32 4294901760, %v5941_v43  ;;  %v550_v4 = vsel %vm8385_vm13, %v4487_v63, 0.0  ;;  %v554_v45 = vsel %vm8384_vm10, %v4487_v63, 0.0  ;;  %vm8387_vm11 = vcmp.eq.s32.totalorder %v8820_v16, %v8758_v31 }
  0xd1   :  { %8832 = vst [vmem:[#allocation122_spill] sm:$0xff] %v5953_v61  ;;  %v2549_v12 = vand.u32 4294901760, %v5953_v61  ;;  %v582_v47 = vadd.f32 %v550_v4, %v374_v54  ;;  %v586_v9 = vadd.f32 %v554_v45, %v378_v28  ;;  %vm8386_vm7 = vcmp.eq.s32.totalorder %v8821_v29, %v8758_v31  ;;  %v8836_v4 = vld [vmem:[#allocation54_spill] sm:$0xff]  ;;  %v8837_v45 = vld [vmem:[#allocation56_spill] sm:$0xff] }
  0xd2   :  { %v5972_v35 = vsub.f32 %v5941_v43, %v2545_v33  ;;  %v758_v49 = vsel %vm8387_vm11, %v8803_v10, 0.0  ;;  %v762_v63 = vsel %vm8386_vm7, %v8803_v10, 0.0  ;;  %vm8388_vm10 = vcmp.eq.s32.totalorder %v8820_v16, %v8804_v50  ;;  %v8850_v43 = vld [vmem:[#allocation35_spill] sm:$0xff] }
  0xd3   :  { %v5984_v2 = vpack.c.bf16 %v2549_v12, %v2545_v33  ;;  %v5987_v0 = vsub.f32 %v5953_v61, %v2549_v12  ;;  %v790_v53 = vadd.f32 %v758_v49, %v582_v47  ;;  %v794_v8 = vadd.f32 %v762_v63, %v586_v9  ;;  %v8838_v47 = vld [vmem:[#allocation55_spill] sm:$0xff]  ;;  %v8849_v61 = vld [vmem:[#allocation34_spill] sm:$0xff] }
  0xd4   :  { %vm8390_vm13 = vcmp.eq.s32.totalorder %v8821_v29, %v8804_v50  ;;  %v966_v57 = vsel %vm8388_vm10, %v8834_v22, 0.0  ;;  %vm8396_vm7 = vcmp.eq.s32.totalorder %v8820_v16, %v8806_v13  ;;  %vm8391_vm11 = vcmp.eq.s32.totalorder %v8821_v29, %v8806_v13 }
  0xd5   :  { %8833 = vst [vmem:[#allocation123_spill] sm:$0xff] %v5984_v2  ;;  %3806 = vmatprep.subr.bf16.mxu1 %v5984_v2  ;;  %v970_v10 = vsel %vm8390_vm13, %v8834_v22, 0.0  ;;  %v998_v15 = vadd.f32 %v966_v57, %v790_v53  ;;  %v1174_v54 = vsel %vm8396_vm7, %v8835_v44, 0.0  ;;  %v1178_v28 = vsel %vm8391_vm11, %v8835_v44, 0.0  ;;  %v8839_v53 = vld [vmem:[#allocation57_spill] sm:$0xff]  ;;  %v8840_v57 = vld [vmem:[#allocation58_spill] sm:$0xff] }
  0xd6   :  { %v1002_v33 = vadd.f32 %v970_v10, %v794_v8  ;;  %vm8392_vm10 = vcmp.eq.s32.totalorder %v8820_v16, %v8836_v4  ;;  %vm8393_vm8 = vcmp.eq.s32.totalorder %v8821_v29, %v8836_v4  ;;  %vm8394_vm13 = vcmp.eq.s32.totalorder %v8820_v16, %v8837_v45  ;;  %v8860_v4 = vld [vmem:[#allocation81_spill] sm:$0xff] }
  0xd7   :  { %v1206_v12 = vadd.f32 %v1174_v54, %v998_v15  ;;  %v1382_v9 = vsel %vm8392_vm10, %v8838_v47, 0.0  ;;  %v1386_v49 = vsel %vm8393_vm8, %v8838_v47, 0.0  ;;  %vm8395_vm11 = vcmp.eq.s32.totalorder %v8821_v29, %v8837_v45  ;;  %v8841_v15 = vld [vmem:[#allocation59_spill] sm:$0xff] }
  0xd8   :  { %v1210_v63 = vadd.f32 %v1178_v28, %v1002_v33  ;;  %v1590_v8 = vsel %vm8394_vm13, %v8839_v53, 0.0  ;;  %v1594_v22 = vsel %vm8395_vm11, %v8839_v53, 0.0  ;;  %vm8406_vm10 = vcmp.eq.s32.totalorder %v8820_v16, %v8840_v57  ;;  %v8844_v53 = vld [vmem:[#allocation67_spill] sm:$0xff] }
  0xd9   :  { %v1414_v10 = vadd.f32 %v1382_v9, %v1206_v12  ;;  %vm8397_vm8 = vcmp.eq.s32.totalorder %v8821_v29, %v8840_v57  ;;  %v132_v44 = vsel %vm8406_vm10, %v8841_v15, 0.0  ;;  %vm8399_vm13 = vcmp.eq.s32.totalorder %v8820_v16, %v8773_v11 }
  0xda   :  { %v1418_v54 = vadd.f32 %v1386_v49, %v1210_v63  ;;  %v136_v28 = vsel %vm8397_vm8, %v8841_v15, 0.0  ;;  %vm8398_vm11 = vcmp.eq.s32.totalorder %v8821_v29, %v8773_v11  ;;  %v344_v33 = vsel %vm8399_vm13, %v4644_v21, 0.0 }
  0xdb   :  { %v6056_v12 = vadd.f32 %v1590_v8, %v1414_v10  ;;  %v348_v47 = vsel %vm8398_vm11, %v4644_v21, 0.0  ;;  %v376_v9 = vadd.f32 %v344_v33, %v132_v44  ;;  %vm8403_vm7 = vcmp.eq.s32.totalorder %v8820_v16, %v4648_v41 }
  0xdc   :  { %v6064_v49 = vadd.f32 %v1594_v22, %v1418_v54  ;;  %v380_v63 = vadd.f32 %v348_v47, %v136_v28  ;;  %vm8400_vm8 = vcmp.eq.s32.totalorder %v8821_v29, %v4648_v41  ;;  %v552_v8 = vsel %vm8403_vm7, %v8844_v53, 0.0 }
  0xdd   :  { %8842 = vst [vmem:[#allocation51_spill] sm:$0xff] %v6056_v12  ;;  %v1753_v10 = vand.u32 4294901760, %v6056_v12  ;;  %v556_v21 = vsel %vm8400_vm8, %v8844_v53, 0.0  ;;  %v584_v15 = vadd.f32 %v552_v8, %v376_v9  ;;  %vm8401_vm11 = vcmp.eq.s32.totalorder %v8820_v16, %v4690_v5 }
  0xde   :  { %8843 = vst [vmem:[#allocation53_spill] sm:$0xff] %v6064_v49  ;;  %v1757_v22 = vand.u32 4294901760, %v6064_v49  ;;  %v588_v44 = vadd.f32 %v556_v21, %v380_v63  ;;  %vm8402_vm13 = vcmp.eq.s32.totalorder %v8821_v29, %v4690_v5  ;;  %v760_v54 = vsel %vm8401_vm11, %v4694_v6, 0.0  ;;  %v8868_v5 = vld [vmem:[#allocation96_spill] sm:$0xff] }
  0xdf   :  { %v6087_v28 = vsub.f32 %v6056_v12, %v1753_v10  ;;  %v764_v33 = vsel %vm8402_vm13, %v4694_v6, 0.0  ;;  %v792_v47 = vadd.f32 %v760_v54, %v584_v15  ;;  %vm8405_vm8 = vcmp.eq.s32.totalorder %v8820_v16, %v4698_v37  ;;  %v8851_v12 = vld [vmem:[#allocation48_spill] sm:$0xff] }
  0xe0   :  { %v6095_v9 = vpack.c.bf16 %v1757_v22, %v1753_v10  ;;  %v6098_v63 = vsub.f32 %v6064_v49, %v1757_v22  ;;  %v796_v53 = vadd.f32 %v764_v33, %v588_v44  ;;  %vm8404_vm11 = vcmp.eq.s32.totalorder %v8821_v29, %v4698_v37  ;;  %v8846_v22 = vld [vmem:[#allocation73_spill] sm:$0xff] }
  0xe1   :  { %v968_v8 = vsel %vm8405_vm8, %v4702_v25, 0.0  ;;  %v972_v6 = vsel %vm8404_vm11, %v4702_v25, 0.0  ;;  %vm1128_vm13 = vcmp.eq.s32.totalorder %v8820_v16, %v4715_v36  ;;  %vm8408_vm7 = vcmp.eq.s32.totalorder %v8821_v29, %v4715_v36  ;;  %v1710_v44 = vld [vmem:[%s7993_s1] sm:$0xff] }
  0xe2   :  { %8845 = vst [vmem:[#allocation55_spill] sm:$0xff] %v6095_v9  ;;  %3712 = vmatpush1.bf16.msra.mxu0 %v6095_v9  ;;  %v1000_v10 = vadd.f32 %v968_v8, %v792_v47  ;;  %v1004_v21 = vadd.f32 %v972_v6, %v796_v53  ;;  %v1176_v15 = vsel %vm1128_vm13, %v4719_v24, 0.0  ;;  %v1180_v25 = vsel %vm8408_vm7, %v4719_v24, 0.0  ;;  %v8847_v47 = vld [vmem:[#allocation72_spill] sm:$0xff]  ;;  %v8848_v8 = vld [vmem:[#allocation74_spill] sm:$0xff] }
  0xe3   :  { %vm1336_vm11 = vcmp.eq.s32.totalorder %v8820_v16, %v4751_v7  ;;  %vm1340_vm8 = vcmp.eq.s32.totalorder %v8821_v29, %v4751_v7  ;;  %vm1544_vm10 = vcmp.eq.s32.totalorder %v8820_v16, %v8846_v22  ;;  %vm1548_vm6 = vcmp.eq.s32.totalorder %v8821_v29, %v8846_v22  ;;  %v8859_v7 = vld [vmem:[#allocation80_spill] sm:$0xff] }
  0xe4   :  { %v1208_v54 = vadd.f32 %v1176_v15, %v1000_v10  ;;  %v1212_v33 = vadd.f32 %v1180_v25, %v1004_v21  ;;  %v1384_v24 = vsel %vm1336_vm11, %v8847_v47, 0.0  ;;  %v1388_v53 = vsel %vm1340_vm8, %v8847_v47, 0.0 }
  0xe5   :  { %v1592_v6 = vsel %vm1544_vm10, %v8848_v8, 0.0  ;;  %v1596_v10 = vsel %vm1548_vm6, %v8848_v8, 0.0  ;;  %vm1714_vm7 = vcmask 523264   ;;  %v8418_v25 = vmov 0.0  }
  0xe6   :  { %v1416_v21 = vadd.f32 %v1384_v24, %v1208_v54  ;;  %v1420_v15 = vadd.f32 %v1388_v53, %v1212_v33  ;;  %1807 = vmatprep.mubr.f32.mxu0 %v8418_v25  ;;  %2601 = vmatprep.mubr.f32.mxu1 %v8418_v25  ;;  %v1716_v47 = vsel %vm1714_vm7, %v1710_v44, 0  ;;  %v8420_v58 = vand.u32 4294901760, %v8849_v61  ;;  %v8855_v24 = vld [vmem:[#allocation65_spill] sm:$0xff] }
  0xe7   :  { %v6154_v49 = vand.u32 4294901760, %v1716_v47  ;;  %v8422_v30 = vand.u32 4294901760, %v8850_v43  ;;  %v8426_v1 = vand.u32 4294901760, %v8851_v12  ;;  %v8427_v8 = vand.u32 4294901760, %v8852_v26 }
  0xe8   :  { %v6159_v29 = vadd.f32 %v1592_v6, %v1416_v21  ;;  %v6161_v54 = vadd.f32 %v1596_v10, %v1420_v15  ;;  %v1855_v33 = vsub.f32 %v8849_v61, %v8420_v58  ;;  %v8431_v44 = vand.u32 4294901760, %v8855_v24 }
  0xe9   :  { %v6168_v53 = vsub.f32 %v1716_v47, %v6154_v49  ;;  %v1867_v25 = vsub.f32 %v8850_v43, %v8422_v30  ;;  %v2649_v6 = vsub.f32 %v8851_v12, %v8426_v1  ;;  %v2661_v10 = vsub.f32 %v8852_v26, %v8427_v8  ;;  %v1711_v1 = vld [vmem:[%s7993_s1 + $0x8] sm:$0xff] }
  0xea   :  { %8853 = vst [vmem:[#allocation57_spill] sm:$0xff] %v6159_v29  ;;  %8854 = vst [vmem:[#allocation59_spill] sm:$0xff] %v6161_v54  ;;  %v2547_v21 = vand.u32 4294901760, %v6159_v29  ;;  %v2551_v15 = vand.u32 4294901760, %v6161_v54  ;;  %v1856_v58 = vand.u32 4294901760, %v1855_v33  ;;  %v1861_v47 = vsub.f32 %v8855_v24, %v8431_v44 }
  0xeb   :  { %v6185_v16 = vand.u32 4294901760, %v6168_v53  ;;  %v1868_v30 = vand.u32 4294901760, %v1867_v25  ;;  %v2650_v42 = vand.u32 4294901760, %v2649_v6  ;;  %v2662_v22 = vand.u32 4294901760, %v2661_v10  ;;  %v8858_v6 = vld [vmem:[#allocation66_spill] sm:$0xff] }
  0xec   :  { %v6190_v8 = vpack.c.bf16 %v2551_v15, %v2547_v21  ;;  %v6193_v56 = vsub.f32 %v6159_v29, %v2547_v21  ;;  %v6196_v33 = vsub.f32 %v6161_v54, %v2551_v15  ;;  %v1862_v45 = vand.u32 4294901760, %v1861_v47  ;;  %v8861_v29 = vld [vmem:[#allocation84_spill] sm:$0xff] }
  0xed   :  { %8856 = vst [vmem:[#allocation67_spill] sm:$0xff] %v6185_v16  ;;  %v1811_v44 = vsub.f32 %v6168_v53, %v6185_v16  ;;  %v3713_v52 = vpack.c.bf16 %v1868_v30, %v1856_v58  ;;  %v3809_v25 = vpack.c.bf16 %v2662_v22, %v2650_v42  ;;  %v8444_v10 = vand.u32 4294901760, %v8858_v6  ;;  %v8862_v58 = vld [vmem:[#allocation86_spill] sm:$0xff] }
  0xee   :  { %8857 = vst [vmem:[#allocation72_spill] sm:$0xff] %v6190_v8  ;;  %3808 = vmatpush1.bf16.msra.mxu1 %v6190_v8  ;;  %v8446_v38 = vand.u32 4294901760, %v8859_v7  ;;  %v8452_v48 = vand.u32 4294901760, %v8860_v4  ;;  %v1719_v21 = vsel %vm1714_vm7, %v1711_v1, 0  ;;  %v8455_v36 = vand.u32 4294901760, %v8861_v29 }
  0xef   :  { %v1812_v15 = vand.u32 4294901760, %v1811_v44  ;;  %3714 = vmatprep.subr.bf16.mxu0 %v3713_v52  ;;  %3810 = vmatprep.subr.bf16.mxu1 %v3809_v25  ;;  %v1873_v30 = vsub.f32 %v8858_v6, %v8444_v10  ;;  %v6209_v42 = vand.u32 4294901760, %v1719_v21  ;;  %v8458_v22 = vand.u32 4294901760, %v8862_v58  ;;  %v8863_v44 = vld [vmem:[#allocation90_spill] sm:$0xff] }
  0xf0   :  { %v2655_v47 = vsub.f32 %v8859_v7, %v8446_v38  ;;  %v2667_v1 = vsub.f32 %v8860_v4, %v8452_v48  ;;  %v1879_v52 = vsub.f32 %v8861_v29, %v8455_v36  ;;  %v8466_v25 = vand.u32 4294901760, %v8863_v44 }
  0xf1   :  { %1813 = vmatmul.mubr.f32.vlgmr.msra.gmra.mrb[0].mxu0 %v1812_v15  ;;  %2607 = vmatmul.mubr.f32.vlgmr.msra.gmra.mrb[0].mxu1 %v1812_v15  ;;  %v1874_v10 = vand.u32 4294901760, %v1873_v30  ;;  %v6223_v54 = vsub.f32 %v1719_v21, %v6209_v42  ;;  %v1891_v38 = vsub.f32 %v8862_v58, %v8458_v22  ;;  %v8468_v13 = vand.u32 4294901760, %v8864_v34 }
  0xf2   :  { %v2656_v46 = vand.u32 4294901760, %v2655_v47  ;;  %v2668_v48 = vand.u32 4294901760, %v2667_v1  ;;  %v8865_v37 = vmov 0.0   ;;  %v1880_v36 = vand.u32 4294901760, %v1879_v52  ;;  %v1712_v47 = vld [vmem:[%s7993_s1 + $0x10] sm:$0xff]  ;;  %v8867_v52 = vld [vmem:[#allocation94_spill] sm:$0xff] }
  0xf3   :  { %1818 = vmatprep.mubr.f32.mxu0 %v8865_v37  ;;  %2612 = vmatprep.mubr.f32.mxu1 %v8865_v37  ;;  %v2673_v15 = vsub.f32 %v8863_v44, %v8466_v25  ;;  %v3715_v30 = vpack.c.bf16 %v1874_v10, %v1862_v45  ;;  %v6235_v21 = vand.u32 4294901760, %v6223_v54  ;;  %v1892_v32 = vand.u32 4294901760, %v1891_v38  ;;  %v8869_v25 = vld [vmem:[#allocation104_spill] sm:$0xff] }
  0xf4   :  { %v2685_v22 = vsub.f32 %v8864_v34, %v8468_v13  ;;  %v3811_v1 = vpack.c.bf16 %v2668_v48, %v2656_v46  ;;  %v8473_v23 = vand.u32 4294901760, %v8867_v52  ;;  %v8474_v18 = vand.u32 4294901760, %v8868_v5  ;;  %v8870_v48 = vld [vmem:[#allocation105_spill] sm:$0xff] }
  0xf5   :  { %8866 = vst [vmem:[#allocation74_spill] sm:$0xff] %v6235_v21  ;;  %v2674_v50 = vand.u32 4294901760, %v2673_v15  ;;  %3716 = vmatpush1.bf16.msra.mxu0 %v3715_v30  ;;  %v1822_v45 = vsub.f32 %v6223_v54, %v6235_v21  ;;  %v3717_v10 = vpack.c.bf16 %v1892_v32, %v1880_v36  ;;  %v8477_v31 = vand.u32 4294901760, %v8869_v25 }
  0xf6   :  { %v2686_v38 = vand.u32 4294901760, %v2685_v22  ;;  %3812 = vmatpush1.bf16.msra.mxu1 %v3811_v1  ;;  %v1885_v13 = vsub.f32 %v8867_v52, %v8473_v23  ;;  %v1897_v46 = vsub.f32 %v8868_v5, %v8474_v18  ;;  %v8480_v15 = vand.u32 4294901760, %v8870_v48  ;;  %v8871_v18 = vld [vmem:[#allocation108_spill] sm:$0xff] }
  0xf7   :  { %v1722_v30 = vsel %vm1714_vm7, %v1712_v47, 0  ;;  %v1823_v3 = vand.u32 4294901760, %v1822_v45  ;;  %3718 = vmatprep.subr.bf16.mxu0 %v3717_v10  ;;  %v2679_v32 = vsub.f32 %v8869_v25, %v8477_v31  ;;  %v8482_v62 = vand.u32 4294901760, %v8871_v18 }
  0xf8   :  { %v3813_v41 = vpack.c.bf16 %v2686_v38, %v2674_v50  ;;  %v6259_v36 = vand.u32 4294901760, %v1722_v30  ;;  %v1886_v22 = vand.u32 4294901760, %v1885_v13  ;;  %v1898_v1 = vand.u32 4294901760, %v1897_v46  ;;  %v8872_v50 = vld [vmem:[#allocation110_spill] sm:$0xff] }
  0xf9   :  { %v2691_v23 = vsub.f32 %v8870_v48, %v8480_v15  ;;  %1824 = vmatmul.mubr.f32.gmra.mrb[2].mxu0 %v1823_v3  ;;  %2618 = vmatmul.mubr.f32.gmra.mrb[2].mxu1 %v1823_v3  ;;  %v2680_v47 = vand.u32 4294901760, %v2679_v32  ;;  %v8487_v10 = vand.u32 4294901760, %v8872_v50  ;;  %v8873_v38 = vld [vmem:[#allocation114_spill] sm:$0xff]  ;;  %v1903_v46 = vsub.f32 %v8871_v18, %v8482_v62  ;;  %v8874_v15 = vld [vmem:[#allocation115_spill] sm:$0xff] }
  0xfa   :  { %v6266_v45 = vsub.f32 %v1722_v30, %v6259_v36  ;;  %v8490_v31 = vand.u32 4294901760, %v8873_v38  ;;  %3814 = vmatprep.subr.bf16.mxu1 %v3813_v41  ;;  %v3719_v55 = vpack.c.bf16 %v1898_v1, %v1886_v22  ;;  %1829 = vmatprep.mubr.f32.mxu0 %v8865_v37  ;;  %v8491_v11 = vand.u32 4294901760, %v8874_v15  ;;  %v8876_v41 = vld [vmem:[#allocation117_spill] sm:$0xff] }
  0xfb   :  { %v2692_v13 = vand.u32 4294901760, %v2691_v23  ;;  %2623 = vmatprep.mubr.f32.mxu1 %v8865_v37  ;;  %v1915_v30 = vsub.f32 %v8872_v50, %v8487_v10  ;;  %v8507_v32 = vand.u32 4294901760, %v8876_v41  ;;  %v1904_v1 = vand.u32 4294901760, %v1903_v46 }
  0xfc   :  { %v6277_v3 = vand.u32 4294901760, %v6266_v45  ;;  %v2697_v23 = vsub.f32 %v8873_v38, %v8490_v31  ;;  %3720 = vmatpush1.bf16.msra.mxu0 %v3719_v55  ;;  %v2709_v62 = vsub.f32 %v8874_v15, %v8491_v11  ;;  %v8500_v57 = vand.u32 4294901760, %v8877_v51 }
  0xfd   :  { %v3815_v22 = vpack.c.bf16 %v2692_v13, %v2680_v47  ;;  %v1916_v40 = vand.u32 4294901760, %v1915_v30  ;;  %v1909_v55 = vsub.f32 %v8876_v41, %v8507_v32  ;;  %v8506_v46 = vand.u32 4294901760, %v5760_v59 }
  0xfe   :  { %8875 = vst [vmem:[#allocation34_spill] sm:$0xff] %v6277_v3  ;;  %v1833_v10 = vsub.f32 %v6266_v45, %v6277_v3  ;;  %v2698_v31 = vand.u32 4294901760, %v2697_v23  ;;  %v2710_v47 = vand.u32 4294901760, %v2709_v62  ;;  %v1921_v13 = vsub.f32 %v8877_v51, %v8500_v57 }
  0xff   :  { %3816 = vmatpush1.bf16.msra.mxu1 %v3815_v22  ;;  %v8502_v11 = vand.u32 4294901760, %v5763_v27  ;;  %v3721_v21 = vpack.c.bf16 %v1916_v40, %v1904_v1  ;;  %v1910_v16 = vand.u32 4294901760, %v1909_v55  ;;  %v1725_v30 = vsel %vm1714_vm7, %v1713_v14, 0 }
 0x100   :  { %v1834_v60 = vand.u32 4294901760, %v1833_v10  ;;  %v3817_v23 = vpack.c.bf16 %v2710_v47, %v2698_v31  ;;  %v1922_v3 = vand.u32 4294901760, %v1921_v13  ;;  %v2703_v22 = vsub.f32 %v5760_v59, %v8506_v46 }
 0x101   :  { %v2715_v62 = vsub.f32 %v5763_v27, %v8502_v11  ;;  %3722 = vmatprep.subr.bf16.mxu0 %v3721_v21  ;;  %v6310_v57 = vand.u32 4294901760, %v1725_v30  ;;  %v8501_v10 = vand.u32 4294901760, %v5873_v17  ;;  %v8505_v40 = vand.u32 4294901760, %v5876_v19 }
 0x102   :  { %1835 = vmatmul.mubr.f32.gmra.mrb[4].mxu0 %v1834_v60  ;;  %v8503_v14 = vand.u32 4294901760, %v5972_v35  ;;  %2629 = vmatmul.mubr.f32.gmra.mrb[4].mxu1 %v1834_v60  ;;  %v3723_v31 = vpack.c.bf16 %v1922_v3, %v1910_v16  ;;  %v2704_v1 = vand.u32 4294901760, %v2703_v22  ;;  %v8504_v47 = vand.u32 4294901760, %v5987_v0 }
 0x103   :  { %3818 = vmatprep.subr.bf16.mxu1 %v3817_v23  ;;  %v2716_v55 = vand.u32 4294901760, %v2715_v62  ;;  %1840 = vmatprep.mubr.f32.mxu0 %v8865_v37  ;;  %v6319_v21 = vsub.f32 %v1725_v30, %v6310_v57  ;;  %v1927_v13 = vsub.f32 %v5873_v17, %v8501_v10  ;;  %v1939_v60 = vsub.f32 %v5876_v19, %v8505_v40 }
 0x104   :  { %2634 = vmatprep.mubr.f32.mxu1 %v8865_v37  ;;  %v8513_v16 = vand.u32 4294901760, %v6087_v28  ;;  %3724 = vmatpush1.bf16.msra.mxu0 %v3723_v31  ;;  %v2721_v23 = vsub.f32 %v5972_v35, %v8503_v14  ;;  %v2733_v30 = vsub.f32 %v5987_v0, %v8504_v47  ;;  %v8510_v22 = vand.u32 4294901760, %v6098_v63 }
 0x105   :  { %v3819_v3 = vpack.c.bf16 %v2716_v55, %v2704_v1  ;;  %v6336_v62 = vand.u32 4294901760, %v6319_v21  ;;  %v1928_v10 = vand.u32 4294901760, %v1927_v13  ;;  %v1940_v11 = vand.u32 4294901760, %v1939_v60 }
 0x106   :  { %v1933_v31 = vsub.f32 %v6087_v28, %v8513_v16  ;;  %v2722_v1 = vand.u32 4294901760, %v2721_v23  ;;  %v2734_v55 = vand.u32 4294901760, %v2733_v30  ;;  %v1945_v14 = vsub.f32 %v6098_v63, %v8510_v22 }
 0x107   :  { %8878 = vst [vmem:[#allocation35_spill] sm:$0xff] %v6336_v62  ;;  %3820 = vmatpush1.bf16.msra.mxu1 %v3819_v3  ;;  %v8512_v47 = vand.u32 4294901760, %v6193_v56  ;;  %v1844_v40 = vsub.f32 %v6319_v21, %v6336_v62  ;;  %v3725_v46 = vpack.c.bf16 %v1940_v11, %v1928_v10  ;;  %v8511_v13 = vand.u32 4294901760, %v6196_v33 }
 0x108   :  { %v1934_v32 = vand.u32 4294901760, %v1933_v31  ;;  %v3821_v60 = vpack.c.bf16 %v2734_v55, %v2722_v1  ;;  %v1946_v8 = vand.u32 4294901760, %v1945_v14  ;;  %v3729_v23 = vpack.c.bf16 %v8850_v43, %v8849_v61 }
 0x109   :  { %v2727_v3 = vsub.f32 %v6193_v56, %v8512_v47  ;;  %v1845_v30 = vand.u32 4294901760, %v1844_v40  ;;  %3726 = vmatprep.subr.bf16.mxu0 %v3725_v46  ;;  %v2739_v22 = vsub.f32 %v6196_v33, %v8511_v13  ;;  %v3825_v11 = vpack.c.bf16 %v8852_v26, %v8851_v12 }
 0x10a   :  { %v3731_v10 = vpack.c.bf16 %v8858_v6, %v8855_v24  ;;  %3822 = vmatprep.subr.bf16.mxu1 %v3821_v60  ;;  %v3727_v14 = vpack.c.bf16 %v1946_v8, %v1934_v32  ;;  %v3827_v1 = vpack.c.bf16 %v8860_v4, %v8859_v7  ;;  %v3733_v40 = vpack.c.bf16 %v8862_v58, %v8861_v29 }
 0x10b   :  { %v2728_v31 = vand.u32 4294901760, %v2727_v3  ;;  %1846 = vmatmul.mubr.f32.gmra.mrb[6].mxu0 %v1845_v30  ;;  %2640 = vmatmul.mubr.f32.gmra.mrb[6].mxu1 %v1845_v30  ;;  %v2740_v46 = vand.u32 4294901760, %v2739_v22  ;;  %v3829_v55 = vpack.c.bf16 %v8864_v34, %v8863_v44  ;;  %v3735_v13 = vpack.c.bf16 %v8868_v5, %v8867_v52 }
 0x10c   :  { %v3831_v60 = vpack.c.bf16 %v8870_v48, %v8869_v25  ;;  %3728 = vmatpush1.bf16.msra.mxu0 %v3727_v14  ;;  %1996 = vmatprep.mubr.f32.mxu0 %v8865_v37  ;;  %v3737_v8 = vpack.c.bf16 %v8872_v50, %v8871_v18  ;;  %v3833_v32 = vpack.c.bf16 %v8874_v15, %v8873_v38  ;;  %v8879_v14 = vand.u32 4294901760, %v8849_v61 }
 0x10d   :  { %v3739_v22 = vpack.c.bf16 %v8877_v51, %v8876_v41  ;;  %v3823_v3 = vpack.c.bf16 %v2740_v46, %v2728_v31  ;;  %2790 = vmatprep.mubr.f32.mxu1 %v8865_v37  ;;  %3730 = vmatprep.subr.bf16.mxu0 %v3729_v23  ;;  %v3835_v30 = vpack.c.bf16 %v5763_v27, %v5760_v59  ;;  %v8880_v47 = vand.u32 4294901760, %v8850_v43 }
 0x10e   :  { %v4004_v62 = vmov 0   ;;  %v8881_v31 = vand.u32 4294901760, %v8851_v12  ;;  %v8882_v46 = vand.u32 4294901760, %v8852_v26  ;;  %v8883_v9 = vand.u32 4294901760, %v8855_v24 }
 0x10f   :  { %v6384_v16 = vpack.c.bf16 %v8880_v47, %v8879_v14  ;;  %3973 = vset.pattern.permute.xlu0 %v4004_v62  ;;  %3824 = vmatpush1.bf16.msra.mxu1 %v3823_v3  ;;  %v8884_v61 = vand.u32 4294901760, %v8858_v6  ;;  %v8885_v43 = vand.u32 4294901760, %v8859_v7  ;;  %v8886_v47 = vand.u32 4294901760, %v8860_v4 }
 0x110   :  { %1998 = vmatmul.mubr.f32.vlgmr.msra.gmra.mrb[0].mxu0 %v6154_v49  ;;  %v6392_v23 = vpack.c.bf16 %v8882_v46, %v8881_v31  ;;  %3826 = vmatprep.subr.bf16.mxu1 %v3825_v11  ;;  %v8887_v12 = vand.u32 4294901760, %v8861_v29  ;;  %v8888_v26 = vand.u32 4294901760, %v8862_v58  ;;  %v8889_v24 = vand.u32 4294901760, %v8863_v44 }
 0x111   :  { %v6398_v2 = vpack.c.bf16 %v8884_v61, %v8883_v9  ;;  %v6404_v14 = vpack.c.bf16 %v8886_v47, %v8885_v43  ;;  %3732 = vmatpush1.bf16.msra.mxu0 %v3731_v10  ;;  %v8890_v6 = vand.u32 4294901760, %v8864_v34  ;;  %v8891_v7 = vand.u32 4294901760, %v8867_v52  ;;  %2003 = vmatprep.mubr.f32.mxu0 %v8865_v37  ;;  %v8915_v43 = vld [vmem:[#allocation55_spill] sm:$0xff]  ;;  %v8916_v47 = vld [vmem:[#allocation72_spill] sm:$0xff] }
 0x112   :  { %v6410_v3 = vpack.c.bf16 %v8888_v26, %v8887_v12  ;;  %v8892_v4 = vand.u32 4294901760, %v8868_v5  ;;  %3734 = vmatprep.subr.bf16.mxu0 %v3733_v40  ;;  %v8893_v29 = vand.u32 4294901760, %v8869_v25  ;;  %v8894_v58 = vand.u32 4294901760, %v8870_v48  ;;  %2792 = vmatmul.mubr.f32.vlgmr.msra.gmra.mrb[0].mxu1 %v6154_v49 }
 0x113   :  { %v6416_v9 = vpack.c.bf16 %v8890_v6, %v8889_v24  ;;  %v8895_v44 = vand.u32 4294901760, %v8871_v18  ;;  %v8896_v34 = vand.u32 4294901760, %v8872_v50  ;;  %v8897_v52 = vand.u32 4294901760, %v8873_v38  ;;  %3828 = vmatpush1.bf16.msra.mxu1 %v3827_v1  ;;  %2797 = vmatprep.mubr.f32.mxu1 %v8865_v37  ;;  %v8903_v38 = vld [vmem:[#allocation33_spill] sm:$0xff] }
 0x114   :  { %v6422_v31 = vpack.c.bf16 %v8892_v4, %v8891_v7  ;;  %v6429_v11 = vpack.c.bf16 %v8894_v58, %v8893_v29  ;;  %v8898_v5 = vand.u32 4294901760, %v8874_v15  ;;  %v8899_v25 = vand.u32 4294901760, %v8876_v41  ;;  %2005 = vmatmul.mubr.f32.gmra.mrb[2].mxu0 %v6209_v42  ;;  %3830 = vmatprep.subr.bf16.mxu1 %v3829_v55  ;;  %v8904_v41 = vld [vmem:[#allocation47_spill] sm:$0xff]  ;;  %v8906_v1 = vld [vmem:[#allocation85_spill] sm:$0xff] }
 0x115   :  { %v6435_v10 = vpack.c.bf16 %v8896_v34, %v8895_v44  ;;  %v8900_v48 = vand.u32 4294901760, %v8877_v51  ;;  %v8901_v18 = vand.u32 4294901760, %v5760_v59  ;;  %v8902_v50 = vand.u32 4294901760, %v5763_v27  ;;  %3736 = vmatpush1.bf16.msra.mxu0 %v3735_v13  ;;  %2010 = vmatprep.mubr.f32.mxu0 %v8865_v37  ;;  %v8905_v13 = vld [vmem:[#allocation64_spill] sm:$0xff]  ;;  %v8907_v55 = vld [vmem:[#allocation79_spill] sm:$0xff]  ;;  %v3975_v58 = vld [vmem:[%s7997_s5] sm:$0xff] }
 0x116   :  { %v6441_v46 = vpack.c.bf16 %v8898_v5, %v8897_v52  ;;  %2799 = vmatmul.mubr.f32.gmra.mrb[2].mxu1 %v6209_v42  ;;  %3738 = vmatprep.subr.bf16.mxu0 %v3737_v8  ;;  %v3741_v51 = vpack.c.bf16 %v5876_v19, %v5873_v17  ;;  %v3837_v27 = vpack.c.bf16 %v5987_v0, %v5972_v35  ;;  %v8909_v8 = vld [vmem:[#allocation95_spill] sm:$0xff]  ;;  %v8922_v12 = vand.u32 4294901760, %v5972_v35  ;;  %v3374_v4 = vld [vmem:[%s7994_s2 + $0x38] sm:$0xff] }
 0x117   :  { %v6448_v40 = vpack.c.bf16 %v8900_v48, %v8899_v25  ;;  %v6454_v61 = vpack.c.bf16 %v8902_v50, %v8901_v18  ;;  %3832 = vmatpush1.bf16.msra.mxu1 %v3831_v60  ;;  %2804 = vmatprep.mubr.f32.mxu1 %v8865_v37  ;;  %v3743_v59 = vpack.c.bf16 %v6098_v63, %v6087_v28  ;;  %v8908_v60 = vld [vmem:[#allocation89_spill] sm:$0xff]  ;;  %v8923_v26 = vand.u32 4294901760, %v5987_v0  ;;  %v3373_v7 = vld [vmem:[%s7994_s2 + $0x30] sm:$0xff]  ;;  %v3976_v44 = vld [vmem:[%s7997_s5 + $0x8] sm:$0xff] }
 0x118   :  { %2012 = vmatmul.mubr.f32.gmra.mrb[4].mxu0 %v6259_v36  ;;  %3834 = vmatprep.subr.bf16.mxu1 %v3833_v32  ;;  %v3839_v15 = vpack.c.bf16 %v6196_v33, %v6193_v56  ;;  %v8910_v32 = vld [vmem:[#allocation109_spill] sm:$0xff]  ;;  %v8926_v35 = vand.u32 4294901760, %v6193_v56  ;;  %v8927_v0 = vand.u32 4294901760, %v6196_v33  ;;  %v6656_v34 = vmul.f32 %v3976_v44, %v3976_v44  ;;  %v8929_v25 = vld [vmem:[#allocation8_spill] sm:$0xff] }
 0x119   :  { %3740 = vmatpush1.bf16.msra.mxu0 %v3739_v22  ;;  %2017 = vmatprep.mubr.f32.mxu0 %v8865_v37  ;;  %v8911_v22 = vld [vmem:[#allocation103_spill] sm:$0xff]  ;;  %v3367_v56 = vld [vmem:[%s7994_s2] sm:$0xff]  ;;  %v3506_v29 = vld [vmem:[%s7995_s3 + $0x38] sm:$0xff] }
 0x11a   :  { %2806 = vmatmul.mubr.f32.gmra.mrb[4].mxu1 %v6259_v36  ;;  %3742 = vmatprep.subr.bf16.mxu0 %v3741_v51  ;;  %v3871_v6 = vpack.c.bf16 %v8927_v0, %v8926_v35  ;;  %v3371_v33 = vld [vmem:[%s7994_s2 + $0x20] sm:$0xff]  ;;  %v3978_v5 = vld [vmem:[%s7997_s5 + $0x18] sm:$0xff]  ;;  %v8954_v35 = vld [vmem:[#allocation19_spill] sm:$0xff] }
 0x11b   :  { %3836 = vmatpush1.bf16.msra.mxu1 %v3835_v30  ;;  %2811 = vmatprep.mubr.f32.mxu1 %v8865_v37  ;;  %v8913_v30 = vld [vmem:[#allocation118_spill] sm:$0xff]  ;;  %v8932_v18 = vld [vmem:[#allocation9_spill] sm:$0xff] }
 0x11c   :  { %2019 = vmatmul.mubr.f32.gmra.mrb[6].mxu0 %v6310_v57  ;;  %3838 = vmatprep.subr.bf16.mxu1 %v3837_v27 }
 0x11d   :  { %3744 = vmatpush1.bf16.msra.mxu0 %v3743_v59  ;;  %2121 = vmatprep.mubr.f32.mxu0 %v8865_v37 }
 0x11e   :  { %2813 = vmatmul.mubr.f32.gmra.mrb[6].mxu1 %v6310_v57  ;;  %3746 = vmatprep.subr.bf16.mxu0 %v8903_v38 }
 0x11f   :  { %3840 = vmatpush1.bf16.msra.mxu1 %v3839_v15  ;;  %2915 = vmatprep.mubr.f32.mxu1 %v8865_v37 }
 0x120   :  { %2124 = vmatmul.mubr.f32.vlgmr.msra.gmra.mrb[0].mxu0 %v6168_v53  ;;  %3842 = vmatprep.subr.bf16.mxu1 %v8904_v41 }
 0x121   :  { %3748 = vmatpush1.bf16.msra.mxu0 %v8905_v13  ;;  %2129 = vmatprep.mubr.f32.mxu0 %v8865_v37 }
 0x122   :  { %2918 = vmatmul.mubr.f32.vlgmr.msra.gmra.mrb[0].mxu1 %v6168_v53  ;;  %3750 = vmatprep.subr.bf16.mxu0 %v8906_v1  ;;  %v8912_v53 = vld [vmem:[#allocation113_spill] sm:$0xff] }
 0x123   :  { %3844 = vmatpush1.bf16.msra.mxu1 %v8907_v55  ;;  %2923 = vmatprep.mubr.f32.mxu1 %v8865_v37 }
 0x124   :  { %2132 = vmatmul.mubr.f32.gmra.mrb[2].mxu0 %v6223_v54  ;;  %3846 = vmatprep.subr.bf16.mxu1 %v8908_v60 }
 0x125   :  { %3752 = vmatpush1.bf16.msra.mxu0 %v8909_v8  ;;  %2137 = vmatprep.mubr.f32.mxu0 %v8865_v37 }
 0x126   :  { %2926 = vmatmul.mubr.f32.gmra.mrb[2].mxu1 %v6223_v54  ;;  %3754 = vmatprep.subr.bf16.mxu0 %v8910_v32  ;;  %v8914_v54 = vld [vmem:[#allocation123_spill] sm:$0xff] }
 0x127   :  { %3848 = vmatpush1.bf16.msra.mxu1 %v8911_v22  ;;  %2931 = vmatprep.mubr.f32.mxu1 %v8865_v37 }
 0x128   :  { %2140 = vmatmul.mubr.f32.gmra.mrb[4].mxu0 %v6266_v45  ;;  %3850 = vmatprep.subr.bf16.mxu1 %v8912_v53 }
 0x129   :  { %3756 = vmatpush1.bf16.msra.mxu0 %v8913_v30  ;;  %2145 = vmatprep.mubr.f32.mxu0 %v8865_v37 }
 0x12a   :  { %2934 = vmatmul.mubr.f32.gmra.mrb[4].mxu1 %v6266_v45  ;;  %3758 = vmatprep.subr.bf16.mxu0 %v5870_v39  ;;  %v8917_v45 = vld [vmem:[#allocation67_spill] sm:$0xff] }
 0x12b   :  { %3852 = vmatpush1.bf16.msra.mxu1 %v5757_v20  ;;  %2939 = vmatprep.mubr.f32.mxu1 %v8865_v37 }
 0x12c   :  { %2148 = vmatmul.mubr.f32.gmra.mrb[6].mxu0 %v6319_v21  ;;  %3854 = vmatprep.subr.bf16.mxu1 %v8914_v54 }
 0x12d   :  { %3760 = vmatpush1.bf16.msra.mxu0 %v8915_v43  ;;  %2234 = vmatprep.mubr.f32.mxu0 %v8865_v37 }
 0x12e   :  { %2942 = vmatmul.mubr.f32.gmra.mrb[6].mxu1 %v6319_v21  ;;  %3762 = vmatprep.subr.bf16.mxu0 %v6384_v16  ;;  %v8918_v21 = vld [vmem:[#allocation74_spill] sm:$0xff]  ;;  %v8920_v16 = vand.u32 4294901760, %v5876_v19  ;;  %v8925_v19 = vand.u32 4294901760, %v6098_v63 }
 0x12f   :  { %3856 = vmatpush1.bf16.msra.mxu1 %v8916_v47  ;;  %3028 = vmatprep.mubr.f32.mxu1 %v8865_v37  ;;  %v3499_v63 = vld [vmem:[%s7995_s3] sm:$0xff] }
 0x130   :  { %2238 = vmatmul.mubr.f32.vlgmr.msra.gmra.mrb[0].mxu0 %v8917_v45  ;;  %3858 = vmatprep.subr.bf16.mxu1 %v6392_v23 }
 0x131   :  { %3764 = vmatpush1.bf16.msra.mxu0 %v6398_v2  ;;  %2243 = vmatprep.mubr.f32.mxu0 %v8865_v37  ;;  %v8919_v2 = vand.u32 4294901760, %v5873_v17  ;;  %v8924_v17 = vand.u32 4294901760, %v6087_v28  ;;  %v3370_v28 = vld [vmem:[%s7994_s2 + $0x18] sm:$0xff] }
 0x132   :  { %3032 = vmatmul.mubr.f32.vlgmr.msra.gmra.mrb[0].mxu1 %v8917_v45  ;;  %3766 = vmatprep.subr.bf16.mxu0 %v6410_v3  ;;  %v3869_v3 = vpack.c.bf16 %v8923_v26, %v8922_v12  ;;  %v8948_v45 = vld [vmem:[#allocation26_spill] sm:$0xff] }
 0x133   :  { %3860 = vmatpush1.bf16.msra.mxu1 %v6404_v14  ;;  %3037 = vmatprep.mubr.f32.mxu1 %v8865_v37  ;;  %v3773_v23 = vpack.c.bf16 %v8920_v16, %v8919_v2  ;;  %v8921_v14 = vld [vmem:[#allocation34_spill] sm:$0xff]  ;;  %v3775_v24 = vpack.c.bf16 %v8925_v19, %v8924_v17  ;;  %v8949_v2 = vld [vmem:[#allocation60_spill] sm:$0xff] }
 0x134   :  { %2247 = vmatmul.mubr.f32.gmra.mrb[2].mxu0 %v8918_v21  ;;  %3862 = vmatprep.subr.bf16.mxu1 %v6416_v9  ;;  %v8928_v9 = vld [vmem:[#allocation35_spill] sm:$0xff]  ;;  %v8953_v19 = vld [vmem:[#allocation44_spill] sm:$0xff] }
 0x135   :  { %3768 = vmatpush1.bf16.msra.mxu0 %v6422_v31  ;;  %2252 = vmatprep.mubr.f32.mxu0 %v8865_v37  ;;  %v3505_v31 = vld [vmem:[%s7995_s3 + $0x30] sm:$0xff] }
 0x136   :  { %3041 = vmatmul.mubr.f32.gmra.mrb[2].mxu1 %v8918_v21  ;;  %3770 = vmatprep.subr.bf16.mxu0 %v6435_v10  ;;  %v3977_v10 = vld [vmem:[%s7997_s5 + $0x10] sm:$0xff] }
 0x137   :  { %3864 = vmatpush1.bf16.msra.mxu1 %v6429_v11  ;;  %3046 = vmatprep.mubr.f32.mxu1 %v8865_v37  ;;  %v6651_v11 = vmul.f32 %v3975_v58, %v3975_v58  ;;  %v6661_v52 = vmul.f32 %v3977_v10, %v3977_v10 }
 0x138   :  { %2256 = vmatmul.mubr.f32.gmra.mrb[4].mxu0 %v8921_v14  ;;  %3866 = vmatprep.subr.bf16.mxu1 %v6441_v46  ;;  %v6666_v46 = vmul.f32 %v3978_v5, %v3978_v5 }
 0x139   :  { %3772 = vmatpush1.bf16.msra.mxu0 %v6448_v40  ;;  %2261 = vmatprep.mubr.f32.mxu0 %v8865_v37  ;;  %v6670_v48 = vrot.slane %v6651_v11, %v8929_v25  ;;  %v6674_v40 = vrot.slane %v6656_v34, %v8929_v25  ;;  %v6678_v50 = vrot.slane %v6651_v11, %v8932_v18 }
 0x13a   :  { %3050 = vmatmul.mubr.f32.gmra.mrb[4].mxu1 %v8921_v14  ;;  %3774 = vmatprep.subr.bf16.mxu0 %v3773_v23  ;;  %v6686_v51 = vrot.slane %v6661_v52, %v8929_v25  ;;  %v6690_v27 = vrot.slane %v6666_v46, %v8929_v25  ;;  %v6694_v59 = vrot.slane %v6661_v52, %v8932_v18  ;;  %v8950_v23 = vld [vmem:[#allocation27_spill] sm:$0xff]  ;;  %v8970_v25 = vld [vmem:[#allocation68_spill] sm:$0xff] }
 0x13b   :  { %3868 = vmatpush1.bf16.msra.mxu1 %v6454_v61  ;;  %3055 = vmatprep.mubr.f32.mxu1 %v8865_v37  ;;  %8930 = vst [vmem:[#allocation48_spill] sm:$0xff] %v6670_v48  ;;  %8931 = vst [vmem:[#allocation49_spill] sm:$0xff] %v6674_v40  ;;  %v6682_v61 = vrot.slane %v6656_v34, %v8932_v18  ;;  %v6698_v15 = vrot.slane %v6666_v46, %v8932_v18 }
 0x13c   :  { %2265 = vmatmul.mubr.f32.gmra.mrb[6].mxu0 %v8928_v9  ;;  %3870 = vmatprep.subr.bf16.mxu1 %v3869_v3  ;;  %8933 = vst [vmem:[#allocation65_spill] sm:$0xff] %v6678_v50  ;;  %8935 = vst [vmem:[#allocation80_spill] sm:$0xff] %v6686_v51  ;;  %v193_v21 = vsel %vm61_vm14, %v6690_v27, 0.0  ;;  %v400_v16 = vsel %vm272_vm5, %v6694_v59, 0.0 }
 0x13d   :  { %3776 = vmatpush1.bf16.msra.mxu0 %v3775_v24  ;;  %2383 = vmatprep.mubr.f32.mxu0 %v8865_v37  ;;  %8934 = vst [vmem:[#allocation66_spill] sm:$0xff] %v6682_v61  ;;  %8936 = vst [vmem:[#allocation81_spill] sm:$0xff] %v6690_v27  ;;  %v401_v14 = vsel %vm273_vm9, %v6698_v15, 0.0 }
 0x13e   :  { %3059 = vmatmul.mubr.f32.gmra.mrb[6].mxu1 %v8928_v9  ;;  %3778 = vmatprep.subr.bf16.mxu0 %v8903_v38  ;;  %8937 = vst [vmem:[#allocation84_spill] sm:$0xff] %v6694_v59  ;;  %8938 = vst [vmem:[#allocation86_spill] sm:$0xff] %v6698_v15  ;;  %v8939_v38 = vld [vmem:[#allocation6_spill] sm:$0xff] }
 0x13f   :  { %3872 = vmatpush1.bf16.msra.mxu1 %v3871_v6  ;;  %3177 = vmatprep.mubr.f32.mxu1 %v8865_v37  ;;  %v8955_v6 = vld [vmem:[#allocation11_spill] sm:$0xff] }
 0x140   :  { %2385 = vmatmul.mubr.f32.vlgmr.msra.gmra.mrb[0].mxu0 %v6154_v49  ;;  %3874 = vmatprep.subr.bf16.mxu1 %v8904_v41  ;;  %v8940_v41 = vld [vmem:[#allocation40_spill] sm:$0xff]  ;;  %v6758_v9 = vrot.slane %v6651_v11, %v8955_v6 }
 0x141   :  { %3780 = vmatpush1.bf16.msra.mxu0 %v8905_v13  ;;  %2390 = vmatprep.mubr.f32.mxu0 %v8865_v37  ;;  %v190_v13 = vsel %vm58_vm3, %v6670_v48, 0.0 }
 0x142   :  { %3179 = vmatmul.mubr.f32.vlgmr.msra.gmra.mrb[0].mxu1 %v6154_v49  ;;  %3782 = vmatprep.subr.bf16.mxu0 %v8906_v1  ;;  %v8941_v1 = vld [vmem:[#allocation15_spill] sm:$0xff]  ;;  %8956 = vst [vmem:[#allocation104_spill] sm:$0xff] %v6758_v9 }
 0x143   :  { %3876 = vmatpush1.bf16.msra.mxu1 %v8907_v55  ;;  %3184 = vmatprep.mubr.f32.mxu1 %v8865_v37  ;;  %v191_v55 = vsel %vm59_vm0, %v6674_v40, 0.0 }
 0x144   :  { %2392 = vmatmul.mubr.f32.gmra.mrb[2].mxu0 %v6209_v42  ;;  %3878 = vmatprep.subr.bf16.mxu1 %v8908_v60  ;;  %v8942_v60 = vld [vmem:[#allocation41_spill] sm:$0xff] }
 0x145   :  { %3784 = vmatpush1.bf16.msra.mxu0 %v8909_v8  ;;  %2397 = vmatprep.mubr.f32.mxu0 %v8865_v37  ;;  %v398_v8 = vsel %vm270_vm15, %v6678_v50, 0.0 }
 0x146   :  { %3186 = vmatmul.mubr.f32.gmra.mrb[2].mxu1 %v6209_v42  ;;  %3786 = vmatprep.subr.bf16.mxu0 %v8910_v32  ;;  %v8943_v32 = vld [vmem:[#allocation17_spill] sm:$0xff]  ;;  %v430_v3 = vadd.f32 %v398_v8, %v190_v13  ;;  %v8972_v13 = vld [vmem:[#allocation32_spill] sm:$0xff] }
 0x147   :  { %3880 = vmatpush1.bf16.msra.mxu1 %v8911_v22  ;;  %3191 = vmatprep.mubr.f32.mxu1 %v8865_v37  ;;  %v399_v22 = vsel %vm271_vm2, %v6682_v61, 0.0  ;;  %vm8973_vm5 = vcmp.eq.s32.totalorder %v8939_v38, %v8972_v13 }
 0x148   :  { %2399 = vmatmul.mubr.f32.gmra.mrb[4].mxu0 %v6259_v36  ;;  %3882 = vmatprep.subr.bf16.mxu1 %v8912_v53  ;;  %v8944_v53 = vld [vmem:[#allocation10_spill] sm:$0xff]  ;;  %v431_v17 = vadd.f32 %v399_v22, %v191_v55 }
 0x149   :  { %3788 = vmatpush1.bf16.msra.mxu0 %v8913_v30  ;;  %2404 = vmatprep.mubr.f32.mxu0 %v8865_v37  ;;  %v6718_v30 = vrot.slane %v6651_v11, %v8944_v53  ;;  %v6742_v12 = vrot.slane %v6661_v52, %v8944_v53  ;;  %v6746_v26 = vrot.slane %v6666_v46, %v8944_v53 }
 0x14a   :  { %3193 = vmatmul.mubr.f32.gmra.mrb[4].mxu1 %v6259_v36  ;;  %3790 = vmatprep.subr.bf16.mxu0 %v5870_v39  ;;  %v3368_v39 = vld [vmem:[%s7994_s2 + $0x8] sm:$0xff] }
 0x14b   :  { %3884 = vmatpush1.bf16.msra.mxu1 %v5757_v20  ;;  %3198 = vmatprep.mubr.f32.mxu1 %v8865_v37  ;;  %v3369_v20 = vld [vmem:[%s7994_s2 + $0x10] sm:$0xff]  ;;  %8945 = vst [vmem:[#allocation90_spill] sm:$0xff] %v6718_v30  ;;  %8951 = vst [vmem:[#allocation94_spill] sm:$0xff] %v6742_v12  ;;  %v606_v24 = vsel %vm478_vm1, %v6718_v30, 0.0 }
 0x14c   :  { %2406 = vmatmul.mubr.f32.gmra.mrb[6].mxu0 %v6310_v57  ;;  %3886 = vmatprep.subr.bf16.mxu1 %v8914_v54  ;;  %v6722_v54 = vrot.slane %v6656_v34, %v8944_v53  ;;  %8952 = vst [vmem:[#allocation96_spill] sm:$0xff] %v6746_v26 }
 0x14d   :  { %3792 = vmatpush1.bf16.msra.mxu0 %v8915_v43  ;;  %2492 = vmatprep.mubr.f32.mxu0 %v8865_v37  ;;  %v8947_v43 = vld [vmem:[#allocation58_spill] sm:$0xff] }
 0x14e   :  { %3200 = vmatmul.mubr.f32.gmra.mrb[6].mxu1 %v6310_v57  ;;  %3377 = vperm.xlu0 %3973, %v3367_v56   ;;  %8946 = vst [vmem:[#allocation91_spill] sm:$0xff] %v6722_v54  ;;  %v607_v0 = vsel %vm479_vm4, %v6722_v54, 0.0  ;;  %v6762_v56 = vrot.slane %v6656_v34, %v8955_v6  ;;  %vm8971_vm4 = vcmp.eq.s32.totalorder %v8939_v38, %v8970_v25 }
 0x14f   :  { %3888 = vmatpush1.bf16.msra.mxu1 %v8916_v47  ;;  %3286 = vmatprep.mubr.f32.mxu1 %v8865_v37  ;;  %v192_v47 = vsel %vm60_vm12, %v6686_v51, 0.0 }
 0x150   :  { %2494 = vmatmul.mubr.f32.vlgmr.msra.gmra.mrb[0].mxu0 %v6154_v49  ;;  %3974 = vset.pattern.permute.xlu1 %v4004_v62  ;;  %v3372_v62 = vld [vmem:[%s7994_s2 + $0x28] sm:$0xff]  ;;  %8957 = vst [vmem:[#allocation105_spill] sm:$0xff] %v6762_v56 }
 0x151   :  { %2499 = vmatprep.mubr.f32.mxu0 %v8865_v37  ;;  %3387 = vperm.xlu1 %3974, %v3369_v20   ;;  %v432_v20 = vadd.f32 %v400_v16, %v192_v47 }
 0x152   :  { %3288 = vmatmul.mubr.f32.vlgmr.msra.gmra.mrb[0].mxu1 %v6154_v49  ;;  %3382 = vperm.xlu0 %3973, %v3368_v39   ;;  %v3500_v49 = vld [vmem:[%s7995_s3 + $0x8] sm:$0xff]  ;;  %v433_v39 = vadd.f32 %v401_v14, %v193_v21 }
 0x153   :  { %3293 = vmatprep.mubr.f32.mxu1 %v8865_v37  ;;  %v8976_v21 = vld [vmem:[#allocation50_spill] sm:$0xff] }
 0x154   :  { %2501 = vmatmul.mubr.f32.gmra.mrb[2].mxu0 %v6209_v42  ;;  %vm8977_vm7 = vcmp.eq.s32.totalorder %v8939_v38, %v8976_v21  ;;  %v8978_v14 = vld [vmem:[#allocation22_spill] sm:$0xff] }
 0x155   :  { %2506 = vmatprep.mubr.f32.mxu0 %v8865_v37  ;;  %3392 = vperm.xlu1 %3974, %v3370_v28   ;;  %v8958_v28 = vld [vmem:[#allocation63_spill] sm:$0xff]  ;;  %vm8979_vm9 = vcmp.eq.s32.totalorder %v8939_v38, %v8978_v14 }
 0x156   :  { %3295 = vmatmul.mubr.f32.gmra.mrb[2].mxu1 %v6209_v42  ;;  %3509 = vperm.xlu0 %3973, %v3499_v63   ;;  %v3501_v42 = vld [vmem:[%s7995_s3 + $0x10] sm:$0xff]  ;;  %vm8959_vm0 = vcmp.eq.s32.totalorder %v8939_v38, %v8958_v28 }
 0x157   :  { %3300 = vmatprep.mubr.f32.mxu1 %v8865_v37  ;;  %v608_v63 = vsel %vm8959_vm0, %v6742_v12, 0.0 }
 0x158   :  { %2508 = vmatmul.mubr.f32.gmra.mrb[4].mxu0 %v6259_v36  ;;  %v640_v10 = vadd.f32 %v608_v63, %v432_v20 }
 0x159   :  { %2513 = vmatprep.mubr.f32.mxu0 %v8865_v37  ;;  %3514 = vperm.xlu1 %3974, %v3500_v49   ;;  %v8960_v49 = vld [vmem:[#allocation29_spill] sm:$0xff] }
 0x15a   :  { %3302 = vmatmul.mubr.f32.gmra.mrb[4].mxu1 %v6259_v36  ;;  %3397 = vperm.xlu0 %3973, %v3371_v33   ;;  %v3502_v36 = vld [vmem:[%s7995_s3 + $0x18] sm:$0xff]  ;;  %vm8961_vm1 = vcmp.eq.s32.totalorder %v8939_v38, %v8960_v49 }
 0x15b   :  { %3307 = vmatprep.mubr.f32.mxu1 %v8865_v37  ;;  %v3503_v37 = vld [vmem:[%s7995_s3 + $0x20] sm:$0xff]  ;;  %v609_v33 = vsel %vm8961_vm1, %v6746_v26, 0.0 }
 0x15c   :  { %2515 = vmatmul.mubr.f32.gmra.mrb[6].mxu0 %v6310_v57  ;;  %v641_v5 = vadd.f32 %v609_v33, %v433_v39  ;;  %v8983_v39 = vld [vmem:[#allocation69_spill] sm:$0xff]  ;;  %v8985_v33 = vld [vmem:[#allocation36_spill] sm:$0xff] }
 0x15d   :  { %3519 = vperm.xlu1 %3974, %v3501_v42   ;;  %v6774_v42 = vrot.slane %v6661_v52, %v8955_v6  ;;  %vm8984_vm12 = vcmp.eq.s32.totalorder %v8939_v38, %v8983_v39  ;;  %vm8986_vm14 = vcmp.eq.s32.totalorder %v8939_v38, %v8985_v33 }
 0x15e   :  { %3309 = vmatmul.mubr.f32.gmra.mrb[6].mxu1 %v6310_v57  ;;  %3402 = vperm.xlu0 %3973, %v3372_v62   ;;  %v3504_v57 = vld [vmem:[%s7995_s3 + $0x28] sm:$0xff]  ;;  %v6778_v62 = vrot.slane %v6666_v46, %v8955_v6 }
 0x15f   :  { %v816_v18 = vsel %vm8971_vm4, %v6774_v42, 0.0 }
 0x160   :  { %8962 = vst [vmem:[#allocation108_spill] sm:$0xff] %v6778_v62  ;;  %v817_v55 = vsel %vm8973_vm5, %v6778_v62, 0.0  ;;  %v848_v6 = vadd.f32 %v816_v18, %v640_v10  ;;  %v8989_v10 = vld [vmem:[#allocation52_spill] sm:$0xff]  ;;  %v8991_v18 = vld [vmem:[#allocation23_spill] sm:$0xff] }
 0x161   :  { %3524 = vperm.xlu1 %3974, %v3502_v36   ;;  %v638_v36 = vadd.f32 %v606_v24, %v430_v3  ;;  %v849_v20 = vadd.f32 %v817_v55, %v641_v5  ;;  %vm8990_vm15 = vcmp.eq.s32.totalorder %v8939_v38, %v8989_v10  ;;  %vm8992_vm0 = vcmp.eq.s32.totalorder %v8939_v38, %v8991_v18 }
 0x162   :  { %3407 = vperm.xlu0 %3973, %v3373_v7   ;;  %v639_v7 = vadd.f32 %v607_v0, %v431_v17  ;;  %v8980_v17 = vld [vmem:[#allocation13_spill] sm:$0xff] }
 0x163   :  { %v6822_v24 = vrot.slane %v6651_v11, %v8980_v17  ;;  %v6826_v0 = vrot.slane %v6656_v34, %v8980_v17 }
 0x165   :  { %3529 = vperm.xlu1 %3974, %v3503_v37   ;;  %v8963_v37 = vld [vmem:[#allocation45_spill] sm:$0xff]  ;;  %8981 = vst [vmem:[#allocation119_spill] sm:$0xff] %v6822_v24  ;;  %8982 = vst [vmem:[#allocation33_spill] sm:$0xff] %v6826_v0  ;;  %v1230_v5 = vsel %vm8990_vm15, %v6822_v24, 0.0  ;;  %v1231_v55 = vsel %vm8992_vm0, %v6826_v0, 0.0  ;;  %v9000_v0 = vld [vmem:[#allocation14_spill] sm:$0xff] }
 0x166   :  { %3412 = vperm.xlu0 %3973, %v3374_v4   ;;  %vm8964_vm2 = vcmp.eq.s32.totalorder %v8939_v38, %v8963_v37  ;;  %v6874_v24 = vrot.slane %v6651_v11, %v9000_v0 }
 0x167   :  { %v814_v4 = vsel %vm8964_vm2, %v6758_v9, 0.0 }
 0x168   :  { %v846_v53 = vadd.f32 %v814_v4, %v638_v36  ;;  %9001 = vst [vmem:[#allocation85_spill] sm:$0xff] %v6874_v24 }
 0x169   :  { %3534 = vperm.xlu1 %3974, %v3504_v57   ;;  %v8965_v57 = vld [vmem:[#allocation21_spill] sm:$0xff] }
 0x16a   :  { %3539 = vperm.xlu0 %3973, %v3505_v31   ;;  %vm8966_vm3 = vcmp.eq.s32.totalorder %v8939_v38, %v8965_v57 }
 0x16b   :  { %v815_v31 = vsel %vm8966_vm3, %v6762_v56, 0.0 }
 0x16c   :  { %v847_v47 = vadd.f32 %v815_v31, %v639_v7  ;;  %v6838_v31 = vrot.slane %v6661_v52, %v8980_v17 }
 0x16d   :  { %3544 = vperm.xlu1 %3974, %v3506_v29   ;;  %v8967_v29 = vld [vmem:[#allocation12_spill] sm:$0xff] }
 0x16e   :  { %v6790_v58 = vrot.slane %v6651_v11, %v8967_v29  ;;  %v6794_v44 = vrot.slane %v6656_v34, %v8967_v29  ;;  %v6806_v8 = vrot.slane %v6661_v52, %v8967_v29  ;;  %v6810_v22 = vrot.slane %v6666_v46, %v8967_v29  ;;  %8987 = vst [vmem:[#allocation47_spill] sm:$0xff] %v6838_v31 }
 0x16f   :  { %v6842_v29 = vrot.slane %v6666_v46, %v8980_v17 }
 0x170   :  { %8968 = vst [vmem:[#allocation110_spill] sm:$0xff] %v6790_v58  ;;  %8969 = vst [vmem:[#allocation114_spill] sm:$0xff] %v6794_v44  ;;  %v1022_v16 = vsel %vm8977_vm7, %v6790_v58, 0.0  ;;  %v1023_v3 = vsel %vm8979_vm9, %v6794_v44, 0.0  ;;  %v1024_v63 = vsel %vm8984_vm12, %v6806_v8, 0.0  ;;  %v1025_v36 = vsel %vm8986_vm14, %v6810_v22, 0.0 }
 0x171   :  { %8974 = vst [vmem:[#allocation115_spill] sm:$0xff] %v6806_v8  ;;  %8975 = vst [vmem:[#allocation117_spill] sm:$0xff] %v6810_v22  ;;  %v1054_v7 = vadd.f32 %v1022_v16, %v846_v53  ;;  %v1055_v4 = vadd.f32 %v1023_v3, %v847_v47  ;;  %v1056_v53 = vadd.f32 %v1024_v63, %v848_v6  ;;  %v8993_v16 = vld [vmem:[#allocation75_spill] sm:$0xff] }
 0x172   :  { %8988 = vst [vmem:[#allocation64_spill] sm:$0xff] %v6842_v29  ;;  %v1057_v47 = vadd.f32 %v1025_v36, %v849_v20  ;;  %vm8994_vm1 = vcmp.eq.s32.totalorder %v8993_v16, %v8940_v41  ;;  %vm8995_vm2 = vcmp.eq.s32.totalorder %v8993_v16, %v8941_v1  ;;  %vm8996_vm3 = vcmp.eq.s32.totalorder %v8993_v16, %v8942_v60  ;;  %v8998_v20 = vld [vmem:[#allocation70_spill] sm:$0xff]  ;;  %v9002_v60 = vld [vmem:[#allocation37_spill] sm:$0xff] }
 0x173   :  { %v198_v3 = vsel %vm8994_vm1, %v6670_v48, 0.0  ;;  %v199_v17 = vsel %vm8995_vm2, %v6674_v40, 0.0  ;;  %v406_v10 = vsel %vm8996_vm3, %v6678_v50, 0.0  ;;  %vm8997_vm4 = vcmp.eq.s32.totalorder %v8993_v16, %v8943_v32 }
 0x174   :  { %v407_v6 = vsel %vm8997_vm4, %v6682_v61, 0.0  ;;  %vm8999_vm5 = vcmp.eq.s32.totalorder %v8939_v38, %v8998_v20  ;;  %v1262_v36 = vadd.f32 %v1230_v5, %v1054_v7  ;;  %v1263_v18 = vadd.f32 %v1231_v55, %v1055_v4 }
 0x175   :  { %v1232_v63 = vsel %vm8999_vm5, %v6838_v31, 0.0  ;;  %vm9003_vm7 = vcmp.eq.s32.totalorder %v8939_v38, %v9002_v60  ;;  %v6882_v32 = vrot.slane %v6656_v34, %v9000_v0  ;;  %vm9005_vm9 = vcmp.eq.s32.totalorder %v8993_v16, %v8947_v43 }
 0x176   :  { %v1233_v50 = vsel %vm9003_vm7, %v6842_v29, 0.0  ;;  %v200_v20 = vsel %vm9005_vm9, %v6686_v51, 0.0  ;;  %vm9006_vm12 = vcmp.eq.s32.totalorder %v8993_v16, %v8948_v45  ;;  %vm9007_vm14 = vcmp.eq.s32.totalorder %v8993_v16, %v8949_v2 }
 0x177   :  { %9004 = vst [vmem:[#allocation79_spill] sm:$0xff] %v6882_v32  ;;  %v201_v7 = vsel %vm9006_vm12, %v6690_v27, 0.0  ;;  %v408_v4 = vsel %vm9007_vm14, %v6694_v59, 0.0  ;;  %vm9008_vm15 = vcmp.eq.s32.totalorder %v8993_v16, %v8950_v23  ;;  %v438_v55 = vadd.f32 %v406_v10, %v198_v3 }
 0x178   :  { %v409_v5 = vsel %vm9008_vm15, %v6698_v15, 0.0  ;;  %v439_v60 = vadd.f32 %v407_v6, %v199_v17  ;;  %v1264_v29 = vadd.f32 %v1232_v63, %v1056_v53  ;;  %v6902_v31 = vrot.slane %v6661_v52, %v9000_v0  ;;  %v9013_v53 = vld [vmem:[#allocation54_spill] sm:$0xff]  ;;  %v9015_v17 = vld [vmem:[#allocation25_spill] sm:$0xff]  ;;  %v9017_v63 = vld [vmem:[#allocation24_spill] sm:$0xff] }
 0x179   :  { %vm9010_vm0 = vcmp.eq.s32.totalorder %v8993_v16, %v8953_v19  ;;  %vm9011_vm1 = vcmp.eq.s32.totalorder %v8993_v16, %v8954_v35  ;;  %v1265_v59 = vadd.f32 %v1233_v50, %v1057_v47  ;;  %v6914_v10 = vrot.slane %v6666_v46, %v9000_v0 }
 0x17a   :  { %9009 = vst [vmem:[#allocation89_spill] sm:$0xff] %v6902_v31  ;;  %v614_v45 = vsel %vm9010_vm0, %v6718_v30, 0.0  ;;  %v615_v2 = vsel %vm9011_vm1, %v6722_v54, 0.0  ;;  %vm9014_vm2 = vcmp.eq.s32.totalorder %v8939_v38, %v9013_v53  ;;  %v6922_v6 = vrot.slane %v6651_v11, %v9015_v17 }
 0x17b   :  { %9012 = vst [vmem:[#allocation95_spill] sm:$0xff] %v6914_v10  ;;  %v1438_v3 = vsel %vm9014_vm2, %v6874_v24, 0.0  ;;  %vm9018_vm3 = vcmp.eq.s32.totalorder %v8939_v38, %v9017_v63  ;;  %v6930_v50 = vrot.slane %v6656_v34, %v9015_v17  ;;  %v440_v0 = vadd.f32 %v408_v4, %v200_v20  ;;  %v9022_v63 = vld [vmem:[#allocation71_spill] sm:$0xff] }
 0x17c   :  { %9016 = vst [vmem:[#allocation109_spill] sm:$0xff] %v6922_v6  ;;  %v1439_v35 = vsel %vm9018_vm3, %v6882_v32, 0.0  ;;  %v441_v47 = vadd.f32 %v409_v5, %v201_v7  ;;  %vm9020_vm4 = vcmp.eq.s32.totalorder %v8993_v16, %v8958_v28  ;;  %vm9021_vm5 = vcmp.eq.s32.totalorder %v8993_v16, %v8960_v49  ;;  %v9030_v5 = vld [vmem:[#allocation56_spill] sm:$0xff] }
 0x17d   :  { %9019 = vst [vmem:[#allocation103_spill] sm:$0xff] %v6930_v50  ;;  %v616_v53 = vsel %vm9020_vm4, %v6742_v12, 0.0  ;;  %v617_v11 = vsel %vm9021_vm5, %v6746_v26, 0.0  ;;  %v646_v24 = vadd.f32 %v614_v45, %v438_v55  ;;  %v647_v54 = vadd.f32 %v615_v2, %v439_v60  ;;  %v9026_v45 = vld [vmem:[#allocation38_spill] sm:$0xff] }
 0x17e   :  { %vm9023_vm7 = vcmp.eq.s32.totalorder %v8939_v38, %v9022_v63  ;;  %v1470_v32 = vadd.f32 %v1438_v3, %v1262_v36  ;;  %vm9024_vm9 = vcmp.eq.s32.totalorder %v8993_v16, %v8963_v37  ;;  %vm9025_vm12 = vcmp.eq.s32.totalorder %v8993_v16, %v8965_v57  ;;  %v9032_v3 = vld [vmem:[#allocation28_spill] sm:$0xff] }
 0x17f   :  { %v1440_v34 = vsel %vm9023_vm7, %v6902_v31, 0.0  ;;  %v822_v20 = vsel %vm9024_vm9, %v6758_v9, 0.0  ;;  %v823_v7 = vsel %vm9025_vm12, %v6762_v56, 0.0  ;;  %vm9027_vm14 = vcmp.eq.s32.totalorder %v8939_v38, %v9026_v45 }
 0x180   :  { %v1441_v60 = vsel %vm9027_vm14, %v6914_v10, 0.0  ;;  %v1471_v2 = vadd.f32 %v1439_v35, %v1263_v18  ;;  %v6958_v4 = vrot.slane %v6661_v52, %v9015_v17  ;;  %v6962_v36 = vrot.slane %v6666_v46, %v9015_v17 }
 0x181   :  { %vm9031_vm15 = vcmp.eq.s32.totalorder %v8939_v38, %v9030_v5  ;;  %vm9033_vm0 = vcmp.eq.s32.totalorder %v8939_v38, %v9032_v3  ;;  %v648_v56 = vadd.f32 %v616_v53, %v440_v0  ;;  %v649_v35 = vadd.f32 %v617_v11, %v441_v47  ;;  %v9038_v11 = vld [vmem:[#allocation73_spill] sm:$0xff] }
 0x182   :  { %9028 = vst [vmem:[#allocation113_spill] sm:$0xff] %v6958_v4  ;;  %9029 = vst [vmem:[#allocation118_spill] sm:$0xff] %v6962_v36  ;;  %v1646_v55 = vsel %vm9031_vm15, %v6922_v6, 0.0  ;;  %v1647_v57 = vsel %vm9033_vm0, %v6930_v50, 0.0  ;;  %vm9034_vm1 = vcmp.eq.s32.totalorder %v8993_v16, %v8970_v25  ;;  %vm9035_vm2 = vcmp.eq.s32.totalorder %v8993_v16, %v8972_v13 }
 0x183   :  { %v824_v52 = vsel %vm9034_vm1, %v6774_v42, 0.0  ;;  %v825_v46 = vsel %vm9035_vm2, %v6778_v62, 0.0  ;;  %v854_v18 = vadd.f32 %v822_v20, %v646_v24  ;;  %v855_v17 = vadd.f32 %v823_v7, %v647_v54  ;;  %v9041_v54 = vld [vmem:[#allocation39_spill] sm:$0xff] }
 0x184   :  { %vm9036_vm3 = vcmp.eq.s32.totalorder %v8993_v16, %v8976_v21  ;;  %vm9037_vm4 = vcmp.eq.s32.totalorder %v8993_v16, %v8978_v14  ;;  %v1472_v0 = vadd.f32 %v1440_v34, %v1264_v29  ;;  %v1473_v47 = vadd.f32 %v1441_v60, %v1265_v59  ;;  %v9046_v60 = vld [vmem:[#allocation7_spill] sm:$0xff] }
 0x185   :  { %v1030_v3 = vsel %vm9036_vm3, %v6790_v58, 0.0  ;;  %v1031_v53 = vsel %vm9037_vm4, %v6794_v44, 0.0  ;;  %vm9039_vm5 = vcmp.eq.s32.totalorder %v8939_v38, %v9038_v11  ;;  %v6992_v5 = vadd.f32 %v1646_v55, %v1470_v32  ;;  %v9050_v55 = vld [vmem:[#allocation41_spill] sm:$0xff] }
 0x186   :  { %v1648_v50 = vsel %vm9039_vm5, %v6958_v4, 0.0  ;;  %vm9042_vm7 = vcmp.eq.s32.totalorder %v8939_v38, %v9041_v54  ;;  %v6998_v20 = vadd.f32 %v1647_v57, %v1471_v2  ;;  %v856_v7 = vadd.f32 %v824_v52, %v648_v56  ;;  %v9049_v2 = vld [vmem:[#allocation65_spill] sm:$0xff]  ;;  %v9058_v38 = vld [vmem:[#allocation60_spill] sm:$0xff]  ;;  %v9067_v54 = vld [vmem:[#allocation47_spill] sm:$0xff] }
 0x187   :  { %9040 = vst [vmem:[#allocation123_spill] sm:$0xff] %v6992_v5  ;;  %v1649_v24 = vsel %vm9042_vm7, %v6962_v36, 0.0  ;;  %v857_v21 = vadd.f32 %v825_v46, %v649_v35  ;;  %vm9044_vm9 = vcmp.eq.s32.totalorder %v8993_v16, %v8983_v39  ;;  %vm9045_vm12 = vcmp.eq.s32.totalorder %v8993_v16, %v8985_v33  ;;  %v9052_v52 = vld [vmem:[#allocation17_spill] sm:$0xff]  ;;  %v9061_v39 = vld [vmem:[#allocation119_spill] sm:$0xff]  ;;  %v9070_v36 = vld [vmem:[#allocation64_spill] sm:$0xff] }
 0x188   :  { %9043 = vst [vmem:[#allocation55_spill] sm:$0xff] %v6998_v20  ;;  %v1032_v59 = vsel %vm9044_vm9, %v6806_v8, 0.0  ;;  %v1033_v32 = vsel %vm9045_vm12, %v6810_v22, 0.0  ;;  %v1062_v29 = vadd.f32 %v1030_v3, %v854_v18  ;;  %v1063_v34 = vadd.f32 %v1031_v53, %v855_v17  ;;  %v9055_v18 = vld [vmem:[#allocation26_spill] sm:$0xff]  ;;  %v9057_v53 = vld [vmem:[#allocation84_spill] sm:$0xff]  ;;  %v9064_v8 = vld [vmem:[#allocation33_spill] sm:$0xff] }
 0x189   :  { %vm9047_vm14 = vcmp.eq.s32.totalorder %v9046_v60, %v8940_v41  ;;  %vm9048_vm15 = vcmp.eq.s32.totalorder %v9046_v60, %v8941_v1  ;;  %vm9051_vm0 = vcmp.eq.s32.totalorder %v9046_v60, %v9050_v55  ;;  %vm9053_vm1 = vcmp.eq.s32.totalorder %v9046_v60, %v9052_v52 }
 0x18a   :  { %v194_v57 = vsel %vm9047_vm14, %v6670_v48, 0.0  ;;  %v195_v56 = vsel %vm9048_vm15, %v6674_v40, 0.0  ;;  %v402_v35 = vsel %vm9051_vm0, %v9049_v2, 0.0  ;;  %v403_v3 = vsel %vm9053_vm1, %v6682_v61, 0.0 }
 0x18b   :  { %vm9054_vm2 = vcmp.eq.s32.totalorder %v9046_v60, %v8947_v43  ;;  %vm9056_vm3 = vcmp.eq.s32.totalorder %v9046_v60, %v9055_v18  ;;  %vm9059_vm4 = vcmp.eq.s32.totalorder %v9046_v60, %v9058_v38  ;;  %vm9060_vm5 = vcmp.eq.s32.totalorder %v9046_v60, %v8950_v23  ;;  %v9062_v43 = vld [vmem:[#allocation52_spill] sm:$0xff]  ;;  %v9065_v18 = vld [vmem:[#allocation23_spill] sm:$0xff]  ;;  %v9068_v38 = vld [vmem:[#allocation70_spill] sm:$0xff] }
 0x18c   :  { %v196_v46 = vsel %vm9054_vm2, %v6686_v51, 0.0  ;;  %v197_v17 = vsel %vm9056_vm3, %v6690_v27, 0.0  ;;  %v404_v20 = vsel %vm9059_vm4, %v9057_v53, 0.0  ;;  %v405_v5 = vsel %vm9060_vm5, %v6698_v15, 0.0  ;;  %v9071_v23 = vld [vmem:[#allocation37_spill] sm:$0xff] }
 0x18d   :  { %v1064_v33 = vadd.f32 %v1032_v59, %v856_v7  ;;  %v1065_v22 = vadd.f32 %v1033_v32, %v857_v21  ;;  %vm9063_vm7 = vcmp.eq.s32.totalorder %v8993_v16, %v9062_v43  ;;  %vm9066_vm9 = vcmp.eq.s32.totalorder %v8993_v16, %v9065_v18 }
 0x18e   :  { %v1238_v51 = vsel %vm9063_vm7, %v9061_v39, 0.0  ;;  %v1239_v27 = vsel %vm9066_vm9, %v9064_v8, 0.0  ;;  %vm9069_vm12 = vcmp.eq.s32.totalorder %v8993_v16, %v9068_v38  ;;  %vm9072_vm14 = vcmp.eq.s32.totalorder %v8993_v16, %v9071_v23  ;;  %v9074_v8 = vld [vmem:[#allocation91_spill] sm:$0xff] }
 0x18f   :  { %v1240_v53 = vsel %vm9069_vm12, %v9067_v54, 0.0  ;;  %v1241_v21 = vsel %vm9072_vm14, %v9070_v36, 0.0  ;;  %v434_v7 = vadd.f32 %v402_v35, %v194_v57  ;;  %v435_v59 = vadd.f32 %v403_v3, %v195_v56  ;;  %v9075_v39 = vld [vmem:[#allocation19_spill] sm:$0xff]  ;;  %v9079_v35 = vld [vmem:[#allocation85_spill] sm:$0xff]  ;;  %v9080_v3 = vld [vmem:[#allocation54_spill] sm:$0xff] }
 0x190   :  { %v436_v32 = vadd.f32 %v404_v20, %v196_v46  ;;  %v437_v43 = vadd.f32 %v405_v5, %v197_v17  ;;  %vm9073_vm15 = vcmp.eq.s32.totalorder %v9046_v60, %v8953_v19  ;;  %vm9076_vm0 = vcmp.eq.s32.totalorder %v9046_v60, %v9075_v39  ;;  %v9082_v17 = vld [vmem:[#allocation79_spill] sm:$0xff] }
 0x191   :  { %v610_v18 = vsel %vm9073_vm15, %v6718_v30, 0.0  ;;  %v611_v38 = vsel %vm9076_vm0, %v9074_v8, 0.0  ;;  %v1270_v54 = vadd.f32 %v1238_v51, %v1062_v29  ;;  %v1271_v15 = vadd.f32 %v1239_v27, %v1063_v34  ;;  %v9083_v51 = vld [vmem:[#allocation24_spill] sm:$0xff] }
 0x192   :  { %vm9077_vm1 = vcmp.eq.s32.totalorder %v9046_v60, %v8958_v28  ;;  %vm9078_vm2 = vcmp.eq.s32.totalorder %v9046_v60, %v8960_v49  ;;  %v1272_v20 = vadd.f32 %v1240_v53, %v1064_v33  ;;  %v1273_v56 = vadd.f32 %v1241_v21, %v1065_v22 }
 0x193   :  { %v612_v57 = vsel %vm9077_vm1, %v6742_v12, 0.0  ;;  %v613_v5 = vsel %vm9078_vm2, %v6746_v26, 0.0  ;;  %vm9081_vm3 = vcmp.eq.s32.totalorder %v8993_v16, %v9080_v3  ;;  %vm9084_vm4 = vcmp.eq.s32.totalorder %v8993_v16, %v9083_v51  ;;  %v9089_v3 = vld [vmem:[#allocation21_spill] sm:$0xff] }
 0x194   :  { %v1446_v46 = vsel %vm9081_vm3, %v9079_v35, 0.0  ;;  %v1447_v27 = vsel %vm9084_vm4, %v9082_v17, 0.0  ;;  %vm9085_vm5 = vcmp.eq.s32.totalorder %v8993_v16, %v9022_v63  ;;  %vm9086_vm7 = vcmp.eq.s32.totalorder %v8993_v16, %v9026_v45  ;;  %v9088_v17 = vld [vmem:[#allocation105_spill] sm:$0xff] }
 0x195   :  { %v1448_v29 = vsel %vm9085_vm5, %v6902_v31, 0.0  ;;  %v1449_v22 = vsel %vm9086_vm7, %v6914_v10, 0.0  ;;  %v642_v33 = vadd.f32 %v610_v18, %v434_v7  ;;  %v643_v34 = vadd.f32 %v611_v38, %v435_v59 }
 0x196   :  { %v644_v53 = vadd.f32 %v612_v57, %v436_v32  ;;  %v645_v21 = vadd.f32 %v613_v5, %v437_v43  ;;  %vm9087_vm9 = vcmp.eq.s32.totalorder %v9046_v60, %v8963_v37  ;;  %vm9090_vm12 = vcmp.eq.s32.totalorder %v9046_v60, %v9089_v3 }
 0x197   :  { %v818_v51 = vsel %vm9087_vm9, %v6758_v9, 0.0  ;;  %v819_v63 = vsel %vm9090_vm12, %v9088_v17, 0.0  ;;  %v7096_v31 = vadd.f32 %v1648_v50, %v1472_v0  ;;  %v7098_v35 = vadd.f32 %v1649_v24, %v1473_v47  ;;  %v9095_v50 = vld [vmem:[#allocation56_spill] sm:$0xff]  ;;  %v9097_v47 = vld [vmem:[#allocation103_spill] sm:$0xff] }
 0x198   :  { %vm9093_vm14 = vcmp.eq.s32.totalorder %v9046_v60, %v8970_v25  ;;  %vm9094_vm15 = vcmp.eq.s32.totalorder %v9046_v60, %v8972_v13  ;;  %v1478_v18 = vadd.f32 %v1446_v46, %v1270_v54  ;;  %v1479_v7 = vadd.f32 %v1447_v27, %v1271_v15  ;;  %v9098_v24 = vld [vmem:[#allocation28_spill] sm:$0xff]  ;;  %v9100_v54 = vld [vmem:[#allocation50_spill] sm:$0xff] }
 0x199   :  { %9091 = vst [vmem:[#allocation72_spill] sm:$0xff] %v7096_v31  ;;  %9092 = vst [vmem:[#allocation67_spill] sm:$0xff] %v7098_v35  ;;  %v820_v38 = vsel %vm9093_vm14, %v6774_v42, 0.0  ;;  %v821_v43 = vsel %vm9094_vm15, %v6778_v62, 0.0  ;;  %v1480_v59 = vadd.f32 %v1448_v29, %v1272_v20  ;;  %v1481_v32 = vadd.f32 %v1449_v22, %v1273_v56  ;;  %v9103_v56 = vld [vmem:[#allocation76_spill] sm:$0xff]  ;;  %v9109_v22 = vld [vmem:[#allocation118_spill] sm:$0xff] }
 0x19a   :  { %vm9096_vm0 = vcmp.eq.s32.totalorder %v8993_v16, %v9095_v50  ;;  %vm9099_vm1 = vcmp.eq.s32.totalorder %v8993_v16, %v9098_v24  ;;  %v850_v5 = vadd.f32 %v818_v51, %v642_v33  ;;  %v851_v35 = vadd.f32 %v819_v63, %v643_v34  ;;  %v9110_v33 = vld [vmem:[#allocation39_spill] sm:$0xff] }
 0x19b   :  { %v1654_v0 = vsel %vm9096_vm0, %v6922_v6, 0.0  ;;  %v1655_v57 = vsel %vm9099_vm1, %v9097_v47, 0.0  ;;  %v852_v31 = vadd.f32 %v820_v38, %v644_v53  ;;  %v853_v45 = vadd.f32 %v821_v43, %v645_v21  ;;  %v9112_v53 = vld [vmem:[#allocation115_spill] sm:$0xff]  ;;  %v9113_v21 = vld [vmem:[#allocation69_spill] sm:$0xff] }
 0x19c   :  { %vm9101_vm2 = vcmp.eq.s32.totalorder %v9046_v60, %v9100_v54  ;;  %vm9102_vm3 = vcmp.eq.s32.totalorder %v9046_v60, %v8978_v14  ;;  %vm9104_vm4 = vcmp.eq.s32.totalorder %v9103_v56, %v8940_v41  ;;  %vm9105_vm5 = vcmp.eq.s32.totalorder %v9103_v56, %v8941_v1  ;;  %v9115_v43 = vld [vmem:[#allocation117_spill] sm:$0xff]  ;;  %v9122_v41 = vld [vmem:[#allocation26_spill] sm:$0xff] }
 0x19d   :  { %v1026_v15 = vsel %vm9101_vm2, %v6790_v58, 0.0  ;;  %v1027_v20 = vsel %vm9102_vm3, %v6794_v44, 0.0  ;;  %v202_v46 = vsel %vm9104_vm4, %v6670_v48, 0.0  ;;  %v203_v63 = vsel %vm9105_vm5, %v6674_v40, 0.0  ;;  %v9121_v40 = vld [vmem:[#allocation81_spill] sm:$0xff]  ;;  %v9124_v48 = vld [vmem:[#allocation84_spill] sm:$0xff] }
 0x19e   :  { %vm9106_vm7 = vcmp.eq.s32.totalorder %v9103_v56, %v9050_v55  ;;  %vm9107_vm9 = vcmp.eq.s32.totalorder %v9103_v56, %v9052_v52  ;;  %vm9108_vm12 = vcmp.eq.s32.totalorder %v8993_v16, %v9038_v11  ;;  %vm9111_vm14 = vcmp.eq.s32.totalorder %v8993_v16, %v9110_v33  ;;  %v9116_v55 = vld [vmem:[#allocation36_spill] sm:$0xff]  ;;  %v9127_v11 = vld [vmem:[#allocation86_spill] sm:$0xff] }
 0x19f   :  { %v410_v51 = vsel %vm9106_vm7, %v9049_v2, 0.0  ;;  %v411_v27 = vsel %vm9107_vm9, %v6682_v61, 0.0  ;;  %v1656_v29 = vsel %vm9108_vm12, %v6958_v4, 0.0  ;;  %v1657_v34 = vsel %vm9111_vm14, %v9109_v22, 0.0  ;;  %v9118_v61 = vld [vmem:[#allocation80_spill] sm:$0xff]  ;;  %v9119_v2 = vld [vmem:[#allocation58_spill] sm:$0xff] }
 0x1a0   :  { %vm9114_vm15 = vcmp.eq.s32.totalorder %v9046_v60, %v9113_v21  ;;  %vm9117_vm0 = vcmp.eq.s32.totalorder %v9046_v60, %v9116_v55  ;;  %vm9120_vm1 = vcmp.eq.s32.totalorder %v9103_v56, %v9119_v2  ;;  %vm9123_vm2 = vcmp.eq.s32.totalorder %v9103_v56, %v9122_v41  ;;  %v9125_v33 = vld [vmem:[#allocation60_spill] sm:$0xff]  ;;  %v9128_v4 = vld [vmem:[#allocation27_spill] sm:$0xff] }
 0x1a1   :  { %v1028_v38 = vsel %vm9114_vm15, %v9112_v53, 0.0  ;;  %v1029_v52 = vsel %vm9117_vm0, %v9115_v43, 0.0  ;;  %v204_v1 = vsel %vm9120_vm1, %v9118_v61, 0.0  ;;  %v205_v16 = vsel %vm9123_vm2, %v9121_v40, 0.0 }
 0x1a2   :  { %vm9126_vm3 = vcmp.eq.s32.totalorder %v9103_v56, %v9125_v33  ;;  %vm9129_vm4 = vcmp.eq.s32.totalorder %v9103_v56, %v9128_v4  ;;  %v1058_v47 = vadd.f32 %v1026_v15, %v850_v5  ;;  %v1059_v50 = vadd.f32 %v1027_v20, %v851_v35  ;;  %v9133_v4 = vld [vmem:[#allocation52_spill] sm:$0xff]  ;;  %v9135_v35 = vld [vmem:[#allocation33_spill] sm:$0xff]  ;;  %v9136_v15 = vld [vmem:[#allocation23_spill] sm:$0xff] }
 0x1a3   :  { %v412_v22 = vsel %vm9126_vm3, %v9124_v48, 0.0  ;;  %v413_v24 = vsel %vm9129_vm4, %v9127_v11, 0.0  ;;  %v442_v6 = vadd.f32 %v410_v51, %v202_v46  ;;  %v443_v2 = vadd.f32 %v411_v27, %v203_v63  ;;  %v9132_v48 = vld [vmem:[#allocation119_spill] sm:$0xff]  ;;  %v9139_v46 = vld [vmem:[#allocation70_spill] sm:$0xff] }
 0x1a4   :  { %v1060_v61 = vadd.f32 %v1028_v38, %v852_v31  ;;  %v1061_v55 = vadd.f32 %v1029_v52, %v853_v45  ;;  %vm9130_vm5 = vcmp.eq.s32.totalorder %v9103_v56, %v8953_v19  ;;  %vm9131_vm7 = vcmp.eq.s32.totalorder %v9103_v56, %v9075_v39  ;;  %v9138_v20 = vld [vmem:[#allocation47_spill] sm:$0xff] }
 0x1a5   :  { %v618_v41 = vsel %vm9130_vm5, %v6718_v30, 0.0  ;;  %v619_v33 = vsel %vm9131_vm7, %v9074_v8, 0.0  ;;  %vm9134_vm9 = vcmp.eq.s32.totalorder %v9046_v60, %v9133_v4  ;;  %vm9137_vm12 = vcmp.eq.s32.totalorder %v9046_v60, %v9136_v15 }
 0x1a6   :  { %v1234_v5 = vsel %vm9134_vm9, %v9132_v48, 0.0  ;;  %v1235_v31 = vsel %vm9137_vm12, %v9135_v35, 0.0  ;;  %v444_v45 = vadd.f32 %v412_v22, %v204_v1  ;;  %v445_v52 = vadd.f32 %v413_v24, %v205_v16 }
 0x1a7   :  { %vm9140_vm14 = vcmp.eq.s32.totalorder %v9046_v60, %v9139_v46  ;;  %vm9141_vm15 = vcmp.eq.s32.totalorder %v9046_v60, %v9071_v23  ;;  %vm9142_vm0 = vcmp.eq.s32.totalorder %v9103_v56, %v8958_v28  ;;  %vm9143_vm1 = vcmp.eq.s32.totalorder %v9103_v56, %v8960_v49 }
 0x1a8   :  { %v1236_v63 = vsel %vm9140_vm14, %v9138_v20, 0.0  ;;  %v1237_v51 = vsel %vm9141_vm15, %v9070_v36, 0.0  ;;  %v620_v27 = vsel %vm9142_vm0, %v6742_v12, 0.0  ;;  %v621_v1 = vsel %vm9143_vm1, %v6746_v26, 0.0 }
 0x1a9   :  { %v7204_v24 = vadd.f32 %v1654_v0, %v1478_v18  ;;  %v7206_v22 = vadd.f32 %v1655_v57, %v1479_v7  ;;  %v650_v38 = vadd.f32 %v618_v41, %v442_v6  ;;  %v651_v16 = vadd.f32 %v619_v33, %v443_v2  ;;  %v9148_v7 = vld [vmem:[#allocation85_spill] sm:$0xff]  ;;  %v9149_v41 = vld [vmem:[#allocation54_spill] sm:$0xff]  ;;  %v9151_v2 = vld [vmem:[#allocation79_spill] sm:$0xff] }
 0x1aa   :  { %v1266_v39 = vadd.f32 %v1234_v5, %v1058_v47  ;;  %v1267_v8 = vadd.f32 %v1235_v31, %v1059_v50  ;;  %vm9146_vm2 = vcmp.eq.s32.totalorder %v9103_v56, %v8963_v37  ;;  %vm9147_vm3 = vcmp.eq.s32.totalorder %v9103_v56, %v9089_v3  ;;  %v9152_v50 = vld [vmem:[#allocation24_spill] sm:$0xff]  ;;  %v9157_v33 = vld [vmem:[#allocation71_spill] sm:$0xff]  ;;  %v9159_v31 = vld [vmem:[#allocation38_spill] sm:$0xff] }
 0x1ab   :  { %9144 = vst [vmem:[#allocation74_spill] sm:$0xff] %v7204_v24  ;;  %9145 = vst [vmem:[#allocation34_spill] sm:$0xff] %v7206_v22  ;;  %v826_v19 = vsel %vm9146_vm2, %v6758_v9, 0.0  ;;  %v827_v28 = vsel %vm9147_vm3, %v9088_v17, 0.0  ;;  %v1268_v49 = vadd.f32 %v1236_v63, %v1060_v61  ;;  %v1269_v26 = vadd.f32 %v1237_v51, %v1061_v55  ;;  %v9156_v55 = vld [vmem:[#allocation89_spill] sm:$0xff] }
 0x1ac   :  { %v652_v18 = vadd.f32 %v620_v27, %v444_v45  ;;  %v653_v0 = vadd.f32 %v621_v1, %v445_v52  ;;  %vm9150_vm4 = vcmp.eq.s32.totalorder %v9046_v60, %v9149_v41  ;;  %vm9153_vm5 = vcmp.eq.s32.totalorder %v9046_v60, %v9152_v50 }
 0x1ad   :  { %v1442_v6 = vsel %vm9150_vm4, %v9148_v7, 0.0  ;;  %v1443_v47 = vsel %vm9153_vm5, %v9151_v2, 0.0  ;;  %vm9154_vm7 = vcmp.eq.s32.totalorder %v9103_v56, %v8970_v25  ;;  %vm9155_vm9 = vcmp.eq.s32.totalorder %v9103_v56, %v8972_v13 }
 0x1ae   :  { %v828_v57 = vsel %vm9154_vm7, %v6774_v42, 0.0  ;;  %v829_v61 = vsel %vm9155_vm9, %v6778_v62, 0.0  ;;  %vm9158_vm12 = vcmp.eq.s32.totalorder %v9046_v60, %v9157_v33  ;;  %vm9160_vm14 = vcmp.eq.s32.totalorder %v9046_v60, %v9159_v31 }
 0x1af   :  { %v1444_v5 = vsel %vm9158_vm12, %v9156_v55, 0.0  ;;  %v1445_v45 = vsel %vm9160_vm14, %v6914_v10, 0.0  ;;  %v858_v52 = vadd.f32 %v826_v19, %v650_v38  ;;  %v859_v63 = vadd.f32 %v827_v28, %v651_v16  ;;  %v9169_v38 = vld [vmem:[#allocation56_spill] sm:$0xff] }
 0x1b0   :  { %v7240_v51 = vadd.f32 %v1656_v29, %v1480_v59  ;;  %v7242_v27 = vadd.f32 %v1657_v34, %v1481_v32  ;;  %vm9163_vm15 = vcmp.eq.s32.totalorder %v9103_v56, %v9100_v54  ;;  %vm9164_vm0 = vcmp.eq.s32.totalorder %v9103_v56, %v8978_v14  ;;  %v9166_v32 = vld [vmem:[#allocation36_spill] sm:$0xff]  ;;  %v9168_v34 = vld [vmem:[#allocation109_spill] sm:$0xff] }
 0x1b1   :  { %v1034_v1 = vsel %vm9163_vm15, %v6790_v58, 0.0  ;;  %v1035_v22 = vsel %vm9164_vm0, %v6794_v44, 0.0  ;;  %v1474_v24 = vadd.f32 %v1442_v6, %v1266_v39  ;;  %v1475_v13 = vadd.f32 %v1443_v47, %v1267_v8  ;;  %v9171_v8 = vld [vmem:[#allocation103_spill] sm:$0xff]  ;;  %v9172_v16 = vld [vmem:[#allocation28_spill] sm:$0xff]  ;;  %v9175_v6 = vld [vmem:[#allocation73_spill] sm:$0xff] }
 0x1b2   :  { %9161 = vst [vmem:[#allocation35_spill] sm:$0xff] %v7240_v51  ;;  %9162 = vst [vmem:[#allocation8_spill] sm:$0xff] %v7242_v27  ;;  %v860_v62 = vadd.f32 %v828_v57, %v652_v18  ;;  %v861_v25 = vadd.f32 %v829_v61, %v653_v0  ;;  %v1476_v19 = vadd.f32 %v1444_v5, %v1268_v49  ;;  %v9174_v0 = vld [vmem:[#allocation113_spill] sm:$0xff]  ;;  %v9177_v57 = vld [vmem:[#allocation118_spill] sm:$0xff] }
 0x1b3   :  { %v1477_v28 = vadd.f32 %v1445_v45, %v1269_v26  ;;  %vm9165_vm1 = vcmp.eq.s32.totalorder %v9103_v56, %v9113_v21  ;;  %vm9167_vm2 = vcmp.eq.s32.totalorder %v9103_v56, %v9166_v32  ;;  %vm9170_vm3 = vcmp.eq.s32.totalorder %v9046_v60, %v9169_v38  ;;  %v9178_v61 = vld [vmem:[#allocation39_spill] sm:$0xff]  ;;  %v9184_v27 = vld [vmem:[#allocation48_spill] sm:$0xff]  ;;  %v9185_v51 = vld [vmem:[#allocation97_spill] sm:$0xff] }
 0x1b4   :  { %v1036_v59 = vsel %vm9165_vm1, %v9112_v53, 0.0  ;;  %v1037_v29 = vsel %vm9167_vm2, %v9115_v43, 0.0  ;;  %v1650_v39 = vsel %vm9170_vm3, %v9168_v34, 0.0  ;;  %vm9173_vm4 = vcmp.eq.s32.totalorder %v9046_v60, %v9172_v16  ;;  %v9200_v32 = vld [vmem:[#allocation58_spill] sm:$0xff]  ;;  %v9204_v14 = vld [vmem:[#allocation84_spill] sm:$0xff]  ;;  %v9213_v58 = vld [vmem:[#allocation91_spill] sm:$0xff] }
 0x1b5   :  { %v1651_v26 = vsel %vm9173_vm4, %v9171_v8, 0.0  ;;  %v1066_v49 = vadd.f32 %v1034_v1, %v858_v52  ;;  %v1067_v18 = vadd.f32 %v1035_v22, %v859_v63  ;;  %vm9176_vm5 = vcmp.eq.s32.totalorder %v9046_v60, %v9175_v6  ;;  %v9202_v21 = vld [vmem:[#allocation26_spill] sm:$0xff]  ;;  %v9205_v44 = vld [vmem:[#allocation60_spill] sm:$0xff] }
 0x1b6   :  { %v1652_v47 = vsel %vm9176_vm5, %v9174_v0, 0.0  ;;  %vm9179_vm7 = vcmp.eq.s32.totalorder %v9046_v60, %v9178_v61  ;;  %vm9180_vm9 = vcmp.eq.s32.totalorder %v9103_v56, %v9133_v4  ;;  %vm9181_vm12 = vcmp.eq.s32.totalorder %v9103_v56, %v9136_v15  ;;  %v9186_v4 = vld [vmem:[#allocation40_spill] sm:$0xff]  ;;  %v9188_v61 = vld [vmem:[#allocation49_spill] sm:$0xff]  ;;  %v9189_v15 = vld [vmem:[#allocation15_spill] sm:$0xff] }
 0x1b7   :  { %v1653_v5 = vsel %vm9179_vm7, %v9177_v57, 0.0  ;;  %v1242_v45 = vsel %vm9180_vm9, %v9132_v48, 0.0  ;;  %v1243_v22 = vsel %vm9181_vm12, %v9135_v35, 0.0  ;;  %v1068_v52 = vadd.f32 %v1036_v59, %v860_v62  ;;  %v9192_v59 = vld [vmem:[#allocation41_spill] sm:$0xff]  ;;  %v9199_v0 = vld [vmem:[#allocation80_spill] sm:$0xff] }
 0x1b8   :  { %v1069_v63 = vadd.f32 %v1037_v29, %v861_v25  ;;  %vm9182_vm14 = vcmp.eq.s32.totalorder %v9103_v56, %v9139_v46  ;;  %vm9183_vm15 = vcmp.eq.s32.totalorder %v9103_v56, %v9071_v23  ;;  %vm9187_vm0 = vcmp.eq.s32.totalorder %v9185_v51, %v9186_v4  ;;  %v9191_v25 = vld [vmem:[#allocation65_spill] sm:$0xff]  ;;  %v9194_v46 = vld [vmem:[#allocation66_spill] sm:$0xff] }
 0x1b9   :  { %v1244_v1 = vsel %vm9182_vm14, %v9138_v20, 0.0  ;;  %v1245_v60 = vsel %vm9183_vm15, %v9070_v36, 0.0  ;;  %v206_v48 = vsel %vm9187_vm0, %v9184_v27, 0.0  ;;  %vm9190_vm1 = vcmp.eq.s32.totalorder %v9185_v51, %v9189_v15  ;;  %v9195_v20 = vld [vmem:[#allocation17_spill] sm:$0xff] }
 0x1ba   :  { %v207_v62 = vsel %vm9190_vm1, %v9188_v61, 0.0  ;;  %vm9193_vm2 = vcmp.eq.s32.totalorder %v9185_v51, %v9192_v59  ;;  %vm9196_vm3 = vcmp.eq.s32.totalorder %v9185_v51, %v9195_v20  ;;  %v7308_v36 = vadd.f32 %v1650_v39, %v1474_v24 }
 0x1bb   :  { %v414_v29 = vsel %vm9193_vm2, %v9191_v25, 0.0  ;;  %v415_v23 = vsel %vm9196_vm3, %v9194_v46, 0.0  ;;  %v7310_v35 = vadd.f32 %v1651_v26, %v1475_v13  ;;  %v1274_v57 = vadd.f32 %v1242_v45, %v1066_v49  ;;  %v9207_v13 = vld [vmem:[#allocation27_spill] sm:$0xff] }
 0x1bc   :  { %9197 = vst [vmem:[#allocation9_spill] sm:$0xff] %v7308_v36  ;;  %v1275_v6 = vadd.f32 %v1243_v22, %v1067_v18  ;;  %vm9201_vm4 = vcmp.eq.s32.totalorder %v9185_v51, %v9200_v32  ;;  %vm9203_vm5 = vcmp.eq.s32.totalorder %v9185_v51, %v9202_v21  ;;  %vm9206_vm7 = vcmp.eq.s32.totalorder %v9185_v51, %v9205_v44  ;;  %v9211_v36 = vld [vmem:[#allocation44_spill] sm:$0xff] }
 0x1bd   :  { %9198 = vst [vmem:[#allocation10_spill] sm:$0xff] %v7310_v35  ;;  %v208_v43 = vsel %vm9201_vm4, %v9199_v0, 0.0  ;;  %v209_v53 = vsel %vm9203_vm5, %v9121_v40, 0.0  ;;  %v416_v24 = vsel %vm9206_vm7, %v9204_v14, 0.0  ;;  %vm9208_vm9 = vcmp.eq.s32.totalorder %v9185_v51, %v9207_v13 }
 0x1be   :  { %v417_v39 = vsel %vm9208_vm9, %v9127_v11, 0.0  ;;  %v1276_v26 = vadd.f32 %v1244_v1, %v1068_v52  ;;  %v1277_v49 = vadd.f32 %v1245_v60, %v1069_v63  ;;  %v446_v18 = vadd.f32 %v414_v29, %v206_v48  ;;  %v9214_v52 = vld [vmem:[#allocation19_spill] sm:$0xff] }
 0x1bf   :  { %v447_v45 = vadd.f32 %v415_v23, %v207_v62  ;;  %vm9209_vm12 = vcmp.eq.s32.totalorder %v9103_v56, %v9149_v41  ;;  %vm9210_vm14 = vcmp.eq.s32.totalorder %v9103_v56, %v9152_v50  ;;  %vm9212_vm15 = vcmp.eq.s32.totalorder %v9185_v51, %v9211_v36  ;;  %v9220_v50 = vld [vmem:[#allocation63_spill] sm:$0xff]  ;;  %v9222_v41 = vld [vmem:[#allocation96_spill] sm:$0xff] }
 0x1c0   :  { %v1450_v22 = vsel %vm9209_vm12, %v9148_v7, 0.0  ;;  %v1451_v35 = vsel %vm9210_vm14, %v9151_v2, 0.0  ;;  %v622_v54 = vsel %vm9212_vm15, %v6718_v30, 0.0  ;;  %vm9215_vm0 = vcmp.eq.s32.totalorder %v9185_v51, %v9214_v52 }
 0x1c1   :  { %v623_v48 = vsel %vm9215_vm0, %v9213_v58, 0.0  ;;  %vm9216_vm1 = vcmp.eq.s32.totalorder %v9103_v56, %v9157_v33  ;;  %vm9217_vm2 = vcmp.eq.s32.totalorder %v9103_v56, %v9159_v31  ;;  %v448_v1 = vadd.f32 %v416_v24, %v208_v43  ;;  %v9223_v33 = vld [vmem:[#allocation29_spill] sm:$0xff] }
 0x1c2   :  { %v1452_v23 = vsel %vm9216_vm1, %v9156_v55, 0.0  ;;  %v1453_v63 = vsel %vm9217_vm2, %v6914_v10, 0.0  ;;  %v449_v60 = vadd.f32 %v417_v39, %v209_v53  ;;  %v7352_v62 = vadd.f32 %v1652_v47, %v1476_v19  ;;  %v9232_v39 = vld [vmem:[#allocation98_spill] sm:$0xff] }
 0x1c3   :  { %v7354_v29 = vadd.f32 %v1653_v5, %v1477_v28  ;;  %vm9221_vm3 = vcmp.eq.s32.totalorder %v9185_v51, %v9220_v50  ;;  %vm9224_vm4 = vcmp.eq.s32.totalorder %v9185_v51, %v9223_v33  ;;  %v1482_v7 = vadd.f32 %v1450_v22, %v1274_v57  ;;  %v9230_v57 = vld [vmem:[#allocation32_spill] sm:$0xff] }
 0x1c4   :  { %9218 = vst [vmem:[#allocation11_spill] sm:$0xff] %v7352_v62  ;;  %v624_v2 = vsel %vm9221_vm3, %v6742_v12, 0.0  ;;  %v625_v55 = vsel %vm9224_vm4, %v9222_v41, 0.0  ;;  %v1483_v52 = vadd.f32 %v1451_v35, %v1275_v6  ;;  %v654_v31 = vadd.f32 %v622_v54, %v446_v18  ;;  %v9227_v54 = vld [vmem:[#allocation68_spill] sm:$0xff]  ;;  %v9244_v62 = vld [vmem:[#allocation50_spill] sm:$0xff] }
 0x1c5   :  { %9219 = vst [vmem:[#allocation12_spill] sm:$0xff] %v7354_v29  ;;  %v655_v10 = vadd.f32 %v623_v48, %v447_v45  ;;  %v7364_v43 = vadd.f32 %v1452_v23, %v1276_v26  ;;  %v7366_v53 = vadd.f32 %v1453_v63, %v1277_v49  ;;  %vm9225_vm5 = vcmp.eq.s32.totalorder %v9185_v51, %v8963_v37  ;;  %v9229_v6 = vld [vmem:[#allocation108_spill] sm:$0xff]  ;;  %v9243_v29 = vld [vmem:[#allocation110_spill] sm:$0xff] }
 0x1c6   :  { %v830_v19 = vsel %vm9225_vm5, %v6758_v9, 0.0  ;;  %vm9226_vm7 = vcmp.eq.s32.totalorder %v9185_v51, %v9089_v3  ;;  %v656_v47 = vadd.f32 %v624_v2, %v448_v1  ;;  %v657_v5 = vadd.f32 %v625_v55, %v449_v60 }
 0x1c7   :  { %v831_v28 = vsel %vm9226_vm7, %v9088_v17, 0.0  ;;  %vm9228_vm9 = vcmp.eq.s32.totalorder %v9185_v51, %v9227_v54  ;;  %vm9231_vm12 = vcmp.eq.s32.totalorder %v9185_v51, %v9230_v57  ;;  %vm9233_vm14 = vcmp.eq.s32.totalorder %v9232_v39, %v9186_v4 }
 0x1c8   :  { %v832_v35 = vsel %vm9228_vm9, %v6774_v42, 0.0  ;;  %v833_v24 = vsel %vm9231_vm12, %v9229_v6, 0.0  ;;  %v210_v26 = vsel %vm9233_vm14, %v9184_v27, 0.0  ;;  %vm9234_vm15 = vcmp.eq.s32.totalorder %v9232_v39, %v9189_v15 }
 0x1c9   :  { %v211_v2 = vsel %vm9234_vm15, %v9188_v61, 0.0  ;;  %vm9235_vm0 = vcmp.eq.s32.totalorder %v9232_v39, %v9192_v59  ;;  %vm9236_vm1 = vcmp.eq.s32.totalorder %v9232_v39, %v9195_v20  ;;  %vm9237_vm2 = vcmp.eq.s32.totalorder %v9103_v56, %v9169_v38  ;;  %v9261_v20 = vld [vmem:[#allocation118_spill] sm:$0xff] }
 0x1ca   :  { %v418_v55 = vsel %vm9235_vm0, %v9191_v25, 0.0  ;;  %v419_v49 = vsel %vm9236_vm1, %v9194_v46, 0.0  ;;  %v1658_v18 = vsel %vm9237_vm2, %v9168_v34, 0.0  ;;  %vm9238_vm3 = vcmp.eq.s32.totalorder %v9103_v56, %v9172_v16 }
 0x1cb   :  { %v1659_v45 = vsel %vm9238_vm3, %v9171_v8, 0.0  ;;  %v862_v22 = vadd.f32 %v830_v19, %v654_v31  ;;  %v863_v48 = vadd.f32 %v831_v28, %v655_v10  ;;  %vm9239_vm4 = vcmp.eq.s32.totalorder %v9232_v39, %v9200_v32  ;;  %v9247_v32 = vld [vmem:[#allocation22_spill] sm:$0xff] }
 0x1cc   :  { %v212_v23 = vsel %vm9239_vm4, %v9199_v0, 0.0  ;;  %vm9240_vm5 = vcmp.eq.s32.totalorder %v9232_v39, %v9202_v21  ;;  %vm9241_vm7 = vcmp.eq.s32.totalorder %v9232_v39, %v9205_v44  ;;  %vm9242_vm9 = vcmp.eq.s32.totalorder %v9232_v39, %v9207_v13  ;;  %v9258_v0 = vld [vmem:[#allocation113_spill] sm:$0xff] }
 0x1cd   :  { %v213_v63 = vsel %vm9240_vm5, %v9121_v40, 0.0  ;;  %v420_v1 = vsel %vm9241_vm7, %v9204_v14, 0.0  ;;  %v421_v10 = vsel %vm9242_vm9, %v9127_v11, 0.0  ;;  %v864_v31 = vadd.f32 %v832_v35, %v656_v47  ;;  %v9246_v40 = vld [vmem:[#allocation114_spill] sm:$0xff]  ;;  %v9250_v47 = vld [vmem:[#allocation19_spill] sm:$0xff] }
 0x1ce   :  { %v865_v60 = vadd.f32 %v833_v24, %v657_v5  ;;  %v450_v19 = vadd.f32 %v418_v55, %v210_v26  ;;  %v451_v28 = vadd.f32 %v419_v49, %v211_v2  ;;  %vm9245_vm12 = vcmp.eq.s32.totalorder %v9185_v51, %v9244_v62  ;;  %v9252_v35 = vld [vmem:[#allocation115_spill] sm:$0xff]  ;;  %v9253_v24 = vld [vmem:[#allocation69_spill] sm:$0xff]  ;;  %v9256_v55 = vld [vmem:[#allocation36_spill] sm:$0xff] }
 0x1cf   :  { %v1038_v21 = vsel %vm9245_vm12, %v9243_v29, 0.0  ;;  %vm9248_vm14 = vcmp.eq.s32.totalorder %v9185_v51, %v9247_v32  ;;  %vm9249_vm15 = vcmp.eq.s32.totalorder %v9232_v39, %v9211_v36  ;;  %vm9251_vm0 = vcmp.eq.s32.totalorder %v9232_v39, %v9250_v47  ;;  %v9255_v2 = vld [vmem:[#allocation117_spill] sm:$0xff]  ;;  %v9262_v47 = vld [vmem:[#allocation39_spill] sm:$0xff] }
 0x1d0   :  { %v1039_v44 = vsel %vm9248_vm14, %v9246_v40, 0.0  ;;  %v626_v13 = vsel %vm9249_vm15, %v6718_v30, 0.0  ;;  %v627_v5 = vsel %vm9251_vm0, %v9213_v58, 0.0  ;;  %vm9254_vm1 = vcmp.eq.s32.totalorder %v9185_v51, %v9253_v24  ;;  %v9259_v36 = vld [vmem:[#allocation73_spill] sm:$0xff] }
 0x1d1   :  { %v1040_v26 = vsel %vm9254_vm1, %v9252_v35, 0.0  ;;  %vm9257_vm2 = vcmp.eq.s32.totalorder %v9185_v51, %v9256_v55  ;;  %v452_v11 = vadd.f32 %v420_v1, %v212_v23  ;;  %v453_v14 = vadd.f32 %v421_v10, %v213_v63 }
 0x1d2   :  { %v1041_v49 = vsel %vm9257_vm2, %v9255_v2, 0.0  ;;  %vm9260_vm3 = vcmp.eq.s32.totalorder %v9103_v56, %v9259_v36  ;;  %vm9263_vm4 = vcmp.eq.s32.totalorder %v9103_v56, %v9262_v47  ;;  %vm9264_vm5 = vcmp.eq.s32.totalorder %v9232_v39, %v9220_v50 }
 0x1d3   :  { %v1660_v30 = vsel %vm9260_vm3, %v9258_v0, 0.0  ;;  %v1661_v58 = vsel %vm9263_vm4, %v9261_v20, 0.0  ;;  %v628_v46 = vsel %vm9264_vm5, %v6742_v12, 0.0  ;;  %vm9265_vm7 = vcmp.eq.s32.totalorder %v9232_v39, %v9223_v33  ;;  %v9268_v12 = vld [vmem:[#allocation119_spill] sm:$0xff]  ;;  %v9269_v33 = vld [vmem:[#allocation52_spill] sm:$0xff] }
 0x1d4   :  { %v629_v23 = vsel %vm9265_vm7, %v9222_v41, 0.0  ;;  %v1070_v63 = vadd.f32 %v1038_v21, %v862_v22  ;;  %v1071_v1 = vadd.f32 %v1039_v44, %v863_v48  ;;  %v658_v10 = vadd.f32 %v626_v13, %v450_v19  ;;  %v9271_v44 = vld [vmem:[#allocation33_spill] sm:$0xff]  ;;  %v9272_v13 = vld [vmem:[#allocation23_spill] sm:$0xff]  ;;  %v9275_v19 = vld [vmem:[#allocation70_spill] sm:$0xff] }
 0x1d5   :  { %v659_v59 = vadd.f32 %v627_v5, %v451_v28  ;;  %v1072_v25 = vadd.f32 %v1040_v26, %v864_v31  ;;  %v1073_v15 = vadd.f32 %v1041_v49, %v865_v60  ;;  %vm9266_vm9 = vcmp.eq.s32.totalorder %v9232_v39, %v8963_v37  ;;  %v9274_v60 = vld [vmem:[#allocation47_spill] sm:$0xff]  ;;  %v9277_v5 = vld [vmem:[#allocation64_spill] sm:$0xff]  ;;  %v9278_v26 = vld [vmem:[#allocation37_spill] sm:$0xff] }
 0x1d6   :  { %v834_v56 = vsel %vm9266_vm9, %v6758_v9, 0.0  ;;  %vm9267_vm12 = vcmp.eq.s32.totalorder %v9232_v39, %v9089_v3  ;;  %vm9270_vm14 = vcmp.eq.s32.totalorder %v9185_v51, %v9269_v33  ;;  %vm9273_vm15 = vcmp.eq.s32.totalorder %v9185_v51, %v9272_v13 }
 0x1d7   :  { %v835_v50 = vsel %vm9267_vm12, %v9088_v17, 0.0  ;;  %v1246_v21 = vsel %vm9270_vm14, %v9268_v12, 0.0  ;;  %v1247_v22 = vsel %vm9273_vm15, %v9271_v44, 0.0  ;;  %v660_v48 = vadd.f32 %v628_v46, %v452_v11 }
 0x1d8   :  { %v661_v31 = vadd.f32 %v629_v23, %v453_v14  ;;  %vm9276_vm0 = vcmp.eq.s32.totalorder %v9185_v51, %v9275_v19  ;;  %vm9279_vm1 = vcmp.eq.s32.totalorder %v9185_v51, %v9278_v26  ;;  %vm9280_vm2 = vcmp.eq.s32.totalorder %v9232_v39, %v9227_v54 }
 0x1d9   :  { %v1248_v28 = vsel %vm9276_vm0, %v9274_v60, 0.0  ;;  %v1249_v49 = vsel %vm9279_vm1, %v9277_v5, 0.0  ;;  %v836_v3 = vsel %vm9280_vm2, %v6774_v42, 0.0  ;;  %vm9281_vm3 = vcmp.eq.s32.totalorder %v9232_v39, %v9230_v57 }
 0x1da   :  { %v837_v14 = vsel %vm9281_vm3, %v9229_v6, 0.0  ;;  %v7496_v11 = vadd.f32 %v1658_v18, %v1482_v7  ;;  %v7498_v46 = vadd.f32 %v1659_v45, %v1483_v52  ;;  %v866_v23 = vadd.f32 %v834_v56, %v658_v10  ;;  %v9286_v52 = vld [vmem:[#allocation85_spill] sm:$0xff]  ;;  %v9287_v45 = vld [vmem:[#allocation54_spill] sm:$0xff] }
 0x1db   :  { %v867_v17 = vadd.f32 %v835_v50, %v659_v59  ;;  %v1278_v37 = vadd.f32 %v1246_v21, %v1070_v63  ;;  %v1279_v9 = vadd.f32 %v1247_v22, %v1071_v1  ;;  %vm9284_vm4 = vcmp.eq.s32.totalorder %v9232_v39, %v9244_v62  ;;  %v9289_v59 = vld [vmem:[#allocation79_spill] sm:$0xff]  ;;  %v9290_v63 = vld [vmem:[#allocation24_spill] sm:$0xff]  ;;  %v9298_v22 = vld [vmem:[#allocation38_spill] sm:$0xff] }
 0x1dc   :  { %9282 = vst [vmem:[#allocation13_spill] sm:$0xff] %v7496_v11  ;;  %9283 = vst [vmem:[#allocation75_spill] sm:$0xff] %v7498_v46  ;;  %v1042_v41 = vsel %vm9284_vm4, %v9243_v29, 0.0  ;;  %vm9285_vm5 = vcmp.eq.s32.totalorder %v9232_v39, %v9247_v32  ;;  %v1280_v57 = vadd.f32 %v1248_v28, %v1072_v25  ;;  %v1281_v6 = vadd.f32 %v1249_v49, %v1073_v15  ;;  %v9294_v15 = vld [vmem:[#allocation89_spill] sm:$0xff]  ;;  %v9295_v25 = vld [vmem:[#allocation71_spill] sm:$0xff] }
 0x1dd   :  { %v1043_v54 = vsel %vm9285_vm5, %v9246_v40, 0.0  ;;  %v868_v7 = vadd.f32 %v836_v3, %v660_v48  ;;  %v869_v18 = vadd.f32 %v837_v14, %v661_v31  ;;  %vm9288_vm7 = vcmp.eq.s32.totalorder %v9185_v51, %v9287_v45  ;;  %v9297_v21 = vld [vmem:[#allocation95_spill] sm:$0xff] }
 0x1de   :  { %v1454_v50 = vsel %vm9288_vm7, %v9286_v52, 0.0  ;;  %vm9291_vm9 = vcmp.eq.s32.totalorder %v9185_v51, %v9290_v63  ;;  %vm9292_vm12 = vcmp.eq.s32.totalorder %v9232_v39, %v9253_v24  ;;  %vm9293_vm14 = vcmp.eq.s32.totalorder %v9232_v39, %v9256_v55 }
 0x1df   :  { %v1455_v1 = vsel %vm9291_vm9, %v9289_v59, 0.0  ;;  %v1044_v10 = vsel %vm9292_vm12, %v9252_v35, 0.0  ;;  %v1045_v3 = vsel %vm9293_vm14, %v9255_v2, 0.0  ;;  %vm9296_vm15 = vcmp.eq.s32.totalorder %v9185_v51, %v9295_v25 }
 0x1e0   :  { %v1456_v56 = vsel %vm9296_vm15, %v9294_v15, 0.0  ;;  %vm9299_vm0 = vcmp.eq.s32.totalorder %v9185_v51, %v9298_v22  ;;  %v1074_v31 = vadd.f32 %v1042_v41, %v866_v23  ;;  %v1075_v28 = vadd.f32 %v1043_v54, %v867_v17 }
 0x1e1   :  { %v1457_v48 = vsel %vm9299_vm0, %v9297_v21, 0.0  ;;  %v7533_v49 = vadd.f32 %v1660_v30, %v7364_v43  ;;  %v7536_v14 = vadd.f32 %v1661_v58, %v7366_v53  ;;  %vm9302_vm1 = vcmp.eq.s32.totalorder %v9232_v39, %v9269_v33 }
 0x1e2   :  { %v1250_v46 = vsel %vm9302_vm1, %v9268_v12, 0.0  ;;  %vm9303_vm2 = vcmp.eq.s32.totalorder %v9232_v39, %v9272_v13  ;;  %v1486_v55 = vadd.f32 %v1454_v50, %v1278_v37  ;;  %v1487_v2 = vadd.f32 %v1455_v1, %v1279_v9  ;;  %v9314_v1 = vld [vmem:[#allocation99_spill] sm:$0xff] }
 0x1e3   :  { %9300 = vst [vmem:[#allocation14_spill] sm:$0xff] %v7533_v49  ;;  %9301 = vst [vmem:[#allocation25_spill] sm:$0xff] %v7536_v14  ;;  %v1251_v11 = vsel %vm9303_vm2, %v9271_v44, 0.0  ;;  %v1076_v41 = vadd.f32 %v1044_v10, %v868_v7  ;;  %v1077_v17 = vadd.f32 %v1045_v3, %v869_v18  ;;  %v1488_v54 = vadd.f32 %v1456_v56, %v1280_v57  ;;  %v9316_v3 = vld [vmem:[#allocation15_spill] sm:$0xff] }
 0x1e4   :  { %v1489_v30 = vadd.f32 %v1457_v48, %v1281_v6  ;;  %vm9304_vm3 = vcmp.eq.s32.totalorder %v9232_v39, %v9275_v19  ;;  %vm9305_vm4 = vcmp.eq.s32.totalorder %v9232_v39, %v9278_v26  ;;  %vm9306_vm5 = vcmp.eq.s32.totalorder %v9185_v51, %v9169_v38  ;;  %v9318_v48 = vld [vmem:[#allocation65_spill] sm:$0xff]  ;;  %v9333_v26 = vld [vmem:[#allocation60_spill] sm:$0xff]  ;;  %v9343_v13 = vld [vmem:[#allocation91_spill] sm:$0xff] }
 0x1e5   :  { %v1252_v58 = vsel %vm9304_vm3, %v9274_v60, 0.0  ;;  %v1253_v43 = vsel %vm9305_vm4, %v9277_v5, 0.0  ;;  %v1662_v37 = vsel %vm9306_vm5, %v9168_v34, 0.0  ;;  %vm9307_vm7 = vcmp.eq.s32.totalorder %v9185_v51, %v9172_v16  ;;  %v9340_v5 = vld [vmem:[#allocation90_spill] sm:$0xff]  ;;  %v9341_v19 = vld [vmem:[#allocation44_spill] sm:$0xff] }
 0x1e6   :  { %v1663_v9 = vsel %vm9307_vm7, %v9171_v8, 0.0  ;;  %v1282_v53 = vadd.f32 %v1250_v46, %v1074_v31  ;;  %v1283_v6 = vadd.f32 %v1251_v11, %v1075_v28  ;;  %vm9308_vm9 = vcmp.eq.s32.totalorder %v9185_v51, %v9259_v36  ;;  %v9319_v31 = vld [vmem:[#allocation41_spill] sm:$0xff] }
 0x1e7   :  { %v1664_v57 = vsel %vm9308_vm9, %v9258_v0, 0.0  ;;  %vm9309_vm12 = vcmp.eq.s32.totalorder %v9185_v51, %v9262_v47  ;;  %vm9310_vm14 = vcmp.eq.s32.totalorder %v9232_v39, %v9287_v45  ;;  %vm9311_vm15 = vcmp.eq.s32.totalorder %v9232_v39, %v9290_v63  ;;  %v9329_v63 = vld [vmem:[#allocation81_spill] sm:$0xff] }
 0x1e8   :  { %v1665_v23 = vsel %vm9309_vm12, %v9261_v20, 0.0  ;;  %v1458_v7 = vsel %vm9310_vm14, %v9286_v52, 0.0  ;;  %v1459_v11 = vsel %vm9311_vm15, %v9289_v59, 0.0  ;;  %v1284_v46 = vadd.f32 %v1252_v58, %v1076_v41  ;;  %v9321_v41 = vld [vmem:[#allocation66_spill] sm:$0xff]  ;;  %v9332_v52 = vld [vmem:[#allocation84_spill] sm:$0xff] }
 0x1e9   :  { %v1285_v18 = vadd.f32 %v1253_v43, %v1077_v17  ;;  %vm9312_vm0 = vcmp.eq.s32.totalorder %v9232_v39, %v9295_v25  ;;  %vm9313_vm1 = vcmp.eq.s32.totalorder %v9232_v39, %v9298_v22  ;;  %vm9315_vm2 = vcmp.eq.s32.totalorder %v9314_v1, %v9186_v4  ;;  %v9322_v17 = vld [vmem:[#allocation17_spill] sm:$0xff]  ;;  %v9327_v25 = vld [vmem:[#allocation58_spill] sm:$0xff] }
 0x1ea   :  { %v1460_v50 = vsel %vm9312_vm0, %v9294_v15, 0.0  ;;  %v1461_v51 = vsel %vm9313_vm1, %v9297_v21, 0.0  ;;  %v214_v10 = vsel %vm9315_vm2, %v9184_v27, 0.0  ;;  %vm9317_vm3 = vcmp.eq.s32.totalorder %v9314_v1, %v9316_v3  ;;  %v9326_v21 = vld [vmem:[#allocation80_spill] sm:$0xff]  ;;  %v9330_v59 = vld [vmem:[#allocation26_spill] sm:$0xff] }
 0x1eb   :  { %v215_v56 = vsel %vm9317_vm3, %v9188_v61, 0.0  ;;  %vm9320_vm4 = vcmp.eq.s32.totalorder %v9314_v1, %v9319_v31  ;;  %vm9323_vm5 = vcmp.eq.s32.totalorder %v9314_v1, %v9322_v17  ;;  %v7602_v43 = vadd.f32 %v1662_v37, %v1486_v55  ;;  %v9335_v37 = vld [vmem:[#allocation86_spill] sm:$0xff] }
 0x1ec   :  { %v422_v28 = vsel %vm9320_vm4, %v9318_v48, 0.0  ;;  %v423_v58 = vsel %vm9323_vm5, %v9321_v41, 0.0  ;;  %v7604_v14 = vadd.f32 %v1663_v9, %v1487_v2  ;;  %v1490_v49 = vadd.f32 %v1458_v7, %v1282_v53  ;;  %v9336_v2 = vld [vmem:[#allocation27_spill] sm:$0xff] }
 0x1ed   :  { %9324 = vst [vmem:[#allocation7_spill] sm:$0xff] %v7602_v43  ;;  %v1491_v22 = vadd.f32 %v1459_v11, %v1283_v6  ;;  %vm9328_vm7 = vcmp.eq.s32.totalorder %v9314_v1, %v9327_v25  ;;  %vm9331_vm9 = vcmp.eq.s32.totalorder %v9314_v1, %v9330_v59  ;;  %vm9334_vm12 = vcmp.eq.s32.totalorder %v9314_v1, %v9333_v26 }
 0x1ee   :  { %9325 = vst [vmem:[#allocation76_spill] sm:$0xff] %v7604_v14  ;;  %v216_v15 = vsel %vm9328_vm7, %v9326_v21, 0.0  ;;  %v217_v45 = vsel %vm9331_vm9, %v9329_v63, 0.0  ;;  %v424_v55 = vsel %vm9334_vm12, %v9332_v52, 0.0  ;;  %vm9337_vm14 = vcmp.eq.s32.totalorder %v9314_v1, %v9336_v2 }
 0x1ef   :  { %v425_v9 = vsel %vm9337_vm14, %v9335_v37, 0.0  ;;  %v1492_v53 = vadd.f32 %v1460_v50, %v1284_v46  ;;  %v1493_v6 = vadd.f32 %v1461_v51, %v1285_v18  ;;  %v454_v7 = vadd.f32 %v422_v28, %v214_v10  ;;  %v9344_v46 = vld [vmem:[#allocation19_spill] sm:$0xff] }
 0x1f0   :  { %v455_v11 = vadd.f32 %v423_v58, %v215_v56  ;;  %vm9338_vm15 = vcmp.eq.s32.totalorder %v9232_v39, %v9169_v38  ;;  %vm9339_vm0 = vcmp.eq.s32.totalorder %v9232_v39, %v9172_v16  ;;  %vm9342_vm1 = vcmp.eq.s32.totalorder %v9314_v1, %v9341_v19  ;;  %v9350_v16 = vld [vmem:[#allocation94_spill] sm:$0xff] }
 0x1f1   :  { %v1666_v14 = vsel %vm9338_vm15, %v9168_v34, 0.0  ;;  %v1667_v43 = vsel %vm9339_vm0, %v9171_v8, 0.0  ;;  %v630_v60 = vsel %vm9342_vm1, %v9340_v5, 0.0  ;;  %vm9345_vm2 = vcmp.eq.s32.totalorder %v9314_v1, %v9344_v46  ;;  %v9351_v8 = vld [vmem:[#allocation63_spill] sm:$0xff]  ;;  %v9353_v34 = vld [vmem:[#allocation96_spill] sm:$0xff] }
 0x1f2   :  { %v631_v18 = vsel %vm9345_vm2, %v9343_v13, 0.0  ;;  %vm9346_vm3 = vcmp.eq.s32.totalorder %v9232_v39, %v9259_v36  ;;  %vm9347_vm4 = vcmp.eq.s32.totalorder %v9232_v39, %v9262_v47  ;;  %v456_v10 = vadd.f32 %v424_v55, %v216_v15  ;;  %v9354_v36 = vld [vmem:[#allocation29_spill] sm:$0xff] }
 0x1f3   :  { %v1668_v50 = vsel %vm9346_vm3, %v9258_v0, 0.0  ;;  %v1669_v51 = vsel %vm9347_vm4, %v9261_v20, 0.0  ;;  %v457_v56 = vadd.f32 %v425_v9, %v217_v45  ;;  %v7646_v28 = vadd.f32 %v1664_v57, %v1488_v54  ;;  %v9356_v57 = vld [vmem:[#allocation104_spill] sm:$0xff]  ;;  %v9359_v9 = vld [vmem:[#allocation105_spill] sm:$0xff] }
 0x1f4   :  { %v7648_v58 = vadd.f32 %v1665_v23, %v1489_v30  ;;  %vm9352_vm5 = vcmp.eq.s32.totalorder %v9314_v1, %v9351_v8  ;;  %vm9355_vm7 = vcmp.eq.s32.totalorder %v9314_v1, %v9354_v36  ;;  %v7658_v44 = vadd.f32 %v1666_v14, %v1490_v49  ;;  %v9357_v23 = vld [vmem:[#allocation45_spill] sm:$0xff] }
 0x1f5   :  { %9348 = vst [vmem:[#allocation48_spill] sm:$0xff] %v7646_v28  ;;  %v632_v38 = vsel %vm9352_vm5, %v9350_v16, 0.0  ;;  %v633_v0 = vsel %vm9355_vm7, %v9353_v34, 0.0  ;;  %v7660_v39 = vadd.f32 %v1667_v43, %v1491_v22  ;;  %v662_v15 = vadd.f32 %v630_v60, %v454_v7  ;;  %v9362_v60 = vld [vmem:[#allocation68_spill] sm:$0xff] }
 0x1f6   :  { %9349 = vst [vmem:[#allocation97_spill] sm:$0xff] %v7648_v58  ;;  %v663_v45 = vadd.f32 %v631_v18, %v455_v11  ;;  %v7662_v54 = vadd.f32 %v1668_v50, %v1492_v53  ;;  %v7664_v30 = vadd.f32 %v1669_v51, %v1493_v6  ;;  %vm9358_vm9 = vcmp.eq.s32.totalorder %v9314_v1, %v9357_v23  ;;  %v9360_v58 = vld [vmem:[#allocation21_spill] sm:$0xff]  ;;  %v9364_v43 = vld [vmem:[#allocation108_spill] sm:$0xff] }
 0x1f7   :  { %v838_v55 = vsel %vm9358_vm9, %v9356_v57, 0.0  ;;  %vm9361_vm12 = vcmp.eq.s32.totalorder %v9314_v1, %v9360_v58  ;;  %v664_v49 = vadd.f32 %v632_v38, %v456_v10  ;;  %v665_v14 = vadd.f32 %v633_v0, %v457_v56  ;;  %v9365_v53 = vld [vmem:[#allocation32_spill] sm:$0xff]  ;;  %v7740_v56 = vpop.permute.xlu1 %3387 }
 0x1f8   :  { %v839_v28 = vsel %vm9361_vm12, %v9359_v9, 0.0  ;;  %vm9363_vm14 = vcmp.eq.s32.totalorder %v9314_v1, %v9362_v60  ;;  %vm9366_vm15 = vcmp.eq.s32.totalorder %v9314_v1, %v9365_v53  ;;  %v9367_v7 = vld [vmem:[#allocation100_spill] sm:$0xff]  ;;  %v870_v50 = vadd.f32 %v838_v55, %v662_v15 }
 0x1f9   :  { %v840_v22 = vsel %vm9363_vm14, %v6774_v42, 0.0  ;;  %v841_v6 = vsel %vm9366_vm15, %v9364_v43, 0.0  ;;  %vm9368_vm0 = vcmp.eq.s32.totalorder %v9367_v7, %v9186_v4  ;;  %vm9369_vm1 = vcmp.eq.s32.totalorder %v9367_v7, %v9316_v3 }
 0x1fa   :  { %v218_v11 = vsel %vm9368_vm0, %v9184_v27, 0.0  ;;  %v219_v38 = vsel %vm9369_vm1, %v9188_v61, 0.0  ;;  %vm9370_vm2 = vcmp.eq.s32.totalorder %v9367_v7, %v9319_v31  ;;  %vm9371_vm3 = vcmp.eq.s32.totalorder %v9367_v7, %v9322_v17 }
 0x1fb   :  { %v426_v0 = vsel %vm9370_vm2, %v9318_v48, 0.0  ;;  %v427_v18 = vsel %vm9371_vm3, %v9321_v41, 0.0  ;;  %v871_v51 = vadd.f32 %v839_v28, %v663_v45  ;;  %vm9372_vm4 = vcmp.eq.s32.totalorder %v9314_v1, %v9244_v62  ;;  %v7722_v41 = vpop.permute.xlu0 %3377 }
 0x1fc   :  { %v1046_v4 = vsel %vm9372_vm4, %v9243_v29, 0.0  ;;  %vm9373_vm5 = vcmp.eq.s32.totalorder %v9314_v1, %v9247_v32  ;;  %vm9374_vm7 = vcmp.eq.s32.totalorder %v9367_v7, %v9327_v25  ;;  %vm9375_vm9 = vcmp.eq.s32.totalorder %v9367_v7, %v9330_v59 }
 0x1fd   :  { %v1047_v27 = vsel %vm9373_vm5, %v9246_v40, 0.0  ;;  %v220_v61 = vsel %vm9374_vm7, %v9326_v21, 0.0  ;;  %v221_v3 = vsel %vm9375_vm9, %v9329_v63, 0.0  ;;  %vm9376_vm12 = vcmp.eq.s32.totalorder %v9367_v7, %v9333_v26  ;;  %v9379_v63 = vld [vmem:[#allocation117_spill] sm:$0xff]  ;;  %v9380_v26 = vld [vmem:[#allocation36_spill] sm:$0xff] }
 0x1fe   :  { %v428_v48 = vsel %vm9376_vm12, %v9332_v52, 0.0  ;;  %vm9377_vm14 = vcmp.eq.s32.totalorder %v9367_v7, %v9336_v2  ;;  %v872_v17 = vadd.f32 %v840_v22, %v664_v49  ;;  %v873_v25 = vadd.f32 %v841_v6, %v665_v14  ;;  %v9385_v14 = vld [vmem:[#allocation33_spill] sm:$0xff] }
 0x1ff   :  { %v429_v31 = vsel %vm9377_vm14, %v9335_v37, 0.0  ;;  %v458_v21 = vadd.f32 %v426_v0, %v218_v11  ;;  %v459_v10 = vadd.f32 %v427_v18, %v219_v38  ;;  %vm9378_vm15 = vcmp.eq.s32.totalorder %v9314_v1, %v9253_v24  ;;  %v9390_v0 = vld [vmem:[#allocation47_spill] sm:$0xff]  ;;  %v9391_v18 = vld [vmem:[#allocation70_spill] sm:$0xff] }
 0x200   :  { %v1048_v59 = vsel %vm9378_vm15, %v9252_v35, 0.0  ;;  %vm9381_vm0 = vcmp.eq.s32.totalorder %v9314_v1, %v9380_v26  ;;  %vm9382_vm1 = vcmp.eq.s32.totalorder %v9367_v7, %v9341_v19  ;;  %vm9383_vm2 = vcmp.eq.s32.totalorder %v9367_v7, %v9344_v46  ;;  %v9386_v19 = vld [vmem:[#allocation23_spill] sm:$0xff] }
 0x201   :  { %v1049_v52 = vsel %vm9381_vm0, %v9379_v63, 0.0  ;;  %v634_v37 = vsel %vm9382_vm1, %v9340_v5, 0.0  ;;  %v635_v2 = vsel %vm9383_vm2, %v9343_v13, 0.0  ;;  %v1078_v28 = vadd.f32 %v1046_v4, %v870_v50  ;;  %v9393_v4 = vld [vmem:[#allocation37_spill] sm:$0xff] }
 0x202   :  { %v1079_v15 = vadd.f32 %v1047_v27, %v871_v51  ;;  %v460_v45 = vadd.f32 %v428_v48, %v220_v61  ;;  %v461_v55 = vadd.f32 %v429_v31, %v221_v3  ;;  %vm9384_vm3 = vcmp.eq.s32.totalorder %v9314_v1, %v9269_v33  ;;  %v9392_v51 = vld [vmem:[#allocation64_spill] sm:$0xff]  ;;  %v9397_v31 = vld [vmem:[#allocation85_spill] sm:$0xff] }
 0x203   :  { %v1254_v49 = vsel %vm9384_vm3, %v9268_v12, 0.0  ;;  %vm9387_vm4 = vcmp.eq.s32.totalorder %v9314_v1, %v9386_v19  ;;  %vm9388_vm5 = vcmp.eq.s32.totalorder %v9367_v7, %v9351_v8  ;;  %vm9389_vm7 = vcmp.eq.s32.totalorder %v9367_v7, %v9354_v36 }
 0x204   :  { %v1255_v5 = vsel %vm9387_vm4, %v9385_v14, 0.0  ;;  %v636_v13 = vsel %vm9388_vm5, %v9350_v16, 0.0  ;;  %v637_v46 = vsel %vm9389_vm7, %v9353_v34, 0.0  ;;  %v1080_v22 = vadd.f32 %v1048_v59, %v872_v17  ;;  %v3383_v16 = vpop.permute.xlu0 %3382  ;;  %v9398_v17 = vld [vmem:[#allocation54_spill] sm:$0xff] }
 0x205   :  { %v1081_v6 = vadd.f32 %v1049_v52, %v873_v25  ;;  %v666_v11 = vadd.f32 %v634_v37, %v458_v21  ;;  %v667_v38 = vadd.f32 %v635_v2, %v459_v10  ;;  %v1256_v50 = vsel %vm1128_vm13, %v9390_v0, 0.0  ;;  %v9400_v21 = vld [vmem:[#allocation79_spill] sm:$0xff]  ;;  %v9401_v10 = vld [vmem:[#allocation24_spill] sm:$0xff] }
 0x206   :  { %vm9394_vm9 = vcmp.eq.s32.totalorder %v9314_v1, %v9393_v4  ;;  %vm9395_vm12 = vcmp.eq.s32.totalorder %v9367_v7, %v9357_v23  ;;  %vm9396_vm14 = vcmp.eq.s32.totalorder %v9367_v7, %v9360_v58  ;;  %v1286_v27 = vadd.f32 %v1254_v49, %v1078_v28  ;;  %v9405_v28 = vld [vmem:[#allocation89_spill] sm:$0xff] }
 0x207   :  { %v1257_v8 = vsel %vm9394_vm9, %v9392_v51, 0.0  ;;  %v842_v36 = vsel %vm9395_vm12, %v9356_v57, 0.0  ;;  %v843_v34 = vsel %vm9396_vm14, %v9359_v9, 0.0  ;;  %v1287_v61 = vadd.f32 %v1255_v5, %v1079_v15  ;;  %v7790_v9 = vpop.permute.xlu1 %3392 }
 0x208   :  { %v668_v3 = vadd.f32 %v636_v13, %v460_v45  ;;  %v669_v48 = vadd.f32 %v637_v46, %v461_v55  ;;  %vm9399_vm13 = vcmp.eq.s32.totalorder %v9314_v1, %v9398_v17  ;;  %vm9402_vm15 = vcmp.eq.s32.totalorder %v9314_v1, %v9401_v10  ;;  %v9407_v55 = vld [vmem:[#allocation95_spill] sm:$0xff] }
 0x209   :  { %v1462_v25 = vsel %vm9399_vm13, %v9397_v31, 0.0  ;;  %v1463_v57 = vsel %vm9402_vm15, %v9400_v21, 0.0  ;;  %vm9403_vm0 = vcmp.eq.s32.totalorder %v9367_v7, %v9362_v60  ;;  %vm9404_vm1 = vcmp.eq.s32.totalorder %v9367_v7, %v9365_v53  ;;  %v9408_v60 = vld [vmem:[#allocation38_spill] sm:$0xff] }
 0x20a   :  { %v844_v58 = vsel %vm9403_vm0, %v6774_v42, 0.0  ;;  %v845_v23 = vsel %vm9404_vm1, %v9364_v43, 0.0  ;;  %v1288_v59 = vadd.f32 %v1256_v50, %v1080_v22  ;;  %v1289_v52 = vadd.f32 %v1257_v8, %v1081_v6  ;;  %v9412_v22 = vld [vmem:[#allocation109_spill] sm:$0xff]  ;;  %v9413_v6 = vld [vmem:[#allocation56_spill] sm:$0xff] }
 0x20b   :  { %v874_v37 = vadd.f32 %v842_v36, %v666_v11  ;;  %v875_v2 = vadd.f32 %v843_v34, %v667_v38  ;;  %v1464_v45 = vsel %vm1336_vm11, %v9405_v28, 0.0  ;;  %vm9409_vm2 = vcmp.eq.s32.totalorder %v9314_v1, %v9408_v60  ;;  %v9415_v38 = vld [vmem:[#allocation103_spill] sm:$0xff]  ;;  %v9416_v50 = vld [vmem:[#allocation28_spill] sm:$0xff] }
 0x20c   :  { %v1465_v42 = vsel %vm9409_vm2, %v9407_v55, 0.0  ;;  %vm9410_vm3 = vcmp.eq.s32.totalorder %v9367_v7, %v9244_v62  ;;  %vm9411_vm4 = vcmp.eq.s32.totalorder %v9367_v7, %v9247_v32  ;;  %v1494_v49 = vadd.f32 %v1462_v25, %v1286_v27 }
 0x20d   :  { %v1050_v43 = vsel %vm9410_vm3, %v9243_v29, 0.0  ;;  %v1051_v53 = vsel %vm9411_vm4, %v9246_v40, 0.0  ;;  %v1495_v5 = vadd.f32 %v1463_v57, %v1287_v61  ;;  %v876_v13 = vadd.f32 %v844_v58, %v668_v3  ;;  %v7824_v29 = vpop.permute.xlu0 %3509  ;;  %v9420_v61 = vld [vmem:[#allocation113_spill] sm:$0xff] }
 0x20e   :  { %v877_v46 = vadd.f32 %v845_v23, %v669_v48  ;;  %vm9414_vm11 = vcmp.eq.s32.totalorder %v9314_v1, %v9413_v6  ;;  %vm9417_vm5 = vcmp.eq.s32.totalorder %v9314_v1, %v9416_v50  ;;  %vm9418_vm7 = vcmp.eq.s32.totalorder %v9367_v7, %v9253_v24 }
 0x20f   :  { %v1670_v11 = vsel %vm9414_vm11, %v9412_v22, 0.0  ;;  %v1671_v62 = vsel %vm9417_vm5, %v9415_v38, 0.0  ;;  %v1052_v32 = vsel %vm9418_vm7, %v9252_v35, 0.0  ;;  %vm9419_vm9 = vcmp.eq.s32.totalorder %v9367_v7, %v9380_v26  ;;  %v3515_v26 = vpop.permute.xlu1 %3514 }
 0x210   :  { %v1053_v40 = vsel %vm9419_vm9, %v9379_v63, 0.0  ;;  %v1496_v8 = vadd.f32 %v1464_v45, %v1288_v59  ;;  %v1497_v36 = vadd.f32 %v1465_v42, %v1289_v52  ;;  %v1082_v34 = vadd.f32 %v1050_v43, %v874_v37  ;;  %v9425_v59 = vld [vmem:[#allocation123_spill] sm:$0xff]  ;;  %v9426_v52 = vld [vmem:[#allocation9_spill] sm:$0xff] }
 0x211   :  { %v1083_v27 = vadd.f32 %v1051_v53, %v875_v2  ;;  %v1672_v48 = vsel %vm1544_vm10, %v9420_v61, 0.0  ;;  %vm9422_vm12 = vcmp.eq.s32.totalorder %v9314_v1, %v9262_v47  ;;  %vm9423_vm14 = vcmp.eq.s32.totalorder %v9367_v7, %v9269_v33  ;;  %v9430_v2 = vld [vmem:[#allocation10_spill] sm:$0xff]  ;;  %v9431_v53 = vld [vmem:[#allocation72_spill] sm:$0xff] }
 0x212   :  { %v1673_v35 = vsel %vm9422_vm12, %v9261_v20, 0.0  ;;  %v1258_v24 = vsel %vm9423_vm14, %v9268_v12, 0.0  ;;  %vm9424_vm13 = vcmp.eq.s32.totalorder %v9367_v7, %v9386_v19  ;;  %v7842_v25 = vadd.f32 %v1670_v11, %v1494_v49 }
 0x213   :  { %v1259_v63 = vsel %vm9424_vm13, %v9385_v14, 0.0  ;;  %v7844_v57 = vadd.f32 %v1671_v62, %v1495_v5  ;;  %v1084_v58 = vadd.f32 %v1052_v32, %v876_v13  ;;  %v1085_v23 = vadd.f32 %v1053_v40, %v877_v46  ;;  %v9429_v14 = vld [vmem:[#allocation55_spill] sm:$0xff]  ;;  %v9434_v46 = vld [vmem:[#allocation12_spill] sm:$0xff]  ;;  %v3398_v62 = vpop.permute.xlu0 %3397 }
 0x214   :  { %v3415_v1 = vmul.f32 %v7722_v41, %v9425_v59  ;;  %v3419_v37 = vmul.f32 %v3383_v16, %v9426_v52  ;;  %vm9427_vm10 = vcmp.eq.s32.totalorder %v9367_v7, %v9391_v18  ;;  %vm9428_vm15 = vcmp.eq.s32.totalorder %v9367_v7, %v9393_v4  ;;  %v9432_v5 = vld [vmem:[#allocation67_spill] sm:$0xff] }
 0x215   :  { %v1260_v12 = vsel %vm9427_vm10, %v9390_v0, 0.0  ;;  %v1261_v33 = vsel %vm9428_vm15, %v9392_v51, 0.0  ;;  %v3416_v19 = vmul.f32 %v7722_v41, %v9429_v14  ;;  %v3420_v45 = vmul.f32 %v3383_v16, %v9430_v2  ;;  %v9433_v18 = vld [vmem:[#allocation11_spill] sm:$0xff] }
 0x216   :  { %v1290_v42 = vadd.f32 %v1258_v24, %v1082_v34  ;;  %v1291_v43 = vadd.f32 %v1259_v63, %v1083_v27  ;;  %v3417_v49 = vmul.f32 %v7722_v41, %v9431_v53  ;;  %v3418_v13 = vmul.f32 %v7722_v41, %v9432_v5  ;;  %v9437_v34 = vld [vmem:[#allocation74_spill] sm:$0xff] }
 0x217   :  { %v3421_v0 = vmul.f32 %v3383_v16, %v9433_v18  ;;  %v3422_v11 = vmul.f32 %v3383_v16, %v9434_v46  ;;  %v1292_v4 = vadd.f32 %v1260_v12, %v1084_v58  ;;  %v1293_v51 = vadd.f32 %v1261_v33, %v1085_v23  ;;  %v9440_v23 = vld [vmem:[#allocation35_spill] sm:$0xff]  ;;  %v9442_v33 = vld [vmem:[#allocation13_spill] sm:$0xff]  ;;  %v3403_v53 = vpop.permute.xlu0 %3402 }
 0x218   :  { %vm9435_vm0 = vcmp.eq.s32.totalorder %v9367_v7, %v9398_v17  ;;  %vm9436_vm1 = vcmp.eq.s32.totalorder %v9367_v7, %v9401_v10  ;;  %v3423_v41 = vmul.f32 %v7740_v56, %v9437_v34  ;;  %v3447_v27 = vadd.f32 %v3419_v37, %v3415_v1  ;;  %v3520_v10 = vpop.permute.xlu1 %3519  ;;  %v9441_v1 = vld [vmem:[#allocation8_spill] sm:$0xff]  ;;  %v9454_v34 = vld [vmem:[#allocation78_spill] sm:$0xff] }
 0x219   :  { %v1466_v32 = vsel %vm9435_vm0, %v9397_v31, 0.0  ;;  %v1467_v40 = vsel %vm9436_vm1, %v9400_v21, 0.0  ;;  %v1468_v16 = vsel %vm1340_vm8, %v9405_v28, 0.0  ;;  %vm9438_vm2 = vcmp.eq.s32.totalorder %v9367_v7, %v9408_v60  ;;  %v9439_v31 = vld [vmem:[#allocation34_spill] sm:$0xff] }
 0x21a   :  { %v1469_v17 = vsel %vm9438_vm2, %v9407_v55, 0.0  ;;  %v3424_v24 = vmul.f32 %v7740_v56, %v9439_v31  ;;  %v3460_v63 = vadd.f32 %v3420_v45, %v3416_v19  ;;  %v7886_v21 = vadd.f32 %v1672_v48, %v1496_v8  ;;  %v9446_v19 = vld [vmem:[#allocation14_spill] sm:$0xff]  ;;  %v9447_v45 = vld [vmem:[#allocation25_spill] sm:$0xff] }
 0x21b   :  { %v7888_v58 = vadd.f32 %v1673_v35, %v1497_v36  ;;  %v3425_v59 = vmul.f32 %v7740_v56, %v9440_v23  ;;  %v3426_v28 = vmul.f32 %v7740_v56, %v9441_v1  ;;  %v3473_v15 = vadd.f32 %v3421_v0, %v3417_v49  ;;  %v9445_v35 = vld [vmem:[#allocation75_spill] sm:$0xff]  ;;  %v9451_v0 = vld [vmem:[#allocation77_spill] sm:$0xff] }
 0x21c   :  { %v3486_v52 = vadd.f32 %v3422_v11, %v3418_v13  ;;  %v1498_v37 = vadd.f32 %v1466_v32, %v1290_v42  ;;  %v1499_v60 = vadd.f32 %v1467_v40, %v1291_v43  ;;  %v7894_v55 = vadd.f32 %v1468_v16, %v1292_v4  ;;  %v9449_v13 = vld [vmem:[#allocation62_spill] sm:$0xff]  ;;  %v3525_v32 = vpop.permute.xlu1 %3524 }
 0x21d   :  { %v7896_v12 = vadd.f32 %v1469_v17, %v1293_v51  ;;  %v3427_v8 = vmul.f32 %v7790_v9, %v9442_v33  ;;  %v3448_v48 = vadd.f32 %v3447_v27, %v3423_v41  ;;  %vm9443_vm8 = vcmp.eq.s32.totalorder %v9367_v7, %v9413_v6  ;;  %v9448_v6 = vld [vmem:[#allocation61_spill] sm:$0xff]  ;;  %v9452_v11 = vld [vmem:[#allocation42_spill] sm:$0xff]  ;;  %v9453_v51 = vld [vmem:[#allocation31_spill] sm:$0xff] }
 0x21e   :  { %v1674_v36 = vsel %vm9443_vm8, %v9412_v22, 0.0  ;;  %vm9444_vm3 = vcmp.eq.s32.totalorder %v9367_v7, %v9416_v50  ;;  %v3428_v14 = vmul.f32 %v7790_v9, %v9445_v35  ;;  %v3429_v2 = vmul.f32 %v7790_v9, %v9446_v19  ;;  %v9450_v50 = vld [vmem:[#allocation30_spill] sm:$0xff]  ;;  %v9455_v27 = vld [vmem:[#allocation43_spill] sm:$0xff]  ;;  %v9461_v35 = vld [vmem:[#allocation97_spill] sm:$0xff] }
 0x21f   :  { %v1675_v56 = vsel %vm9444_vm3, %v9415_v38, 0.0  ;;  %v3430_v42 = vmul.f32 %v7790_v9, %v9447_v45  ;;  %v3461_v43 = vadd.f32 %v3460_v63, %v3424_v24  ;;  %v3474_v49 = vadd.f32 %v3473_v15, %v3425_v59  ;;  %v9456_v17 = vld [vmem:[#allocation7_spill] sm:$0xff]  ;;  %v9457_v63 = vld [vmem:[#allocation76_spill] sm:$0xff]  ;;  %v9462_v19 = vld [vmem:[#allocation82_spill] sm:$0xff] }
 0x220   :  { %v3487_v5 = vadd.f32 %v3486_v52, %v3426_v28  ;;  %v3547_v22 = vmul.f32 %v7824_v29, %v9448_v6  ;;  %v3551_v18 = vmul.f32 %v3515_v26, %v9449_v13  ;;  %v3548_v38 = vmul.f32 %v7824_v29, %v9450_v50  ;;  %v9459_v52 = vld [vmem:[#allocation92_spill] sm:$0xff]  ;;  %v9463_v13 = vld [vmem:[#allocation101_spill] sm:$0xff] }
 0x221   :  { %v3549_v46 = vmul.f32 %v7824_v29, %v9451_v0  ;;  %v3550_v4 = vmul.f32 %v7824_v29, %v9452_v11  ;;  %v3552_v9 = vmul.f32 %v3515_v26, %v9453_v51  ;;  %v3449_v40 = vadd.f32 %v3448_v48, %v3427_v8  ;;  %v9460_v8 = vld [vmem:[#allocation48_spill] sm:$0xff] }
 0x222   :  { %v3553_v41 = vmul.f32 %v3515_v26, %v9454_v34  ;;  %v3554_v16 = vmul.f32 %v3515_v26, %v9455_v27  ;;  %v3431_v31 = vmul.f32 %v3398_v62, %v9456_v17  ;;  %v3462_v24 = vadd.f32 %v3461_v43, %v3428_v14  ;;  %v3408_v43 = vpop.permute.xlu0 %3407  ;;  %v9467_v34 = vld [vmem:[#allocation102_spill] sm:$0xff] }
 0x223   :  { %v3432_v23 = vmul.f32 %v3398_v62, %v9457_v63  ;;  %v1676_v59 = vsel %vm1548_vm6, %v9420_v61, 0.0  ;;  %vm9458_vm4 = vcmp.eq.s32.totalorder %v9367_v7, %v9262_v47  ;;  %v3475_v1 = vadd.f32 %v3474_v49, %v3429_v2  ;;  %v3530_v49 = vpop.permute.xlu1 %3529 }
 0x224   :  { %v1677_v29 = vsel %vm9458_vm4, %v9261_v20, 0.0  ;;  %v3488_v28 = vadd.f32 %v3487_v5, %v3430_v42  ;;  %v3579_v15 = vadd.f32 %v3551_v18, %v3547_v22  ;;  %v3555_v26 = vmul.f32 %v3520_v10, %v9459_v52  ;;  %v9464_v20 = vld [vmem:[#allocation87_spill] sm:$0xff]  ;;  %v9465_v22 = vld [vmem:[#allocation93_spill] sm:$0xff] }
 0x225   :  { %v3592_v33 = vadd.f32 %v3552_v9, %v3548_v38  ;;  %v3433_v48 = vmul.f32 %v3398_v62, %v9460_v8  ;;  %v3434_v14 = vmul.f32 %v3398_v62, %v9461_v35  ;;  %v3556_v45 = vmul.f32 %v3520_v10, %v9462_v19  ;;  %v9472_v8 = vld [vmem:[#allocation111_spill] sm:$0xff] }
 0x226   :  { %v3605_v3 = vadd.f32 %v3553_v41, %v3549_v46  ;;  %v3618_v61 = vadd.f32 %v3554_v16, %v3550_v4  ;;  %v3450_v6 = vadd.f32 %v3449_v40, %v3431_v31  ;;  %v3557_v50 = vmul.f32 %v3520_v10, %v9463_v13  ;;  %v9466_v4 = vld [vmem:[#allocation83_spill] sm:$0xff]  ;;  %v9468_v16 = vld [vmem:[#allocation88_spill] sm:$0xff]  ;;  %v3413_v31 = vpop.permute.xlu0 %3412 }
 0x227   :  { %v3463_v47 = vadd.f32 %v3462_v24, %v3432_v23  ;;  %v3558_v7 = vmul.f32 %v3520_v10, %v9464_v20  ;;  %v3435_v2 = vmul.f32 %v3403_v53, %v7658_v44  ;;  %v3436_v42 = vmul.f32 %v3403_v53, %v7660_v39  ;;  %v9470_v23 = vld [vmem:[#allocation106_spill] sm:$0xff] }
 0x228   :  { %v3580_v5 = vadd.f32 %v3579_v15, %v3555_v26  ;;  %v3559_v18 = vmul.f32 %v3525_v32, %v9465_v22  ;;  %v1706_v62 = vadd.f32 %v1674_v36, %v1498_v37  ;;  %v1707_v38 = vadd.f32 %v1675_v56, %v1499_v60  ;;  %v9469_v56 = vld [vmem:[#allocation46_spill] sm:$0xff] }
 0x229   :  { %v3476_v0 = vadd.f32 %v3475_v1, %v3433_v48  ;;  %v3489_v11 = vadd.f32 %v3488_v28, %v3434_v14  ;;  %v3593_v46 = vadd.f32 %v3592_v33, %v3556_v45  ;;  %v3560_v51 = vmul.f32 %v3525_v32, %v9466_v4  ;;  %v3535_v1 = vpop.permute.xlu1 %3534  ;;  %v9473_v45 = vld [vmem:[#allocation116_spill] sm:$0xff]  ;;  %v2495_v4 = vpop.f32.mrb[0].mxu0 }
 0x22a   :  { %v3606_v9 = vadd.f32 %v3605_v3, %v3557_v50  ;;  %v3437_v40 = vmul.f32 %v3403_v53, %v7662_v54  ;;  %v3438_v10 = vmul.f32 %v3403_v53, %v7664_v30  ;;  %v3561_v44 = vmul.f32 %v3525_v32, %v9467_v34  ;;  %v9474_v3 = vld [vmem:[#allocation107_spill] sm:$0xff]  ;;  %v9475_v50 = vld [vmem:[#allocation120_spill] sm:$0xff]  ;;  %v9480_v34 = vld [vmem:[#allocation121_spill] sm:$0xff] }
 0x22b   :  { %v3619_v41 = vadd.f32 %v3618_v61, %v3558_v7  ;;  %v3451_v39 = vadd.f32 %v3450_v6, %v3435_v2  ;;  %v3464_v27 = vadd.f32 %v3463_v47, %v3436_v42  ;;  %v3562_v17 = vmul.f32 %v3525_v32, %v9468_v16  ;;  %v9471_v32 = vld [vmem:[#allocation16_spill] sm:$0xff]  ;;  %v3540_v6 = vpop.permute.xlu0 %3539 }
 0x22c   :  { %v3581_v37 = vadd.f32 %v3580_v5, %v3559_v18  ;;  %v3439_v60 = vmul.f32 %v3408_v43, %v7842_v25  ;;  %v3440_v36 = vmul.f32 %v3408_v43, %v7844_v57  ;;  %v3563_v24 = vmul.f32 %v3530_v49, %v9469_v56 }
 0x22d   :  { %v3594_v63 = vadd.f32 %v3593_v46, %v3560_v51  ;;  %v3564_v54 = vmul.f32 %v3530_v49, %v9470_v23  ;;  %v1708_v30 = vadd.f32 %v1676_v59, %v7894_v55  ;;  %v1709_v53 = vadd.f32 %v1677_v29, %v7896_v12  ;;  %v3545_v46 = vpop.permute.xlu1 %3544  ;;  %v9479_v51 = vld [vmem:[#allocation57_spill] sm:$0xff] }
 0x22e   :  { %v3477_v28 = vadd.f32 %v3476_v0, %v3437_v40  ;;  %v3490_v15 = vadd.f32 %v3489_v11, %v3438_v10  ;;  %v3607_v52 = vadd.f32 %v3606_v9, %v3561_v44  ;;  %v3565_v26 = vmul.f32 %v3530_v49, %v9471_v32  ;;  %v2497_v10 = vpop.f32.mrb[1].mxu0 }
 0x22f   :  { %v3620_v33 = vadd.f32 %v3619_v41, %v3562_v17  ;;  %v3441_v25 = vmul.f32 %v3408_v43, %v7886_v21  ;;  %v3442_v57 = vmul.f32 %v3408_v43, %v7888_v58  ;;  %v3566_v48 = vmul.f32 %v3530_v49, %v9472_v8  ;;  %v9476_v58 = vld [vmem:[#allocation112_spill] sm:$0xff]  ;;  %v9477_v49 = vld [vmem:[#allocation51_spill] sm:$0xff] }
 0x230   :  { %v3452_v35 = vadd.f32 %v3451_v39, %v3439_v60  ;;  %v3465_v14 = vadd.f32 %v3464_v27, %v3440_v36  ;;  %v3582_v19 = vadd.f32 %v3581_v37, %v3563_v24  ;;  %v3567_v55 = vmul.f32 %v3535_v1, %v9473_v45  ;;  %v3289_v39 = vpop.f32.mrb[0].mxu1  ;;  %v9481_v60 = vld [vmem:[#allocation53_spill] sm:$0xff] }
 0x231   :  { %v3595_v59 = vadd.f32 %v3594_v63, %v3564_v54  ;;  %v3443_v12 = vmul.f32 %v3413_v31, %v1706_v62  ;;  %v3444_v29 = vmul.f32 %v3413_v31, %v1707_v38  ;;  %v3568_v61 = vmul.f32 %v3535_v1, %v9474_v3  ;;  %v9478_v62 = vld [vmem:[#allocation18_spill] sm:$0xff]  ;;  %v3291_v56 = vpop.f32.mrb[1].mxu1  ;;  %v9482_v54 = vld [vmem:[#allocation20_spill] sm:$0xff] }
 0x232   :  { %v3608_v13 = vadd.f32 %v3607_v52, %v3565_v26  ;;  %v3569_v47 = vmul.f32 %v3535_v1, %v9475_v50  ;;  %v3478_v20 = vadd.f32 %v3477_v28, %v3441_v25  ;;  %v3491_v21 = vadd.f32 %v3490_v15, %v3442_v57  ;;  %v9483_v28 = vld [vmem:[#allocation59_spill] sm:$0xff]  ;;  %v9484_v25 = vld [vmem:[#allocation122_spill] sm:$0xff] }
 0x233   :  { %v3621_v7 = vadd.f32 %v3620_v33, %v3566_v48  ;;  %v3570_v43 = vmul.f32 %v3535_v1, %v9476_v58  ;;  %v3445_v2 = vmul.f32 %v3413_v31, %v1708_v30  ;;  %v3446_v42 = vmul.f32 %v3413_v31, %v1709_v53  ;;  %v2502_v53 = vpop.f32.mrb[2].mxu0  ;;  %v3296_v48 = vpop.f32.mrb[2].mxu1 }
 0x234   :  { %v3571_v5 = vmul.f32 %v3540_v6, %v9477_v49  ;;  %v3583_v22 = vadd.f32 %v3582_v19, %v3567_v55  ;;  %v3453_v18 = vadd.f32 %v3452_v35, %v3443_v12  ;;  %v3466_v0 = vadd.f32 %v3465_v14, %v3444_v29  ;;  %v2504_v26 = vpop.f32.mrb[3].mxu0 }
 0x235   :  { %v3572_v38 = vmul.f32 %v3540_v6, %v9478_v62  ;;  %v3596_v11 = vadd.f32 %v3595_v59, %v3568_v61  ;;  %v3573_v9 = vmul.f32 %v3540_v6, %v9479_v51  ;;  %v3609_v40 = vadd.f32 %v3608_v13, %v3569_v47  ;;  %v3298_v59 = vpop.f32.mrb[3].mxu1 }
 0x236   :  { %v3574_v44 = vmul.f32 %v3540_v6, %v9480_v34  ;;  %v3622_v41 = vadd.f32 %v3621_v7, %v3570_v43  ;;  %v4005_v27 = vmov 1966171168   ;;  %v3479_v17 = vadd.f32 %v3478_v20, %v3445_v2  ;;  %v2509_v6 = vpop.f32.mrb[4].mxu0  ;;  %v3303_v2 = vpop.f32.mrb[4].mxu1 }
 0x237   :  { %v7968_v16 = vunpack.c.l.s4 %v4005_v27  ;;  %v3492_v31 = vadd.f32 %v3491_v21, %v3446_v42  ;;  %v3584_v37 = vadd.f32 %v3583_v22, %v3571_v5  ;;  %v3575_v36 = vmul.f32 %v3545_v46, %v9481_v60  ;;  %v2511_v21 = vpop.f32.mrb[5].mxu0 }
 0x238   :  { %v3454_v24 = vrot.slane %v3453_v18, 4  ;;  %v3467_v63 = vrot.slane %v3466_v0, 4  ;;  %v3597_v23 = vadd.f32 %v3596_v11, %v3572_v38  ;;  %v3576_v30 = vmul.f32 %v3545_v46, %v9482_v54  ;;  %v3305_v38 = vpop.f32.mrb[5].mxu1 }
 0x239   :  { %v3610_v1 = vadd.f32 %v3609_v40, %v3573_v9  ;;  %v3577_v15 = vmul.f32 %v3545_v46, %v9483_v28  ;;  %v3315_v52 = vmul.f32 %v2495_v4, %v2495_v4  ;;  %v3319_v32 = vmul.f32 %v2502_v53, %v2502_v53  ;;  %v2516_v9 = vpop.f32.mrb[6].mxu0  ;;  %v3310_v60 = vpop.f32.mrb[6].mxu1 }
 0x23a   :  { %v3623_v33 = vadd.f32 %v3622_v41, %v3574_v44  ;;  %v3578_v57 = vmul.f32 %v3545_v46, %v9484_v25  ;;  %v3316_v8 = vmul.f32 %v2497_v10, %v2497_v10  ;;  %v3320_v35 = vmul.f32 %v2504_v26, %v2504_v26  ;;  %v2518_v41 = vpop.f32.mrb[7].mxu0  ;;  %v3312_v54 = vpop.f32.mrb[7].mxu1 }
 0x23b   :  { %v3585_v14 = vadd.f32 %v3584_v37, %v3575_v36  ;;  %v3317_v19 = vmul.f32 %v3289_v39, %v3289_v39  ;;  %v3331_v45 = vadd.f32 %v3319_v32, %v3315_v52  ;;  %v3321_v55 = vmul.f32 %v3296_v48, %v3296_v48 }
 0x23c   :  { %v3598_v12 = vadd.f32 %v3597_v23, %v3576_v30  ;;  %v3318_v29 = vmul.f32 %v3291_v56, %v3291_v56  ;;  %v3340_v3 = vadd.f32 %v3320_v35, %v3316_v8  ;;  %v3322_v61 = vmul.f32 %v3298_v59, %v3298_v59 }
 0x23d   :  { %v3480_v13 = vrot.slane %v3479_v17, 4  ;;  %v3611_v50 = vadd.f32 %v3610_v1, %v3577_v15  ;;  %v3349_v47 = vadd.f32 %v3321_v55, %v3317_v19  ;;  %v3323_v20 = vmul.f32 %v2509_v6, %v2509_v6 }
 0x23e   :  { %v3493_v7 = vrot.slane %v3492_v31, 4  ;;  %v3624_v58 = vadd.f32 %v3623_v33, %v3578_v57  ;;  %v3358_v43 = vadd.f32 %v3322_v61, %v3318_v29  ;;  %v3324_v42 = vmul.f32 %v2511_v21, %v2511_v21 }
 0x23f   :  { %v3455_v49 = vadd.f32 %v3454_v24, %v3453_v18  ;;  %v3586_v5 = vrot.slane %v3585_v14, 4  ;;  %v3332_v22 = vadd.f32 %v3331_v45, %v3323_v20  ;;  %v3325_v62 = vmul.f32 %v3303_v2, %v3303_v2 }
 0x240   :  { %v3468_v11 = vadd.f32 %v3467_v63, %v3466_v0  ;;  %v3599_v46 = vrot.slane %v3598_v12, 4  ;;  %v3341_v4 = vadd.f32 %v3340_v3, %v3324_v42  ;;  %v3326_v51 = vmul.f32 %v3305_v38, %v3305_v38 }
 0x241   :  { %v3481_v40 = vadd.f32 %v3480_v13, %v3479_v17  ;;  %v3612_v10 = vrot.slane %v3611_v50, 4  ;;  %v3350_v34 = vadd.f32 %v3349_v47, %v3325_v62  ;;  %v3327_v44 = vmul.f32 %v2516_v9, %v2516_v9 }
 0x242   :  { %v3494_v39 = vadd.f32 %v3493_v7, %v3492_v31  ;;  %v3625_v27 = vrot.slane %v3624_v58, 4  ;;  %v3359_v37 = vadd.f32 %v3358_v43, %v3326_v51  ;;  %v3328_v36 = vmul.f32 %v2518_v41, %v2518_v41 }
 0x243   :  { %v3456_v18 = vrot.slane %v3455_v49, 2  ;;  %v3587_v56 = vadd.f32 %v3586_v5, %v3585_v14  ;;  %v3333_v24 = vadd.f32 %v3332_v22, %v3327_v44  ;;  %v3329_v23 = vmul.f32 %v3310_v60, %v3310_v60 }
 0x244   :  { %v3469_v0 = vrot.slane %v3468_v11, 2  ;;  %v3600_v63 = vadd.f32 %v3599_v46, %v3598_v12  ;;  %v3342_v30 = vadd.f32 %v3341_v4, %v3328_v36  ;;  %v3330_v53 = vmul.f32 %v3312_v54, %v3312_v54 }
 0x245   :  { %v3482_v1 = vrot.slane %v3481_v40, 2  ;;  %v3613_v17 = vadd.f32 %v3612_v10, %v3611_v50  ;;  %v3334_v28 = vrot.slane %v3333_v24, 4  ;;  %v3351_v15 = vadd.f32 %v3350_v34, %v3329_v23 }
 0x246   :  { %v3495_v52 = vrot.slane %v3494_v39, 2  ;;  %v3626_v32 = vadd.f32 %v3625_v27, %v3624_v58  ;;  %v3343_v31 = vrot.slane %v3342_v30, 4  ;;  %v3360_v26 = vadd.f32 %v3359_v37, %v3330_v53 }
 0x247   :  { %v3457_v33 = vadd.f32 %v3456_v18, %v3455_v49  ;;  %v3588_v25 = vrot.slane %v3587_v56, 2  ;;  %v3335_v57 = vadd.f32 %v3334_v28, %v3333_v24  ;;  %v3352_v8 = vrot.slane %v3351_v15, 4 }
 0x248   :  { %v3470_v48 = vadd.f32 %v3469_v0, %v3468_v11  ;;  %v3601_v35 = vrot.slane %v3600_v63, 2  ;;  %v3344_v14 = vadd.f32 %v3343_v31, %v3342_v30  ;;  %v3361_v19 = vrot.slane %v3360_v26, 4 }
 0x249   :  { %v3483_v45 = vadd.f32 %v3482_v1, %v3481_v40  ;;  %v3614_v55 = vrot.slane %v3613_v17, 2  ;;  %v3336_v59 = vrot.slane %v3335_v57, 2  ;;  %v3353_v12 = vadd.f32 %v3352_v8, %v3351_v15  ;;  %v9485_v8 = vld [vmem:[#allocation6_spill] sm:$0xff] }
 0x24a   :  { %v3496_v29 = vadd.f32 %v3495_v52, %v3494_v39  ;;  %v3627_v3 = vrot.slane %v3626_v32, 2  ;;  %v3345_v61 = vrot.slane %v3344_v14, 2  ;;  %v3362_v6 = vadd.f32 %v3361_v19, %v3360_v26 }
 0x24b   :  { %v3458_v13 = vrot.slane %v3457_v33, 1  ;;  %v3589_v50 = vadd.f32 %v3588_v25, %v3587_v56  ;;  %v3337_v47 = vadd.f32 %v3336_v59, %v3335_v57  ;;  %v3354_v20 = vrot.slane %v3353_v12, 2 }
 0x24c   :  { %v3602_v21 = vadd.f32 %v3601_v35, %v3600_v63  ;;  %v3346_v7 = vadd.f32 %v3345_v61, %v3344_v14  ;;  %v3471_v58 = vrot.slane %v3470_v48, 1  ;;  %v3363_v43 = vrot.slane %v3362_v6, 2 }
 0x24d   :  { %v3484_v2 = vrot.slane %v3483_v45, 1  ;;  %v3615_v42 = vadd.f32 %v3614_v55, %v3613_v17  ;;  %v3338_v49 = vrot.slane %v3337_v47, 1  ;;  %v3355_v5 = vadd.f32 %v3354_v20, %v3353_v12 }
 0x24e   :  { %v3628_v22 = vadd.f32 %v3627_v3, %v3626_v32  ;;  %v3347_v62 = vrot.slane %v3346_v7, 1  ;;  %v3364_v38 = vadd.f32 %v3363_v43, %v3362_v6  ;;  %v3497_v11 = vrot.slane %v3496_v29, 1 }
 0x24f   :  { %v3590_v46 = vrot.slane %v3589_v50, 1  ;;  %v3339_v4 = vadd.f32 %v3338_v49, %v3337_v47  ;;  %v3459_v51 = vadd.f32 %v3458_v13, %v3457_v33  ;;  %v3356_v9 = vrot.slane %v3355_v5, 1 }
 0x250   :  { %v3603_v40 = vrot.slane %v3602_v21, 1  ;;  %v3348_v10 = vadd.f32 %v3347_v62, %v3346_v7  ;;  %v3472_v34 = vadd.f32 %v3471_v58, %v3470_v48  ;;  %v3365_v44 = vrot.slane %v3364_v38, 1 }
 0x251   :  { %v3616_v41 = vrot.slane %v3615_v42, 1  ;;  %v3631_v39 = vsub.f32 %v3339_v4, %v3459_v51  ;;  %v3357_v27 = vadd.f32 %v3356_v9, %v3355_v5  ;;  %v3485_v37 = vadd.f32 %v3484_v2, %v3483_v45 }
 0x252   :  { %v3629_v60 = vrot.slane %v3628_v22, 1  ;;  %v3632_v36 = vsub.f32 %v3348_v10, %v3472_v34  ;;  %v3366_v18 = vadd.f32 %v3365_v44, %v3364_v38  ;;  %v3498_v56 = vadd.f32 %v3497_v11, %v3496_v29 }
 0x253   :  { %v3591_v24 = vadd.f32 %v3590_v46, %v3589_v50  ;;  %v3635_v23 = vmul.f32 0.5, %v3631_v39  ;;  %v3633_v54 = vsub.f32 %v3357_v27, %v3485_v37  ;;  %v3644_v0 = vstv %s7992_s0  ;;  %s4006_s0 = smov [#allocation3]  }
 0x254   :  { %v3604_v63 = vadd.f32 %v3603_v40, %v3602_v21  ;;  %v3636_v30 = vmul.f32 0.5, %v3632_v36  ;;  %v3634_v53 = vsub.f32 %v3366_v18, %v3498_v56  ;;  %v3657_v1 = vunpack.c.0.s8 %v7968_v16  ;;  %s3689_s8 = sshll.u32 %s4006_s0, 4  ;;  %s3690_s8 = int_to_ptr.vmem [resolvable:$true] %s3689_s8 }
 0x255   :  { %v3617_v17 = vadd.f32 %v3616_v41, %v3615_v42  ;;  %v3639_v28 = vadd.f32 %v3635_v23, %v3591_v24  ;;  %v3637_v15 = vmul.f32 0.5, %v3633_v54  ;;  %v3630_v52 = vadd.f32 %v3629_v60, %v3628_v22  ;;  %s3979_s9 = scalar_lea.vmem %s3690_s8, 64  ;;  %p3984_p1 = scmp.lt.s32.totalorder %s3690_s8, %s3690_s8 }
 0x256   :  { %v3640_v32 = vadd.f32 %v3636_v30, %v3604_v63  ;;  %v3638_v31 = vmul.f32 0.5, %v3634_v53  ;;  %v3660_v48 = vsub.s32 %v3657_v1, %v9485_v8  ;;  %v9486_v12 = vlaneseq  ;;  %p3980_p0 = scmp.ne.s32.totalorder %s3690_s8, %s3979_s9  ;;  %p3985_p2 = scmp.lt.s32.totalorder %s3979_s9, %s3979_s9 }
 0x257   :  { %v3641_v26 = vadd.f32 %v3637_v15, %v3617_v17  ;;  %v3645_v33 = vadd.f32 %v3644_v0, %v3639_v28 }
 0x258   :  { %v3642_v25 = vadd.f32 %v3638_v31, %v3630_v52  ;;  %v3646_v57 = vadd.f32 %v3644_v0, %v3640_v32  ;;  %vm3680_vm6 = vcmp.lt.s32.totalorder %v9486_v12, 512  ;;  %p3986_p3 = por %p3985_p2, %p3984_p1 }
 0x259   :  { %v3647_v35 = vadd.f32 %v3644_v0, %v3641_v26 }
 0x25a   :  { %v3648_v14 = vadd.f32 %v3644_v0, %v3642_v25  ;;  %v3653_v19 = vcombine.low %v3645_v33, %v3646_v57  ;;  %p3987_p4 = pnand %p3986_p3, %p3980_p0 }
 0x25c   :  { %v3654_v45 = vcombine.low %v3647_v35, %v3648_v14  ;;  %v3661_v55 = vrot.slane %v3653_v19, %v3660_v48 }
 0x25e   :  { %v3668_v59 = vrot.slane %v3654_v45, %v3660_v48 }
 0x260   :  { %v3669_v16 = vcombine.low %v3661_v55, %v3668_v59 }
 0x262   :  { %v3676_v29 = vrot.slane %v3669_v16, %v3660_v48 }
 0x264   :  { %3682 = vst.msk [vmem:[#allocation3] sm:$0xf] %vm3680_vm6, %v3676_v29 }
 0x265   :  { %3990 = shalt.err (!%p3987_p4)
}
 0x266   :  { %s3991_s11 = scalar_lea.hbm %s7998_s6, 64 }
 0x267   :  { %p3992_p5 = scmp.ne.s32.totalorder %s7998_s6, %s3991_s11  ;;  %p3995_p6 = scmp.lt.u32.totalorder %s3991_s11, %s7998_s6 }
 0x269   :  { %p3997_p7 = pnand %p3995_p6, %p3992_p5 }
 0x26b   :  { %4000 = shalt.err (!%p3997_p7)
}
 0x26c   :  { %3692 = dma.vmem_to_hbm [thread:$0]  %s3690_s8, 64, %s7998_s6, [#allocation4]  }
 0x26d   :  { %4001 = dma.done.wait [#allocation4], 64  }
 0x26e   :  { %4002 = vsyncadd [#allocation4], 4294967232 }
 0x26f   :  { %3696 = vsyncpa [#allocation4], 1 }

</bundles_post_ra>
